<compile_context>
chip_gen: v6e
topology: v6e:2x2x1
jax: 0.10.0
libtpu: 0.0.40
codegen_flags: <defaults>
</compile_context>

<pallas_src>
import jax
import jax.numpy as jnp
from jax.experimental import pallas as pl
from jax.experimental.pallas import tpu as pltpu

LN_EPS = 1e-5
BF16 = jnp.bfloat16


# ----------------------------------------------------------------------------
# In-kernel helpers
# ----------------------------------------------------------------------------
def _gelu(x):
    c = 0.7978845608028654  # sqrt(2/pi)
    return 0.5 * x * (1.0 + jnp.tanh(c * (x + 0.044715 * x * x * x)))


def _layernorm(y, g, b, eps=LN_EPS):
    mu = jnp.mean(y, axis=-1, keepdims=True)
    d = y - mu
    var = jnp.mean(d * d, axis=-1, keepdims=True)
    return d * jax.lax.rsqrt(var + eps) * g + b


# ----------------------------------------------------------------------------
# Pallas kernels (row-tiled: kernel(*row_refs, *const_refs, *out_refs))
# ----------------------------------------------------------------------------
def _message_mlp_kernel(x_yn_ref, x_e_ref, v1_ref,
                        w1a, w1b, w2, b2, w3, b3, o_ref):
    """h_message = W3(gelu(W2(gelu(W1@[h_Y|h_E|h_V] + b1)))) — bf16 output.
    v1_ref already holds h_V@w1c + b1 per row (bf16)."""
    acc = jnp.dot(x_yn_ref[...].astype(BF16), w1a[...],
                  preferred_element_type=jnp.float32)
    acc = acc + jnp.dot(x_e_ref[...].astype(BF16), w1b[...],
                        preferred_element_type=jnp.float32)
    h = _gelu(acc + v1_ref[...].astype(jnp.float32))
    h = _gelu(jnp.dot(h.astype(BF16), w2[...],
                      preferred_element_type=jnp.float32) + b2[...])
    msg = jnp.dot(h.astype(BF16), w3[...],
                  preferred_element_type=jnp.float32) + b3[...]
    o_ref[...] = msg.astype(o_ref.dtype)


def _post_scatter_fused_kernel(x_yn_ref, x_e_ref, dh_ref, v11_ref, mv_ref,
                               w_in, b_in, w_out, b_out,
                               w11a, w11b, w12, b12, w13, b13,
                               g1, bt1, g2, bt2, g3, bt3,
                               hy_ref, he_ref):
    """Fused: norm1(res) -> FFN -> norm2(res) -> mask_V -> W11..W13 msg MLP
    -> norm3(res on h_E). Two outputs (h_Y, h_E); all per-row."""
    # h_Y = norm1(h_Y + dh)
    y1 = _layernorm(x_yn_ref[...] + dh_ref[...], g1[...], bt1[...])
    # h_Y = mask_V * norm2(h_Y + FFN(h_Y))
    t = _gelu(jnp.dot(y1.astype(BF16), w_in[...],
                      preferred_element_type=jnp.float32) + b_in[...])
    y2 = y1 + jnp.dot(t.astype(BF16), w_out[...],
                      preferred_element_type=jnp.float32) + b_out[...]
    h_y = mv_ref[...] * _layernorm(y2, g2[...], bt2[...])
    hy_ref[...] = h_y.astype(hy_ref.dtype)
    # h_E = norm3(h_E + W13(gelu(W12(gelu(W11@[h_Y|h_E|h_V] + b11)))))
    acc = jnp.dot(h_y.astype(BF16), w11a[...],
                  preferred_element_type=jnp.float32)
    acc = acc + jnp.dot(x_e_ref[...].astype(BF16), w11b[...],
                        preferred_element_type=jnp.float32)
    h = _gelu(acc + v11_ref[...].astype(jnp.float32))
    h = _gelu(jnp.dot(h.astype(BF16), w12[...],
                      preferred_element_type=jnp.float32) + b12[...])
    msg = jnp.dot(h.astype(BF16), w13[...],
                  preferred_element_type=jnp.float32) + b13[...]
    he_ref[...] = _layernorm(x_e_ref[...] + msg, g3[...], bt3[...]).astype(he_ref.dtype)


# ----------------------------------------------------------------------------
# Row-tiled pallas_call wrapper
# ----------------------------------------------------------------------------
def _round_up(x, m):
    return ((x + m - 1) // m) * m


def _pick_tile(rows, tile_m):
    """Tile rows so per-tile VMEM is modest and the 1-D 'parallel' grid has
    >=2 steps (megacore on v7x) whenever rows allow it."""
    r8 = _round_up(max(rows, 8), 8)
    tm = min(tile_m, r8)
    if rows > tm:
        return tm
    if r8 >= 16:
        return _round_up((rows + 1) // 2, 8)
    return r8


def _pad_rows(a, mp):
    m = a.shape[0]
    return a if m == mp else jnp.pad(a, ((0, mp - m), (0, 0)))


def _row_call(kernel, row_arrays, const_arrays, out_dims, out_dtypes, tm, mp):
    """row_arrays: [mp, d_i] arrays tiled (tm, d_i); const_arrays: whole 2-D
    arrays (weights/biases/LN params) resident across all tiles."""
    grid = (mp // tm,)
    in_specs = ([pl.BlockSpec((tm, a.shape[1]), lambda i: (i, 0)) for a in row_arrays]
                + [pl.BlockSpec(c.shape, lambda i: (0, 0)) for c in const_arrays])
    out_shape = tuple(jax.ShapeDtypeStruct((mp, d), dt)
                      for d, dt in zip(out_dims, out_dtypes))
    out_specs = tuple(pl.BlockSpec((tm, d), lambda i: (i, 0)) for d in out_dims)
    single = len(out_dims) == 1
    res = pl.pallas_call(
        kernel,
        out_shape=out_shape[0] if single else out_shape,
        grid=grid,
        in_specs=in_specs,
        out_specs=out_specs[0] if single else out_specs,
        compiler_params=pltpu.CompilerParams(dimension_semantics=("parallel",)),
    )(*row_arrays, *const_arrays)
    return (res,) if single else res


# ----------------------------------------------------------------------------
# Parameters (torch Linear weights stored transposed as [in, out]; MXU weights
# pre-cast to bf16; the h_V slices of W1/W11 kept f32 for the per-residue
# precompute; biases (1, out) f32; LN params (1, H) f32)
# ----------------------------------------------------------------------------
def init_params(key, num_hidden=128, num_in=256):
    H = num_hidden
    E = num_in - H  # feature width of h_E_context
    keys = jax.random.split(key, 8)

    def lin(k, fin, fout):
        kw, kb = jax.random.split(k)
        w = jax.random.normal(kw, (fin, fout), jnp.float32) / jnp.sqrt(float(fin))
        b = 0.02 * jax.random.normal(kb, (1, fout), jnp.float32)
        return w, b

    w1, b1 = lin(keys[0], H + num_in, H)
    w2, b2 = lin(keys[1], H, H)
    w3, b3 = lin(keys[2], H, H)
    w11, b11 = lin(keys[3], H + num_in, H)
    w12, b12 = lin(keys[4], H, H)
    w13, b13 = lin(keys[5], H, H)
    w_in, b_in = lin(keys[6], H, 4 * H)
    w_out, b_out = lin(keys[7], 4 * H, H)

    bf = lambda w: w.astype(BF16)
    ones = jnp.ones((1, H), jnp.float32)
    zeros = jnp.zeros((1, H), jnp.float32)

    return {
        # W1 / W11 split over the virtual concat [h_Y_nodes | h_E_context | h_V]
        'w1a': bf(w1[:H]), 'w1b': bf(w1[H:H + E]), 'w1c': w1[H + E:], 'b1': b1,
        'w2': bf(w2), 'b2': b2, 'w3': bf(w3), 'b3': b3,
        'w11a': bf(w11[:H]), 'w11b': bf(w11[H:H + E]), 'w11c': w11[H + E:], 'b11': b11,
        'w12': bf(w12), 'b12': b12, 'w13': bf(w13), 'b13': b13,
        'w_in': bf(w_in), 'b_in': b_in, 'w_out': bf(w_out), 'b_out': b_out,
        'norm1_g': ones, 'norm1_b': zeros,
        'norm2_g': ones, 'norm2_b': zeros,
        'norm3_g': ones, 'norm3_b': zeros,
    }


# ----------------------------------------------------------------------------
# Forward (Protein2LigandLayer, eval mode: dropout = identity)
# ----------------------------------------------------------------------------
def protein2ligand_layer_forward(params, nn_idx, Y_scale, h_Y_nodes, h_E_context,
                                 h_V, mask_V=None, mask_attend=None, tile_m=512):
    p = params
    B, L, A, H = h_Y_nodes.shape
    E = h_E_context.shape[-1]
    # torch's `norm3(h_E_context + h_message)` already requires E == num_hidden.
    assert E == H, "h_E_context feature width must equal num_hidden"
    M_atoms = Y_scale.shape[1]
    rows = B * L * A

    tm = _pick_tile(rows, tile_m)
    mp = _round_up(rows, tm)

    # Row-major activations, padded once, reused by both kernels.
    x_yn = _pad_rows(h_Y_nodes.reshape(rows, H).astype(jnp.float32), mp)
    x_e = _pad_rows(h_E_context.reshape(rows, E).astype(jnp.float32), mp)

    # Per-residue h_V contribution to the W1 / W11 concats, precomputed once
    # ([B,L,H] matmuls) and streamed as bf16 instead of the A-fold f32 h_V
    # broadcast (half the bytes, one fewer K=128 dot per MLP kernel).
    hv = h_V.astype(jnp.float32)
    v1 = (jnp.einsum('blh,hk->blk', hv, p['w1c']) + p['b1'][0]).astype(BF16)
    v11 = (jnp.einsum('blh,hk->blk', hv, p['w11c']) + p['b11'][0]).astype(BF16)
    v1 = _pad_rows(jnp.broadcast_to(v1[:, :, None, :], (B, L, A, H)).reshape(rows, H), mp)
    v11 = _pad_rows(jnp.broadcast_to(v11[:, :, None, :], (B, L, A, H)).reshape(rows, H), mp)

    if mask_V is None:
        m_v = jnp.ones((mp, 1), jnp.float32)
    else:
        m_v = _pad_rows(jnp.broadcast_to(mask_V[:, :, None], (B, L, A))
                        .reshape(rows, 1).astype(jnp.float32), mp)

    # --- kernel 1: h_message = W3(gelu(W2(gelu(W1 [h_Y, h_E, h_V])))) --------
    (h_message,) = _row_call(
        _message_mlp_kernel,
        row_arrays=[x_yn, x_e, v1],
        const_arrays=[p['w1a'], p['w1b'], p['w2'], p['b2'], p['w3'], p['b3']],
        out_dims=[H], out_dtypes=[BF16], tm=tm, mp=mp)
    h_message = h_message[:rows].reshape(B, L, A, H).astype(jnp.float32)

    # --- scatter-add to atom slots, mean over residues, gather back ----------
    # TODO(synk): data-dependent scatter/gather kept in XLA, not Pallas.
    # mask_attend is applied here (fused by XLA into the scatter update);
    # scatter-add over atoms assumes nn_idx is unique within each residue
    # (same assumption the torch scatter_-then-sum path relies on).
    if mask_attend is not None:
        h_message = h_message * mask_attend[..., None].astype(jnp.float32)
    b_idx = jnp.arange(B)[:, None, None]
    dh_atoms = jnp.zeros((B, M_atoms, H), jnp.float32).at[b_idx, nn_idx].add(h_message)
    dh_atoms = dh_atoms / Y_scale[:, :, None]
    dh = dh_atoms[b_idx, nn_idx]                       # [B, L, A, H] gather-back
    dh = _pad_rows(dh.reshape(rows, H), mp)

    # --- kernel 2 (fused): norm1 -> FFN -> norm2 -> mask_V -> W11..W13 -> norm3
    h_Y, h_E = _row_call(
        _post_scatter_fused_kernel,
        row_arrays=[x_yn, x_e, dh, v11, m_v],
        const_arrays=[p['w_in'], p['b_in'], p['w_out'], p['b_out'],
                      p['w11a'], p['w11b'], p['w12'], p['b12'], p['w13'], p['b13'],
                      p['norm1_g'], p['norm1_b'], p['norm2_g'], p['norm2_b'],
                      p['norm3_g'], p['norm3_b']],
        out_dims=[H, H], out_dtypes=[jnp.float32, jnp.float32], tm=tm, mp=mp)

    return h_Y[:rows].reshape(B, L, A, H), h_E[:rows].reshape(B, L, A, H)


# ----------------------------------------------------------------------------
# Main
# ----------------------------------------------------------------------------
if __name__ == "__main__":
    key = jax.random.PRNGKey(0)
    ks = jax.random.split(key, 7)

    B, L, A, M_ATOMS, H = 2, 8, 10, 16, 128
    NUM_IN = 2 * H   # h_E_context width (128) + h_V width (128)

    h_Y_nodes = jax.random.normal(ks[0], (B, L, A, H), jnp.float32)
    h_E_context = jax.random.normal(ks[1], (B, L, A, H), jnp.float32)
    h_V = jax.random.normal(ks[2], (B, L, H), jnp.float32)
    # unique neighbor-atom indices per residue (matches torch scatter_ usage)
    nn_idx = jnp.argsort(jax.random.uniform(ks[3], (B, L, M_ATOMS)),
                         axis=-1)[..., :A].astype(jnp.int32)
    Y_scale = jax.random.randint(ks[4], (B, M_ATOMS), 1, 5).astype(jnp.float32)
    mask_V = (jax.random.uniform(ks[5], (B, L)) > 0.1).astype(jnp.float32)
    mask_attend = (jax.random.uniform(ks[6], (B, L, A)) > 0.2).astype(jnp.float32)

    params = init_params(jax.random.PRNGKey(42), num_hidden=H, num_in=NUM_IN)

    @jax.jit
    def run(params, nn_idx, Y_scale, h_Y_nodes, h_E_context, h_V, mask_V, mask_attend):
        return protein2ligand_layer_forward(params, nn_idx, Y_scale, h_Y_nodes,
                                            h_E_context, h_V,
                                            mask_V=mask_V, mask_attend=mask_attend)

    h_Y_out, h_E_out = run(params, nn_idx, Y_scale, h_Y_nodes, h_E_context,
                           h_V, mask_V, mask_attend)
    jax.block_until_ready(h_Y_out)
    jax.block_until_ready(h_E_out)

    assert h_Y_out.shape == (B, L, A, H)
    assert h_E_out.shape == (B, L, A, H)
    assert bool(jnp.all(jnp.isfinite(h_Y_out))) and bool(jnp.all(jnp.isfinite(h_E_out)))
    print("KERNEL_OK")
</pallas_src>

<mosaic_0001>
module attributes {stable_mosaic.version = 11 : i64} {
  func.func @_message_mlp_kernel(%arg0: i32, %arg1: memref<80x128xf32, #tpu.memory_space<vmem>>, %arg2: memref<80x128xf32, #tpu.memory_space<vmem>>, %arg3: memref<80x128xbf16, #tpu.memory_space<vmem>>, %arg4: memref<128x128xbf16, #tpu.memory_space<vmem>>, %arg5: memref<128x128xbf16, #tpu.memory_space<vmem>>, %arg6: memref<128x128xbf16, #tpu.memory_space<vmem>>, %arg7: memref<1x128xf32, #tpu.memory_space<vmem>>, %arg8: memref<128x128xbf16, #tpu.memory_space<vmem>>, %arg9: memref<1x128xf32, #tpu.memory_space<vmem>>, %arg10: memref<80x128xbf16, #tpu.memory_space<vmem>>) attributes {dimension_semantics = [#tpu.dimension_semantics<parallel>], iteration_bounds = array<i64: 2>, scalar_prefetch = 0 : i64, scratch_operands = 0 : i64, tpu.core_type = #tpu.core_type<tc>, window_params = [{transform_indices = @transform_0, window_bounds = array<i64: 80, 128>}, {transform_indices = @transform_1, window_bounds = array<i64: 80, 128>}, {transform_indices = @transform_2, window_bounds = array<i64: 80, 128>}, {pipeline_mode = #tpu.pipeline_mode<synchronous>, transform_indices = @transform_3, window_bounds = array<i64: 128, 128>}, {pipeline_mode = #tpu.pipeline_mode<synchronous>, transform_indices = @transform_4, window_bounds = array<i64: 128, 128>}, {pipeline_mode = #tpu.pipeline_mode<synchronous>, transform_indices = @transform_5, window_bounds = array<i64: 128, 128>}, {pipeline_mode = #tpu.pipeline_mode<synchronous>, transform_indices = @transform_6, window_bounds = array<i64: 1, 128>}, {pipeline_mode = #tpu.pipeline_mode<synchronous>, transform_indices = @transform_7, window_bounds = array<i64: 128, 128>}, {pipeline_mode = #tpu.pipeline_mode<synchronous>, transform_indices = @transform_8, window_bounds = array<i64: 1, 128>}, {transform_indices = @transform_9, window_bounds = array<i64: 80, 128>}]} {
    %c0 = arith.constant 0 : index
    %c0_0 = arith.constant 0 : index
    %0 = vector.load %arg1[%c0, %c0_0] : memref<80x128xf32, #tpu.memory_space<vmem>>, vector<80x128xf32>
    %1 = arith.truncf %0 : vector<80x128xf32> to vector<80x128xbf16>
    %c0_1 = arith.constant 0 : index
    %c0_2 = arith.constant 0 : index
    %2 = vector.load %arg4[%c0_1, %c0_2] : memref<128x128xbf16, #tpu.memory_space<vmem>>, vector<128x128xbf16>
    %cst = arith.constant dense<0.000000e+00> : vector<80x128xf32>
    %3 = tpu.matmul %1, %2, %cst {dimension_numbers = #tpu.dot_dimension_numbers<[1], [0], [0], [1], [0, 0, 1, 1], [], []>} : vector<80x128xbf16>, vector<128x128xbf16>, vector<80x128xf32> -> vector<80x128xf32>
    %c0_3 = arith.constant 0 : index
    %c0_4 = arith.constant 0 : index
    %4 = vector.load %arg2[%c0_3, %c0_4] : memref<80x128xf32, #tpu.memory_space<vmem>>, vector<80x128xf32>
    %5 = arith.truncf %4 : vector<80x128xf32> to vector<80x128xbf16>
    %c0_5 = arith.constant 0 : index
    %c0_6 = arith.constant 0 : index
    %6 = vector.load %arg5[%c0_5, %c0_6] : memref<128x128xbf16, #tpu.memory_space<vmem>>, vector<128x128xbf16>
    %cst_7 = arith.constant dense<0.000000e+00> : vector<80x128xf32>
    %7 = tpu.matmul %5, %6, %cst_7 {dimension_numbers = #tpu.dot_dimension_numbers<[1], [0], [0], [1], [0, 0, 1, 1], [], []>} : vector<80x128xbf16>, vector<128x128xbf16>, vector<80x128xf32> -> vector<80x128xf32>
    %8 = arith.addf %3, %7 : vector<80x128xf32>
    %c0_8 = arith.constant 0 : index
    %c0_9 = arith.constant 0 : index
    %9 = vector.load %arg3[%c0_8, %c0_9] : memref<80x128xbf16, #tpu.memory_space<vmem>>, vector<80x128xbf16>
    %10 = arith.extf %9 : vector<80x128xbf16> to vector<80x128xf32>
    %11 = arith.addf %8, %10 : vector<80x128xf32>
    %cst_10 = arith.constant 5.000000e-01 : f32
    %12 = vector.broadcast %cst_10 : f32 to vector<80x128xf32>
    %13 = arith.mulf %12, %11 : vector<80x128xf32>
    %cst_11 = arith.constant 4.471500e-02 : f32
    %14 = vector.broadcast %cst_11 : f32 to vector<80x128xf32>
    %15 = arith.mulf %14, %11 : vector<80x128xf32>
    %16 = arith.mulf %15, %11 : vector<80x128xf32>
    %17 = arith.mulf %16, %11 : vector<80x128xf32>
    %18 = arith.addf %11, %17 : vector<80x128xf32>
    %cst_12 = arith.constant 0.797884583 : f32
    %19 = vector.broadcast %cst_12 : f32 to vector<80x128xf32>
    %20 = arith.mulf %19, %18 : vector<80x128xf32>
    %21 = math.tanh %20 : vector<80x128xf32>
    %cst_13 = arith.constant 1.000000e+00 : f32
    %22 = vector.broadcast %cst_13 : f32 to vector<80x128xf32>
    %23 = arith.addf %22, %21 : vector<80x128xf32>
    %24 = arith.mulf %13, %23 : vector<80x128xf32>
    %25 = arith.truncf %24 : vector<80x128xf32> to vector<80x128xbf16>
    %c0_14 = arith.constant 0 : index
    %c0_15 = arith.constant 0 : index
    %26 = vector.load %arg6[%c0_14, %c0_15] : memref<128x128xbf16, #tpu.memory_space<vmem>>, vector<128x128xbf16>
    %cst_16 = arith.constant dense<0.000000e+00> : vector<80x128xf32>
    %27 = tpu.matmul %25, %26, %cst_16 {dimension_numbers = #tpu.dot_dimension_numbers<[1], [0], [0], [1], [0, 0, 1, 1], [], []>} : vector<80x128xbf16>, vector<128x128xbf16>, vector<80x128xf32> -> vector<80x128xf32>
    %c0_17 = arith.constant 0 : index
    %c0_18 = arith.constant 0 : index
    %28 = vector.load %arg7[%c0_17, %c0_18] : memref<1x128xf32, #tpu.memory_space<vmem>>, vector<1x128xf32>
    %29 = vector.broadcast %28 : vector<1x128xf32> to vector<80x128xf32>
    %30 = arith.addf %27, %29 : vector<80x128xf32>
    %cst_19 = arith.constant 5.000000e-01 : f32
    %31 = vector.broadcast %cst_19 : f32 to vector<80x128xf32>
    %32 = arith.mulf %31, %30 : vector<80x128xf32>
    %cst_20 = arith.constant 4.471500e-02 : f32
    %33 = vector.broadcast %cst_20 : f32 to vector<80x128xf32>
    %34 = arith.mulf %33, %30 : vector<80x128xf32>
    %35 = arith.mulf %34, %30 : vector<80x128xf32>
    %36 = arith.mulf %35, %30 : vector<80x128xf32>
    %37 = arith.addf %30, %36 : vector<80x128xf32>
    %cst_21 = arith.constant 0.797884583 : f32
    %38 = vector.broadcast %cst_21 : f32 to vector<80x128xf32>
    %39 = arith.mulf %38, %37 : vector<80x128xf32>
    %40 = math.tanh %39 : vector<80x128xf32>
    %cst_22 = arith.constant 1.000000e+00 : f32
    %41 = vector.broadcast %cst_22 : f32 to vector<80x128xf32>
    %42 = arith.addf %41, %40 : vector<80x128xf32>
    %43 = arith.mulf %32, %42 : vector<80x128xf32>
    %44 = arith.truncf %43 : vector<80x128xf32> to vector<80x128xbf16>
    %c0_23 = arith.constant 0 : index
    %c0_24 = arith.constant 0 : index
    %45 = vector.load %arg8[%c0_23, %c0_24] : memref<128x128xbf16, #tpu.memory_space<vmem>>, vector<128x128xbf16>
    %cst_25 = arith.constant dense<0.000000e+00> : vector<80x128xf32>
    %46 = tpu.matmul %44, %45, %cst_25 {dimension_numbers = #tpu.dot_dimension_numbers<[1], [0], [0], [1], [0, 0, 1, 1], [], []>} : vector<80x128xbf16>, vector<128x128xbf16>, vector<80x128xf32> -> vector<80x128xf32>
    %c0_26 = arith.constant 0 : index
    %c0_27 = arith.constant 0 : index
    %47 = vector.load %arg9[%c0_26, %c0_27] : memref<1x128xf32, #tpu.memory_space<vmem>>, vector<1x128xf32>
    %48 = vector.broadcast %47 : vector<1x128xf32> to vector<80x128xf32>
    %49 = arith.addf %46, %48 : vector<80x128xf32>
    %50 = arith.truncf %49 : vector<80x128xf32> to vector<80x128xbf16>
    %c0_28 = arith.constant 0 : index
    %c0_29 = arith.constant 0 : index
    %51 = vector.load %arg10[%c0_28, %c0_29] : memref<80x128xbf16, #tpu.memory_space<vmem>>, vector<80x128xbf16>
    tpu.vector_store %arg10[%c0_28, %c0_29], %50 {strides = array<i32>} : memref<80x128xbf16, #tpu.memory_space<vmem>>, vector<80x128xbf16>,
    return
  }
  func.func @transform_0(%arg0: i32) -> (i32, i32) {
    %c0_i32 = arith.constant 0 : i32
    %c0_i32_0 = arith.constant 0 : i32
    return %arg0, %c0_i32 : i32, i32
  }
  func.func @transform_1(%arg0: i32) -> (i32, i32) {
    %c0_i32 = arith.constant 0 : i32
    %c0_i32_0 = arith.constant 0 : i32
    return %arg0, %c0_i32 : i32, i32
  }
  func.func @transform_2(%arg0: i32) -> (i32, i32) {
    %c0_i32 = arith.constant 0 : i32
    %c0_i32_0 = arith.constant 0 : i32
    return %arg0, %c0_i32 : i32, i32
  }
  func.func @transform_3(%arg0: i32) -> (i32, i32) {
    %c0_i32 = arith.constant 0 : i32
    %c0_i32_0 = arith.constant 0 : i32
    %c0_i32_1 = arith.constant 0 : i32
    return %c0_i32, %c0_i32_0 : i32, i32
  }
  func.func @transform_4(%arg0: i32) -> (i32, i32) {
    %c0_i32 = arith.constant 0 : i32
    %c0_i32_0 = arith.constant 0 : i32
    %c0_i32_1 = arith.constant 0 : i32
    return %c0_i32, %c0_i32_0 : i32, i32
  }
  func.func @transform_5(%arg0: i32) -> (i32, i32) {
    %c0_i32 = arith.constant 0 : i32
    %c0_i32_0 = arith.constant 0 : i32
    %c0_i32_1 = arith.constant 0 : i32
    return %c0_i32, %c0_i32_0 : i32, i32
  }
  func.func @transform_6(%arg0: i32) -> (i32, i32) {
    %c0_i32 = arith.constant 0 : i32
    %c0_i32_0 = arith.constant 0 : i32
    %c0_i32_1 = arith.constant 0 : i32
    return %c0_i32, %c0_i32_0 : i32, i32
  }
  func.func @transform_7(%arg0: i32) -> (i32, i32) {
    %c0_i32 = arith.constant 0 : i32
    %c0_i32_0 = arith.constant 0 : i32
    %c0_i32_1 = arith.constant 0 : i32
    return %c0_i32, %c0_i32_0 : i32, i32
  }
  func.func @transform_8(%arg0: i32) -> (i32, i32) {
    %c0_i32 = arith.constant 0 : i32
    %c0_i32_0 = arith.constant 0 : i32
    %c0_i32_1 = arith.constant 0 : i32
    return %c0_i32, %c0_i32_0 : i32, i32
  }
  func.func @transform_9(%arg0: i32) -> (i32, i32) {
    %c0_i32 = arith.constant 0 : i32
    %c0_i32_0 = arith.constant 0 : i32
    return %arg0, %c0_i32 : i32, i32
  }
}

module attributes {stable_mosaic.version = 11 : i64} {
  func.func @_post_scatter_fused_kernel(%arg0: i32, %arg1: memref<80x128xf32, #tpu.memory_space<vmem>>, %arg2: memref<80x128xf32, #tpu.memory_space<vmem>>, %arg3: memref<80x128xf32, #tpu.memory_space<vmem>>, %arg4: memref<80x128xbf16, #tpu.memory_space<vmem>>, %arg5: memref<80x1xf32, #tpu.memory_space<vmem>>, %arg6: memref<128x512xbf16, #tpu.memory_space<vmem>>, %arg7: memref<1x512xf32, #tpu.memory_space<vmem>>, %arg8: memref<512x128xbf16, #tpu.memory_space<vmem>>, %arg9: memref<1x128xf32, #tpu.memory_space<vmem>>, %arg10: memref<128x128xbf16, #tpu.memory_space<vmem>>, %arg11: memref<128x128xbf16, #tpu.memory_space<vmem>>, %arg12: memref<128x128xbf16, #tpu.memory_space<vmem>>, %arg13: memref<1x128xf32, #tpu.memory_space<vmem>>, %arg14: memref<128x128xbf16, #tpu.memory_space<vmem>>, %arg15: memref<1x128xf32, #tpu.memory_space<vmem>>, %arg16: memref<1x128xf32, #tpu.memory_space<vmem>>, %arg17: memref<1x128xf32, #tpu.memory_space<vmem>>, %arg18: memref<1x128xf32, #tpu.memory_space<vmem>>, %arg19: memref<1x128xf32, #tpu.memory_space<vmem>>, %arg20: memref<1x128xf32, #tpu.memory_space<vmem>>, %arg21: memref<1x128xf32, #tpu.memory_space<vmem>>, %arg22: memref<80x128xf32, #tpu.memory_space<vmem>>, %arg23: memref<80x128xf32, #tpu.memory_space<vmem>>) attributes {dimension_semantics = [#tpu.dimension_semantics<parallel>], iteration_bounds = array<i64: 2>, scalar_prefetch = 0 : i64, scratch_operands = 0 : i64, tpu.core_type = #tpu.core_type<tc>, window_params = [{transform_indices = @transform_0, window_bounds = array<i64: 80, 128>}, {transform_indices = @transform_1, window_bounds = array<i64: 80, 128>}, {transform_indices = @transform_2, window_bounds = array<i64: 80, 128>}, {transform_indices = @transform_3, window_bounds = array<i64: 80, 128>}, {transform_indices = @transform_4, window_bounds = array<i64: 80, 1>}, {pipeline_mode = #tpu.pipeline_mode<synchronous>, transform_indices = @transform_5, window_bounds = array<i64: 128, 512>}, {pipeline_mode = #tpu.pipeline_mode<synchronous>, transform_indices = @transform_6, window_bounds = array<i64: 1, 512>}, {pipeline_mode = #tpu.pipeline_mode<synchronous>, transform_indices = @transform_7, window_bounds = array<i64: 512, 128>}, {pipeline_mode = #tpu.pipeline_mode<synchronous>, transform_indices = @transform_8, window_bounds = array<i64: 1, 128>}, {pipeline_mode = #tpu.pipeline_mode<synchronous>, transform_indices = @transform_9, window_bounds = array<i64: 128, 128>}, {pipeline_mode = #tpu.pipeline_mode<synchronous>, transform_indices = @transform_10, window_bounds = array<i64: 128, 128>}, {pipeline_mode = #tpu.pipeline_mode<synchronous>, transform_indices = @transform_11, window_bounds = array<i64: 128, 128>}, {pipeline_mode = #tpu.pipeline_mode<synchronous>, transform_indices = @transform_12, window_bounds = array<i64: 1, 128>}, {pipeline_mode = #tpu.pipeline_mode<synchronous>, transform_indices = @transform_13, window_bounds = array<i64: 128, 128>}, {pipeline_mode = #tpu.pipeline_mode<synchronous>, transform_indices = @transform_14, window_bounds = array<i64: 1, 128>}, {pipeline_mode = #tpu.pipeline_mode<synchronous>, transform_indices = @transform_15, window_bounds = array<i64: 1, 128>}, {pipeline_mode = #tpu.pipeline_mode<synchronous>, transform_indices = @transform_16, window_bounds = array<i64: 1, 128>}, {pipeline_mode = #tpu.pipeline_mode<synchronous>, transform_indices = @transform_17, window_bounds = array<i64: 1, 128>}, {pipeline_mode = #tpu.pipeline_mode<synchronous>, transform_indices = @transform_18, window_bounds = array<i64: 1, 128>}, {pipeline_mode = #tpu.pipeline_mode<synchronous>, transform_indices = @transform_19, window_bounds = array<i64: 1, 128>}, {pipeline_mode = #tpu.pipeline_mode<synchronous>, transform_indices = @transform_20, window_bounds = array<i64: 1, 128>}, {transform_indices = @transform_21, window_bounds = array<i64: 80, 128>}, {transform_indices = @transform_22, window_bounds = array<i64: 80, 128>}]} {
    %c0 = arith.constant 0 : index
    %c0_0 = arith.constant 0 : index
    %0 = vector.load %arg1[%c0, %c0_0] : memref<80x128xf32, #tpu.memory_space<vmem>>, vector<80x128xf32>
    %c0_1 = arith.constant 0 : index
    %c0_2 = arith.constant 0 : index
    %1 = vector.load %arg3[%c0_1, %c0_2] : memref<80x128xf32, #tpu.memory_space<vmem>>, vector<80x128xf32>
    %2 = arith.addf %0, %1 : vector<80x128xf32>
    %c0_3 = arith.constant 0 : index
    %c0_4 = arith.constant 0 : index
    %3 = vector.load %arg16[%c0_3, %c0_4] : memref<1x128xf32, #tpu.memory_space<vmem>>, vector<1x128xf32>
    %c0_5 = arith.constant 0 : index
    %c0_6 = arith.constant 0 : index
    %4 = vector.load %arg17[%c0_5, %c0_6] : memref<1x128xf32, #tpu.memory_space<vmem>>, vector<1x128xf32>
    %cst = arith.constant dense<0.000000e+00> : vector<80xf32>
    %5 = vector.multi_reduction <add>, %2, %cst [1] : vector<80x128xf32> to vector<80xf32>
    %6 = vector.shape_cast %5 : vector<80xf32> to vector<80x1xf32>
    %cst_7 = arith.constant 1.280000e+02 : f32
    %7 = vector.broadcast %cst_7 : f32 to vector<80x1xf32>
    %8 = arith.divf %6, %7 : vector<80x1xf32>
    %9 = vector.broadcast %8 : vector<80x1xf32> to vector<80x128xf32>
    %10 = arith.subf %2, %9 : vector<80x128xf32>
    %11 = arith.mulf %10, %10 : vector<80x128xf32>
    %cst_8 = arith.constant dense<0.000000e+00> : vector<80xf32>
    %12 = vector.multi_reduction <add>, %11, %cst_8 [1] : vector<80x128xf32> to vector<80xf32>
    %13 = vector.shape_cast %12 : vector<80xf32> to vector<80x1xf32>
    %cst_9 = arith.constant 1.280000e+02 : f32
    %14 = vector.broadcast %cst_9 : f32 to vector<80x1xf32>
    %15 = arith.divf %13, %14 : vector<80x1xf32>
    %cst_10 = arith.constant 9.99999974E-6 : f32
    %16 = vector.broadcast %cst_10 : f32 to vector<80x1xf32>
    %17 = arith.addf %15, %16 : vector<80x1xf32>
    %18 = math.rsqrt %17 : vector<80x1xf32>
    %19 = vector.broadcast %18 : vector<80x1xf32> to vector<80x128xf32>
    %20 = arith.mulf %10, %19 : vector<80x128xf32>
    %21 = vector.broadcast %3 : vector<1x128xf32> to vector<80x128xf32>
    %22 = arith.mulf %20, %21 : vector<80x128xf32>
    %23 = vector.broadcast %4 : vector<1x128xf32> to vector<80x128xf32>
    %24 = arith.addf %22, %23 : vector<80x128xf32>
    %25 = arith.truncf %24 : vector<80x128xf32> to vector<80x128xbf16>
    %c0_11 = arith.constant 0 : index
    %c0_12 = arith.constant 0 : index
    %26 = vector.load %arg6[%c0_11, %c0_12] : memref<128x512xbf16, #tpu.memory_space<vmem>>, vector<128x512xbf16>
    %cst_13 = arith.constant dense<0.000000e+00> : vector<80x512xf32>
    %27 = tpu.matmul %25, %26, %cst_13 {dimension_numbers = #tpu.dot_dimension_numbers<[1], [0], [0], [1], [0, 0, 1, 1], [], []>} : vector<80x128xbf16>, vector<128x512xbf16>, vector<80x512xf32> -> vector<80x512xf32>
    %c0_14 = arith.constant 0 : index
    %c0_15 = arith.constant 0 : index
    %28 = vector.load %arg7[%c0_14, %c0_15] : memref<1x512xf32, #tpu.memory_space<vmem>>, vector<1x512xf32>
    %29 = vector.broadcast %28 : vector<1x512xf32> to vector<80x512xf32>
    %30 = arith.addf %27, %29 : vector<80x512xf32>
    %cst_16 = arith.constant 5.000000e-01 : f32
    %31 = vector.broadcast %cst_16 : f32 to vector<80x512xf32>
    %32 = arith.mulf %31, %30 : vector<80x512xf32>
    %cst_17 = arith.constant 4.471500e-02 : f32
    %33 = vector.broadcast %cst_17 : f32 to vector<80x512xf32>
    %34 = arith.mulf %33, %30 : vector<80x512xf32>
    %35 = arith.mulf %34, %30 : vector<80x512xf32>
    %36 = arith.mulf %35, %30 : vector<80x512xf32>
    %37 = arith.addf %30, %36 : vector<80x512xf32>
    %cst_18 = arith.constant 0.797884583 : f32
    %38 = vector.broadcast %cst_18 : f32 to vector<80x512xf32>
    %39 = arith.mulf %38, %37 : vector<80x512xf32>
    %40 = math.tanh %39 : vector<80x512xf32>
    %cst_19 = arith.constant 1.000000e+00 : f32
    %41 = vector.broadcast %cst_19 : f32 to vector<80x512xf32>
    %42 = arith.addf %41, %40 : vector<80x512xf32>
    %43 = arith.mulf %32, %42 : vector<80x512xf32>
    %44 = arith.truncf %43 : vector<80x512xf32> to vector<80x512xbf16>
    %c0_20 = arith.constant 0 : index
    %c0_21 = arith.constant 0 : index
    %45 = vector.load %arg8[%c0_20, %c0_21] : memref<512x128xbf16, #tpu.memory_space<vmem>>, vector<512x128xbf16>
    %cst_22 = arith.constant dense<0.000000e+00> : vector<80x128xf32>
    %46 = tpu.matmul %44, %45, %cst_22 {dimension_numbers = #tpu.dot_dimension_numbers<[1], [0], [0], [1], [0, 0, 1, 1], [], []>} : vector<80x512xbf16>, vector<512x128xbf16>, vector<80x128xf32> -> vector<80x128xf32>
    %47 = arith.addf %24, %46 : vector<80x128xf32>
    %c0_23 = arith.constant 0 : index
    %c0_24 = arith.constant 0 : index
    %48 = vector.load %arg9[%c0_23, %c0_24] : memref<1x128xf32, #tpu.memory_space<vmem>>, vector<1x128xf32>
    %49 = vector.broadcast %48 : vector<1x128xf32> to vector<80x128xf32>
    %50 = arith.addf %47, %49 : vector<80x128xf32>
    %c0_25 = arith.constant 0 : index
    %c0_26 = arith.constant 0 : index
    %51 = vector.load %arg5[%c0_25, %c0_26] : memref<80x1xf32, #tpu.memory_space<vmem>>, vector<80x1xf32>
    %c0_27 = arith.constant 0 : index
    %c0_28 = arith.constant 0 : index
    %52 = vector.load %arg18[%c0_27, %c0_28] : memref<1x128xf32, #tpu.memory_space<vmem>>, vector<1x128xf32>
    %c0_29 = arith.constant 0 : index
    %c0_30 = arith.constant 0 : index
    %53 = vector.load %arg19[%c0_29, %c0_30] : memref<1x128xf32, #tpu.memory_space<vmem>>, vector<1x128xf32>
    %cst_31 = arith.constant dense<0.000000e+00> : vector<80xf32>
    %54 = vector.multi_reduction <add>, %50, %cst_31 [1] : vector<80x128xf32> to vector<80xf32>
    %55 = vector.shape_cast %54 : vector<80xf32> to vector<80x1xf32>
    %cst_32 = arith.constant 1.280000e+02 : f32
    %56 = vector.broadcast %cst_32 : f32 to vector<80x1xf32>
    %57 = arith.divf %55, %56 : vector<80x1xf32>
    %58 = vector.broadcast %57 : vector<80x1xf32> to vector<80x128xf32>
    %59 = arith.subf %50, %58 : vector<80x128xf32>
    %60 = arith.mulf %59, %59 : vector<80x128xf32>
    %cst_33 = arith.constant dense<0.000000e+00> : vector<80xf32>
    %61 = vector.multi_reduction <add>, %60, %cst_33 [1] : vector<80x128xf32> to vector<80xf32>
    %62 = vector.shape_cast %61 : vector<80xf32> to vector<80x1xf32>
    %cst_34 = arith.constant 1.280000e+02 : f32
    %63 = vector.broadcast %cst_34 : f32 to vector<80x1xf32>
    %64 = arith.divf %62, %63 : vector<80x1xf32>
    %cst_35 = arith.constant 9.99999974E-6 : f32
    %65 = vector.broadcast %cst_35 : f32 to vector<80x1xf32>
    %66 = arith.addf %64, %65 : vector<80x1xf32>
    %67 = math.rsqrt %66 : vector<80x1xf32>
    %68 = vector.broadcast %67 : vector<80x1xf32> to vector<80x128xf32>
    %69 = arith.mulf %59, %68 : vector<80x128xf32>
    %70 = vector.broadcast %52 : vector<1x128xf32> to vector<80x128xf32>
    %71 = arith.mulf %69, %70 : vector<80x128xf32>
    %72 = vector.broadcast %53 : vector<1x128xf32> to vector<80x128xf32>
    %73 = arith.addf %71, %72 : vector<80x128xf32>
    %74 = vector.broadcast %51 : vector<80x1xf32> to vector<80x128xf32>
    %75 = arith.mulf %74, %73 : vector<80x128xf32>
    %c0_36 = arith.constant 0 : index
    %c0_37 = arith.constant 0 : index
    %76 = vector.load %arg22[%c0_36, %c0_37] : memref<80x128xf32, #tpu.memory_space<vmem>>, vector<80x128xf32>
    tpu.vector_store %arg22[%c0_36, %c0_37], %75 {strides = array<i32>} : memref<80x128xf32, #tpu.memory_space<vmem>>, vector<80x128xf32>,
    %77 = arith.truncf %75 : vector<80x128xf32> to vector<80x128xbf16>
    %c0_38 = arith.constant 0 : index
    %c0_39 = arith.constant 0 : index
    %78 = vector.load %arg10[%c0_38, %c0_39] : memref<128x128xbf16, #tpu.memory_space<vmem>>, vector<128x128xbf16>
    %cst_40 = arith.constant dense<0.000000e+00> : vector<80x128xf32>
    %79 = tpu.matmul %77, %78, %cst_40 {dimension_numbers = #tpu.dot_dimension_numbers<[1], [0], [0], [1], [0, 0, 1, 1], [], []>} : vector<80x128xbf16>, vector<128x128xbf16>, vector<80x128xf32> -> vector<80x128xf32>
    %c0_41 = arith.constant 0 : index
    %c0_42 = arith.constant 0 : index
    %80 = vector.load %arg2[%c0_41, %c0_42] : memref<80x128xf32, #tpu.memory_space<vmem>>, vector<80x128xf32>
    %81 = arith.truncf %80 : vector<80x128xf32> to vector<80x128xbf16>
    %c0_43 = arith.constant 0 : index
    %c0_44 = arith.constant 0 : index
    %82 = vector.load %arg11[%c0_43, %c0_44] : memref<128x128xbf16, #tpu.memory_space<vmem>>, vector<128x128xbf16>
    %cst_45 = arith.constant dense<0.000000e+00> : vector<80x128xf32>
    %83 = tpu.matmul %81, %82, %cst_45 {dimension_numbers = #tpu.dot_dimension_numbers<[1], [0], [0], [1], [0, 0, 1, 1], [], []>} : vector<80x128xbf16>, vector<128x128xbf16>, vector<80x128xf32> -> vector<80x128xf32>
    %84 = arith.addf %79, %83 : vector<80x128xf32>
    %c0_46 = arith.constant 0 : index
    %c0_47 = arith.constant 0 : index
    %85 = vector.load %arg4[%c0_46, %c0_47] : memref<80x128xbf16, #tpu.memory_space<vmem>>, vector<80x128xbf16>
    %86 = arith.extf %85 : vector<80x128xbf16> to vector<80x128xf32>
    %87 = arith.addf %84, %86 : vector<80x128xf32>
    %cst_48 = arith.constant 5.000000e-01 : f32
    %88 = vector.broadcast %cst_48 : f32 to vector<80x128xf32>
    %89 = arith.mulf %88, %87 : vector<80x128xf32>
    %cst_49 = arith.constant 4.471500e-02 : f32
    %90 = vector.broadcast %cst_49 : f32 to vector<80x128xf32>
    %91 = arith.mulf %90, %87 : vector<80x128xf32>
    %92 = arith.mulf %91, %87 : vector<80x128xf32>
    %93 = arith.mulf %92, %87 : vector<80x128xf32>
    %94 = arith.addf %87, %93 : vector<80x128xf32>
    %cst_50 = arith.constant 0.797884583 : f32
    %95 = vector.broadcast %cst_50 : f32 to vector<80x128xf32>
    %96 = arith.mulf %95, %94 : vector<80x128xf32>
    %97 = math.tanh %96 : vector<80x128xf32>
    %cst_51 = arith.constant 1.000000e+00 : f32
    %98 = vector.broadcast %cst_51 : f32 to vector<80x128xf32>
    %99 = arith.addf %98, %97 : vector<80x128xf32>
    %100 = arith.mulf %89, %99 : vector<80x128xf32>
    %101 = arith.truncf %100 : vector<80x128xf32> to vector<80x128xbf16>
    %c0_52 = arith.constant 0 : index
    %c0_53 = arith.constant 0 : index
    %102 = vector.load %arg12[%c0_52, %c0_53] : memref<128x128xbf16, #tpu.memory_space<vmem>>, vector<128x128xbf16>
    %cst_54 = arith.constant dense<0.000000e+00> : vector<80x128xf32>
    %103 = tpu.matmul %101, %102, %cst_54 {dimension_numbers = #tpu.dot_dimension_numbers<[1], [0], [0], [1], [0, 0, 1, 1], [], []>} : vector<80x128xbf16>, vector<128x128xbf16>, vector<80x128xf32> -> vector<80x128xf32>
    %c0_55 = arith.constant 0 : index
    %c0_56 = arith.constant 0 : index
    %104 = vector.load %arg13[%c0_55, %c0_56] : memref<1x128xf32, #tpu.memory_space<vmem>>, vector<1x128xf32>
    %105 = vector.broadcast %104 : vector<1x128xf32> to vector<80x128xf32>
    %106 = arith.addf %103, %105 : vector<80x128xf32>
    %cst_57 = arith.constant 5.000000e-01 : f32
    %107 = vector.broadcast %cst_57 : f32 to vector<80x128xf32>
    %108 = arith.mulf %107, %106 : vector<80x128xf32>
    %cst_58 = arith.constant 4.471500e-02 : f32
    %109 = vector.broadcast %cst_58 : f32 to vector<80x128xf32>
    %110 = arith.mulf %109, %106 : vector<80x128xf32>
    %111 = arith.mulf %110, %106 : vector<80x128xf32>
    %112 = arith.mulf %111, %106 : vector<80x128xf32>
    %113 = arith.addf %106, %112 : vector<80x128xf32>
    %cst_59 = arith.constant 0.797884583 : f32
    %114 = vector.broadcast %cst_59 : f32 to vector<80x128xf32>
    %115 = arith.mulf %114, %113 : vector<80x128xf32>
    %116 = math.tanh %115 : vector<80x128xf32>
    %cst_60 = arith.constant 1.000000e+00 : f32
    %117 = vector.broadcast %cst_60 : f32 to vector<80x128xf32>
    %118 = arith.addf %117, %116 : vector<80x128xf32>
    %119 = arith.mulf %108, %118 : vector<80x128xf32>
    %120 = arith.truncf %119 : vector<80x128xf32> to vector<80x128xbf16>
    %c0_61 = arith.constant 0 : index
    %c0_62 = arith.constant 0 : index
    %121 = vector.load %arg14[%c0_61, %c0_62] : memref<128x128xbf16, #tpu.memory_space<vmem>>, vector<128x128xbf16>
    %cst_63 = arith.constant dense<0.000000e+00> : vector<80x128xf32>
    %122 = tpu.matmul %120, %121, %cst_63 {dimension_numbers = #tpu.dot_dimension_numbers<[1], [0], [0], [1], [0, 0, 1, 1], [], []>} : vector<80x128xbf16>, vector<128x128xbf16>, vector<80x128xf32> -> vector<80x128xf32>
    %c0_64 = arith.constant 0 : index
    %c0_65 = arith.constant 0 : index
    %123 = vector.load %arg15[%c0_64, %c0_65] : memref<1x128xf32, #tpu.memory_space<vmem>>, vector<1x128xf32>
    %124 = vector.broadcast %123 : vector<1x128xf32> to vector<80x128xf32>
    %125 = arith.addf %122, %124 : vector<80x128xf32>
    %c0_66 = arith.constant 0 : index
    %c0_67 = arith.constant 0 : index
    %126 = vector.load %arg2[%c0_66, %c0_67] : memref<80x128xf32, #tpu.memory_space<vmem>>, vector<80x128xf32>
    %127 = arith.addf %126, %125 : vector<80x128xf32>
    %c0_68 = arith.constant 0 : index
    %c0_69 = arith.constant 0 : index
    %128 = vector.load %arg20[%c0_68, %c0_69] : memref<1x128xf32, #tpu.memory_space<vmem>>, vector<1x128xf32>
    %c0_70 = arith.constant 0 : index
    %c0_71 = arith.constant 0 : index
    %129 = vector.load %arg21[%c0_70, %c0_71] : memref<1x128xf32, #tpu.memory_space<vmem>>, vector<1x128xf32>
    %cst_72 = arith.constant dense<0.000000e+00> : vector<80xf32>
    %130 = vector.multi_reduction <add>, %127, %cst_72 [1] : vector<80x128xf32> to vector<80xf32>
    %131 = vector.shape_cast %130 : vector<80xf32> to vector<80x1xf32>
    %cst_73 = arith.constant 1.280000e+02 : f32
    %132 = vector.broadcast %cst_73 : f32 to vector<80x1xf32>
    %133 = arith.divf %131, %132 : vector<80x1xf32>
    %134 = vector.broadcast %133 : vector<80x1xf32> to vector<80x128xf32>
    %135 = arith.subf %127, %134 : vector<80x128xf32>
    %136 = arith.mulf %135, %135 : vector<80x128xf32>
    %cst_74 = arith.constant dense<0.000000e+00> : vector<80xf32>
    %137 = vector.multi_reduction <add>, %136, %cst_74 [1] : vector<80x128xf32> to vector<80xf32>
    %138 = vector.shape_cast %137 : vector<80xf32> to vector<80x1xf32>
    %cst_75 = arith.constant 1.280000e+02 : f32
    %139 = vector.broadcast %cst_75 : f32 to vector<80x1xf32>
    %140 = arith.divf %138, %139 : vector<80x1xf32>
    %cst_76 = arith.constant 9.99999974E-6 : f32
    %141 = vector.broadcast %cst_76 : f32 to vector<80x1xf32>
    %142 = arith.addf %140, %141 : vector<80x1xf32>
    %143 = math.rsqrt %142 : vector<80x1xf32>
    %144 = vector.broadcast %143 : vector<80x1xf32> to vector<80x128xf32>
    %145 = arith.mulf %135, %144 : vector<80x128xf32>
    %146 = vector.broadcast %128 : vector<1x128xf32> to vector<80x128xf32>
    %147 = arith.mulf %145, %146 : vector<80x128xf32>
    %148 = vector.broadcast %129 : vector<1x128xf32> to vector<80x128xf32>
    %149 = arith.addf %147, %148 : vector<80x128xf32>
    %c0_77 = arith.constant 0 : index
    %c0_78 = arith.constant 0 : index
    %150 = vector.load %arg23[%c0_77, %c0_78] : memref<80x128xf32, #tpu.memory_space<vmem>>, vector<80x128xf32>
    tpu.vector_store %arg23[%c0_77, %c0_78], %149 {strides = array<i32>} : memref<80x128xf32, #tpu.memory_space<vmem>>, vector<80x128xf32>,
    return
  }
  func.func @transform_0(%arg0: i32) -> (i32, i32) {
    %c0_i32 = arith.constant 0 : i32
    %c0_i32_0 = arith.constant 0 : i32
    return %arg0, %c0_i32 : i32, i32
  }
  func.func @transform_1(%arg0: i32) -> (i32, i32) {
    %c0_i32 = arith.constant 0 : i32
    %c0_i32_0 = arith.constant 0 : i32
    return %arg0, %c0_i32 : i32, i32
  }
  func.func @transform_2(%arg0: i32) -> (i32, i32) {
    %c0_i32 = arith.constant 0 : i32
    %c0_i32_0 = arith.constant 0 : i32
    return %arg0, %c0_i32 : i32, i32
  }
  func.func @transform_3(%arg0: i32) -> (i32, i32) {
    %c0_i32 = arith.constant 0 : i32
    %c0_i32_0 = arith.constant 0 : i32
    return %arg0, %c0_i32 : i32, i32
  }
  func.func @transform_4(%arg0: i32) -> (i32, i32) {
    %c0_i32 = arith.constant 0 : i32
    %c0_i32_0 = arith.constant 0 : i32
    return %arg0, %c0_i32 : i32, i32
  }
  func.func @transform_5(%arg0: i32) -> (i32, i32) {
    %c0_i32 = arith.constant 0 : i32
    %c0_i32_0 = arith.constant 0 : i32
    %c0_i32_1 = arith.constant 0 : i32
    return %c0_i32, %c0_i32_0 : i32, i32
  }
  func.func @transform_6(%arg0: i32) -> (i32, i32) {
    %c0_i32 = arith.constant 0 : i32
    %c0_i32_0 = arith.constant 0 : i32
    %c0_i32_1 = arith.constant 0 : i32
    return %c0_i32, %c0_i32_0 : i32, i32
  }
  func.func @transform_7(%arg0: i32) -> (i32, i32) {
    %c0_i32 = arith.constant 0 : i32
    %c0_i32_0 = arith.constant 0 : i32
    %c0_i32_1 = arith.constant 0 : i32
    return %c0_i32, %c0_i32_0 : i32, i32
  }
  func.func @transform_8(%arg0: i32) -> (i32, i32) {
    %c0_i32 = arith.constant 0 : i32
    %c0_i32_0 = arith.constant 0 : i32
    %c0_i32_1 = arith.constant 0 : i32
    return %c0_i32, %c0_i32_0 : i32, i32
  }
  func.func @transform_9(%arg0: i32) -> (i32, i32) {
    %c0_i32 = arith.constant 0 : i32
    %c0_i32_0 = arith.constant 0 : i32
    %c0_i32_1 = arith.constant 0 : i32
    return %c0_i32, %c0_i32_0 : i32, i32
  }
  func.func @transform_10(%arg0: i32) -> (i32, i32) {
    %c0_i32 = arith.constant 0 : i32
    %c0_i32_0 = arith.constant 0 : i32
    %c0_i32_1 = arith.constant 0 : i32
    return %c0_i32, %c0_i32_0 : i32, i32
  }
  func.func @transform_11(%arg0: i32) -> (i32, i32) {
    %c0_i32 = arith.constant 0 : i32
    %c0_i32_0 = arith.constant 0 : i32
    %c0_i32_1 = arith.constant 0 : i32
    return %c0_i32, %c0_i32_0 : i32, i32
  }
  func.func @transform_12(%arg0: i32) -> (i32, i32) {
    %c0_i32 = arith.constant 0 : i32
    %c0_i32_0 = arith.constant 0 : i32
    %c0_i32_1 = arith.constant 0 : i32
    return %c0_i32, %c0_i32_0 : i32, i32
  }
  func.func @transform_13(%arg0: i32) -> (i32, i32) {
    %c0_i32 = arith.constant 0 : i32
    %c0_i32_0 = arith.constant 0 : i32
    %c0_i32_1 = arith.constant 0 : i32
    return %c0_i32, %c0_i32_0 : i32, i32
  }
  func.func @transform_14(%arg0: i32) -> (i32, i32) {
    %c0_i32 = arith.constant 0 : i32
    %c0_i32_0 = arith.constant 0 : i32
    %c0_i32_1 = arith.constant 0 : i32
    return %c0_i32, %c0_i32_0 : i32, i32
  }
  func.func @transform_15(%arg0: i32) -> (i32, i32) {
    %c0_i32 = arith.constant 0 : i32
    %c0_i32_0 = arith.constant 0 : i32
    %c0_i32_1 = arith.constant 0 : i32
    return %c0_i32, %c0_i32_0 : i32, i32
  }
  func.func @transform_16(%arg0: i32) -> (i32, i32) {
    %c0_i32 = arith.constant 0 : i32
    %c0_i32_0 = arith.constant 0 : i32
    %c0_i32_1 = arith.constant 0 : i32
    return %c0_i32, %c0_i32_0 : i32, i32
  }
  func.func @transform_17(%arg0: i32) -> (i32, i32) {
    %c0_i32 = arith.constant 0 : i32
    %c0_i32_0 = arith.constant 0 : i32
    %c0_i32_1 = arith.constant 0 : i32
    return %c0_i32, %c0_i32_0 : i32, i32
  }
  func.func @transform_18(%arg0: i32) -> (i32, i32) {
    %c0_i32 = arith.constant 0 : i32
    %c0_i32_0 = arith.constant 0 : i32
    %c0_i32_1 = arith.constant 0 : i32
    return %c0_i32, %c0_i32_0 : i32, i32
  }
  func.func @transform_19(%arg0: i32) -> (i32, i32) {
    %c0_i32 = arith.constant 0 : i32
    %c0_i32_0 = arith.constant 0 : i32
    %c0_i32_1 = arith.constant 0 : i32
    return %c0_i32, %c0_i32_0 : i32, i32
  }
  func.func @transform_20(%arg0: i32) -> (i32, i32) {
    %c0_i32 = arith.constant 0 : i32
    %c0_i32_0 = arith.constant 0 : i32
    %c0_i32_1 = arith.constant 0 : i32
    return %c0_i32, %c0_i32_0 : i32, i32
  }
  func.func @transform_21(%arg0: i32) -> (i32, i32) {
    %c0_i32 = arith.constant 0 : i32
    %c0_i32_0 = arith.constant 0 : i32
    return %arg0, %c0_i32 : i32, i32
  }
  func.func @transform_22(%arg0: i32) -> (i32, i32) {
    %c0_i32 = arith.constant 0 : i32
    %c0_i32_0 = arith.constant 0 : i32
    return %arg0, %c0_i32 : i32, i32
  }
}

</mosaic_0001>

<bundles_post_ra>
// kernel: run.2
= control target key start
LH: loop header
LB: loop body
LE: loop exit
PB: predicated region body
PF: predicated region fallthrough
CT: control target
= control target key end

     0   :  { %s1779_s30 = smov 0   ;;  %s2146_s0 = inlined_call_operand.vmem [shape: f32[160,128], index: 0, kind: input, shape index: {}]   ;;  %s2147_s1 = inlined_call_operand.vmem [shape: f32[160,128], index: 1, kind: input, shape index: {}]   ;;  %s2148_s2 = inlined_call_operand.vmem [shape: bf16[160,128], index: 2, kind: input, shape index: {}]   ;;  %s2149_s3 = inlined_call_operand.vmem [shape: bf16[128,128], index: 3, kind: input, shape index: {}]   ;;  %s2150_s4 = inlined_call_operand.vmem [shape: bf16[128,128], index: 4, kind: input, shape index: {}]   ;;  %s2151_s5 = inlined_call_operand.vmem [shape: bf16[128,128], index: 5, kind: input, shape index: {}]   ;;  %s2152_s6 = inlined_call_operand.vmem [shape: f32[1,128], index: 6, kind: input, shape index: {}]   ;;  %s2153_s7 = inlined_call_operand.vmem [shape: bf16[128,128], index: 7, kind: input, shape index: {}]   ;;  %s2154_s8 = inlined_call_operand.vmem [shape: f32[1,128], index: 8, kind: input, shape index: {}]   ;;  %s2155_s9 = inlined_call_operand.vmem [shape: bf16[160,128], index: 9, kind: output, shape index: {}]  }
   0x1 LB: > { %s1323_s10 = sadd.s32 4294967295, %s1725_s30   ;;  %p1327_p0 = scmp.ge.s32.totalorder %s1725_s30, 1  ;;  %s1725_s30 = sphi %s1779_s30, %s19_s30  }
   0x2   : > { %p310_p1 = scmp.lt.s32.totalorder %s1725_s30, 3 }
   0x4   : > { %p311_p2 = pnand %p1327_p0, %p310_p1 }
   0x5   : > { %s356_s21 = smul.u32 (!%p311_p2), 10, %s1323_s10 }
   0x6   : > { %314 = sbr.rel (%p311_p2) target bundleno = 739 (0x2e3), region = 56 }
   0x7   : > { %p357_p3 = scmp.lt.s32.totalorder (!%p311_p2), %s356_s21, 19 }
   0xb   : > { %v1647_v0 = vld [vmem:[%s2150_s4 + $0x38] sm:$0xff]   ;;  %v1727_v1 = vmov 0.0   ;;  %v1649_v3 = vld [vmem:[%s2150_s4 + $0x30] sm:$0xff]   ;;  %vm1728_vm0 = vmmov 0   ;;  %v1651_v5 = vld [vmem:[%s2150_s4 + $0x28] sm:$0xff]   ;;  %s2157_s21 = smov (!%p357_p3, %s356_s21), 19 }
   0xc   : > { %1493 = vmatprep.subr.bf16.mxu0 %v1727_v1  ;;  %1529 = vmatprep.subr.bf16.mxu1 %v1727_v1  ;;  %v1648_v2 = vld [vmem:[%s2149_s3 + $0x38] sm:$0xff]   ;;  %v1650_v4 = vld [vmem:[%s2149_s3 + $0x30] sm:$0xff]   ;;  %v1652_v6 = vld [vmem:[%s2149_s3 + $0x28] sm:$0xff]   ;;  %s1328_s14 = sshll.u32 %s2157_s21, 3  ;;  %s1330_s11 = sshll.u32 %s2157_s21, 2 }
   0xd   : > { %1494 = vmatpush3.bf16.msra.mxu0 %v1647_v0  ;;  %1509 = vmatprep.mubr.msk.bf16.mxu0 %vm1728_vm0, %v1727_v1  ;;  %v1653_v7 = vld [vmem:[%s2150_s4 + $0x20] sm:$0xff]   ;;  %v1655_v9 = vld [vmem:[%s2150_s4 + $0x18] sm:$0xff]   ;;  %v1657_v11 = vld [vmem:[%s2150_s4 + $0x10] sm:$0xff]   ;;  %s1845_s19 = scalar_lea.vmem %s2147_s1, %s1328_s14  ;;  %s1853_s25 = scalar_lea.vmem %s2146_s0, %s1328_s14 }
   0xe   : > { %1530 = vmatpush3.bf16.msra.mxu1 %v1648_v2  ;;  %1495 = vmatprep.subr.bf16.mxu0 %v1727_v1  ;;  %v1654_v8 = vld [vmem:[%s2149_s3 + $0x20] sm:$0xff]   ;;  %v1656_v10 = vld [vmem:[%s2149_s3 + $0x18] sm:$0xff]   ;;  %v1658_v12 = vld [vmem:[%s2149_s3 + $0x10] sm:$0xff]   ;;  %s1951_s14 = scalar_lea.vmem %s2148_s2, %s1330_s11  ;;  %s2136_s17 = scalar_lea.vmem %s2155_s9, %s1330_s11 }
   0xf   : > { %1531 = vmatprep.subr.bf16.mxu1 %v1727_v1  ;;  %1545 = vmatprep.mubr.msk.bf16.mxu1 %vm1728_vm0, %v1727_v1  ;;  %v1659_v13 = vld [vmem:[%s2150_s4 + $0x8] sm:$0xff]   ;;  %v1661_v15 = vld [vmem:[%s2150_s4] sm:$0xff]   ;;  %v1663_v22 = vld [vmem:[%s2151_s5 + $0x38] sm:$0xff]  }
  0x10   : > { %v1660_v14 = vld [vmem:[%s2149_s3 + $0x8] sm:$0xff]   ;;  %v412_v16 = vld [vmem:[%s1845_s19] sm:$0xff]  ;;  %v414_v24 = vld [vmem:[%s1845_s19 + $0x10] sm:$0xff] }
  0x11   : > { %1496 = vmatpush3.bf16.msra.mxu0 %v1649_v3  ;;  %v413_v17 = vld [vmem:[%s1845_s19 + $0x8] sm:$0xff]  ;;  %v1662_v18 = vld [vmem:[%s2149_s3] sm:$0xff]   ;;  %v415_v25 = vld [vmem:[%s1845_s19 + $0x18] sm:$0xff] }
  0x12   : > { %1532 = vmatpush3.bf16.msra.mxu1 %v1650_v4  ;;  %1497 = vmatprep.subr.bf16.mxu0 %v1727_v1  ;;  %v381_v19 = vld [vmem:[%s1853_s25] sm:$0xff]  ;;  %v382_v20 = vld [vmem:[%s1853_s25 + $0x8] sm:$0xff]  ;;  %v422_v21 = vpack.c.bf16 %v413_v17, %v412_v16  ;;  %v383_v26 = vld [vmem:[%s1853_s25 + $0x10] sm:$0xff]  ;;  %v423_v28 = vpack.c.bf16 %v415_v25, %v414_v24 }
  0x13   : > { %1533 = vmatprep.subr.bf16.mxu1 %v1727_v1  ;;  %v391_v23 = vpack.c.bf16 %v382_v20, %v381_v19  ;;  %v384_v27 = vld [vmem:[%s1853_s25 + $0x18] sm:$0xff]  ;;  %v416_v30 = vld [vmem:[%s1845_s19 + $0x20] sm:$0xff]  ;;  %v417_v31 = vld [vmem:[%s1845_s19 + $0x28] sm:$0xff] }
  0x14   : > { %v392_v29 = vpack.c.bf16 %v384_v27, %v383_v26  ;;  %v385_v32 = vld [vmem:[%s1853_s25 + $0x20] sm:$0xff]  ;;  %v386_v33 = vld [vmem:[%s1853_s25 + $0x28] sm:$0xff]  ;;  %v424_v34 = vpack.c.bf16 %v417_v31, %v416_v30  ;;  %v418_v36 = vld [vmem:[%s1845_s19 + $0x30] sm:$0xff] }
  0x15   : > { %1498 = vmatpush3.bf16.msra.mxu0 %v1651_v5  ;;  %v393_v35 = vpack.c.bf16 %v386_v33, %v385_v32  ;;  %v419_v37 = vld [vmem:[%s1845_s19 + $0x38] sm:$0xff]  ;;  %v387_v38 = vld [vmem:[%s1853_s25 + $0x30] sm:$0xff]  ;;  %v420_v42 = vld [vmem:[%s1845_s19 + $0x40] sm:$0xff] }
  0x16   : > { %1534 = vmatpush3.bf16.msra.mxu1 %v1652_v6  ;;  %1499 = vmatprep.subr.bf16.mxu0 %v1727_v1  ;;  %v388_v39 = vld [vmem:[%s1853_s25 + $0x38] sm:$0xff]  ;;  %v425_v40 = vpack.c.bf16 %v419_v37, %v418_v36  ;;  %v421_v43 = vld [vmem:[%s1845_s19 + $0x48] sm:$0xff]  ;;  %v389_v44 = vld [vmem:[%s1853_s25 + $0x40] sm:$0xff] }
  0x17   : > { %1535 = vmatprep.subr.bf16.mxu1 %v1727_v1  ;;  %v394_v41 = vpack.c.bf16 %v388_v39, %v387_v38  ;;  %v390_v45 = vld [vmem:[%s1853_s25 + $0x48] sm:$0xff]  ;;  %v426_v46 = vpack.c.bf16 %v421_v43, %v420_v42  ;;  %v1664_v48 = vld [vmem:[%s2151_s5 + $0x30] sm:$0xff]   ;;  %v1666_v50 = vld [vmem:[%s2151_s5 + $0x20] sm:$0xff]  }
  0x18   : > { %v395_v47 = vpack.c.bf16 %v390_v45, %v389_v44  ;;  %v1665_v49 = vld [vmem:[%s2151_s5 + $0x28] sm:$0xff]   ;;  %v1667_v51 = vld [vmem:[%s2151_s5 + $0x18] sm:$0xff]   ;;  %v1668_v52 = vld [vmem:[%s2151_s5 + $0x10] sm:$0xff]  }
  0x19   : > { %1500 = vmatpush3.bf16.msra.mxu0 %v1653_v7  ;;  %v1669_v53 = vld [vmem:[%s2151_s5 + $0x8] sm:$0xff]   ;;  %v1670_v54 = vld [vmem:[%s2151_s5] sm:$0xff]   ;;  %v1671_v55 = vld [vmem:[%s2153_s7 + $0x38] sm:$0xff]  }
  0x1a   : > { %1536 = vmatpush3.bf16.msra.mxu1 %v1654_v8  ;;  %1501 = vmatprep.subr.bf16.mxu0 %v1727_v1  ;;  %v1389_v56 = vld [vmem:[%s1951_s14] sm:$0xff]   ;;  %v1433_v4 = vld [vmem:[%s1951_s14 + $0x8] sm:$0xff]   ;;  %v1434_v24 = vld [vmem:[%s1951_s14 + $0x10] sm:$0xff]  }
  0x1b   : > { %1537 = vmatprep.subr.bf16.mxu1 %v1727_v1  ;;  %v1390_v58 = vunpack.c.l.bf16 %v1389_v56  ;;  %v1391_v2 = vunpack.c.h.bf16 %v1389_v56  ;;  %v1398_v32 = vunpack.c.l.bf16 %v1434_v24 }
  0x1d   : > { %1502 = vmatpush3.bf16.msra.mxu0 %v1655_v9 }
  0x1e   : > { %1538 = vmatpush3.bf16.msra.mxu1 %v1656_v10  ;;  %1503 = vmatprep.subr.bf16.mxu0 %v1727_v1 }
  0x1f   : > { %1539 = vmatprep.subr.bf16.mxu1 %v1727_v1 }
  0x21   : > { %1504 = vmatpush3.bf16.msra.mxu0 %v1657_v11 }
  0x22   : > { %1540 = vmatpush3.bf16.msra.mxu1 %v1658_v12  ;;  %1505 = vmatprep.subr.bf16.mxu0 %v1727_v1  ;;  %v1394_v12 = vunpack.c.l.bf16 %v1433_v4 }
  0x23   : > { %1541 = vmatprep.subr.bf16.mxu1 %v1727_v1 }
  0x25   : > { %1506 = vmatpush3.bf16.msra.mxu0 %v1659_v13 }
  0x26   : > { %1542 = vmatpush3.bf16.msra.mxu1 %v1660_v14  ;;  %1507 = vmatprep.subr.bf16.mxu0 %v1727_v1 }
  0x27   : > { %1543 = vmatprep.subr.bf16.mxu1 %v1727_v1 }
  0x29   : > { %1508 = vmatpush3.bf16.msra.mxu0 %v1661_v15 }
  0x2a   : > { %1544 = vmatpush3.bf16.msra.mxu1 %v1662_v18  ;;  %1565 = vmatprep.subr.bf16.mxu0 %v1727_v1 }
  0x2b   : > { %1601 = vmatprep.subr.bf16.mxu1 %v1727_v1 }
  0x2c   : > { %1510 = vmatmul.mubr.bf16.vlgmr.msra.gmra.mxu0 %v422_v21 }
  0x2d   : > { %1546 = vmatmul.mubr.bf16.vlgmr.msra.gmra.mxu1 %v391_v23  ;;  %1513 = vmatprep.mubr.msk.bf16.mxu0 %vm1728_vm0, %v1727_v1  ;;  %v1395_v23 = vunpack.c.h.bf16 %v1433_v4 }
  0x2e   : > { %1549 = vmatprep.mubr.msk.bf16.mxu1 %vm1728_vm0, %v1727_v1  ;;  %1566 = vmatpush3.bf16.msra.mxu0 %v1663_v22 }
  0x2f   : > { %1567 = vmatprep.subr.bf16.mxu0 %v1727_v1  ;;  %1602 = vmatpush3.bf16.msra.mxu1 %v1671_v55 }
  0x30   : > { %1603 = vmatprep.subr.bf16.mxu1 %v1727_v1 }
  0x32   : > { %1568 = vmatpush3.bf16.msra.mxu0 %v1664_v48 }
  0x33   : > { %1569 = vmatprep.subr.bf16.mxu0 %v1727_v1 }
  0x34   : > { %1514 = vmatmul.mubr.bf16.gmra.mxu0 %v423_v28 }
  0x35   : > { %1550 = vmatmul.mubr.bf16.gmra.mxu1 %v392_v29  ;;  %1517 = vmatprep.mubr.msk.bf16.mxu0 %vm1728_vm0, %v1727_v1 }
  0x36   : > { %1553 = vmatprep.mubr.msk.bf16.mxu1 %vm1728_vm0, %v1727_v1  ;;  %1570 = vmatpush3.bf16.msra.mxu0 %v1665_v49  ;;  %v1435_v49 = vld [vmem:[%s1951_s14 + $0x18] sm:$0xff]  }
  0x37   : > { %1571 = vmatprep.subr.bf16.mxu0 %v1727_v1 }
  0x3a   : > { %1572 = vmatpush3.bf16.msra.mxu0 %v1666_v50 }
  0x3b   : > { %1573 = vmatprep.subr.bf16.mxu0 %v1727_v1 }
  0x3c   : > { %1518 = vmatmul.mubr.bf16.gmra.mxu0 %v424_v34 }
  0x3d   : > { %1554 = vmatmul.mubr.bf16.gmra.mxu1 %v393_v35  ;;  %1521 = vmatprep.mubr.msk.bf16.mxu0 %vm1728_vm0, %v1727_v1 }
  0x3e   : > { %1557 = vmatprep.mubr.msk.bf16.mxu1 %vm1728_vm0, %v1727_v1  ;;  %1574 = vmatpush3.bf16.msra.mxu0 %v1667_v51 }
  0x3f   : > { %1575 = vmatprep.subr.bf16.mxu0 %v1727_v1 }
  0x42   : > { %1576 = vmatpush3.bf16.msra.mxu0 %v1668_v52 }
  0x43   : > { %1577 = vmatprep.subr.bf16.mxu0 %v1727_v1 }
  0x44   : > { %1522 = vmatmul.mubr.bf16.gmra.mxu0 %v425_v40 }
  0x45   : > { %1558 = vmatmul.mubr.bf16.gmra.mxu1 %v394_v41  ;;  %1525 = vmatprep.mubr.msk.bf16.mxu0 %vm1728_vm0, %v1727_v1 }
  0x46   : > { %1561 = vmatprep.mubr.msk.bf16.mxu1 %vm1728_vm0, %v1727_v1  ;;  %1578 = vmatpush3.bf16.msra.mxu0 %v1669_v53 }
  0x47   : > { %1579 = vmatprep.subr.bf16.mxu0 %v1727_v1 }
  0x4a   : > { %1580 = vmatpush3.bf16.msra.mxu0 %v1670_v54 }
  0x4c   : > { %1526 = vmatmul.mubr.bf16.gmra.mxu0 %v426_v46 }
  0x4d   : > { %1562 = vmatmul.mubr.bf16.gmra.mxu1 %v395_v47  ;;  %1581 = vmatprep.mubr.msk.bf16.mxu0 %vm1728_vm0, %v1727_v1  ;;  %v1399_v47 = vunpack.c.h.bf16 %v1434_v24 }
  0x4e   : > { %1617 = vmatprep.mubr.msk.bf16.mxu1 %vm1728_vm0, %v1727_v1 }
  0xec   : > { %v525_v57 = vpop.f32.mrf.mxu0 }
  0xed   : > { %v646_v59 = vpop.f32.mrf.mxu1 }
  0xee   : > { %v647_v60 = vadd.f32 %v646_v59, %v525_v57  ;;  %v1511_v61 = vpop.f32.mrf.mxu0 }
  0xef   : > { %v1547_v62 = vpop.f32.mrf.mxu1 }
  0xf0   : > { %v1954_v63 = vadd.f32 %v1390_v58, %v647_v60  ;;  %v528_v0 = vpop.f32.mrf.mxu0  ;;  %v1402_v60 = vunpack.c.l.bf16 %v1435_v49 }
  0xf1   : > { %v649_v3 = vpop.f32.mrf.mxu1 }
  0xf2   : > { %v725_v5 = vmul.f32 0.044715, %v1954_v63  ;;  %v650_v6 = vadd.f32 %v649_v3, %v528_v0  ;;  %v1512_v7 = vpop.f32.mrf.mxu0 }
  0xf3   : > { %v1548_v8 = vpop.f32.mrf.mxu1 }
  0xf4   : > { %v735_v9 = vmul.f32 %v725_v5, %v1954_v63  ;;  %v1959_v10 = vadd.f32 %v1391_v2, %v650_v6  ;;  %v533_v11 = vpop.f32.mrf.mxu0 }
  0xf5   : > { %v654_v13 = vpop.f32.mrf.mxu1 }
  0xf6   : > { %v745_v14 = vmul.f32 %v735_v9, %v1954_v63  ;;  %v726_v15 = vmul.f32 0.044715, %v1959_v10  ;;  %v655_v16 = vadd.f32 %v654_v13, %v533_v11  ;;  %v1515_v17 = vpop.f32.mrf.mxu0  ;;  %v1403_v11 = vunpack.c.h.bf16 %v1435_v49 }
  0xf7   : > { %v1551_v18 = vpop.f32.mrf.mxu1 }
  0xf8   : > { %v755_v19 = vadd.f32 %v745_v14, %v1954_v63  ;;  %v736_v20 = vmul.f32 %v726_v15, %v1959_v10  ;;  %v1965_v21 = vadd.f32 %v1394_v12, %v655_v16  ;;  %v536_v22 = vpop.f32.mrf.mxu0  ;;  %v1436_v14 = vld [vmem:[%s1951_s14 + $0x20] sm:$0xff]  }
  0xf9   : > { %v657_v25 = vpop.f32.mrf.mxu1 }
  0xfa   : > { %v765_v26 = vmul.f32 0.7978846, %v755_v19  ;;  %v746_v27 = vmul.f32 %v736_v20, %v1959_v10  ;;  %v727_v28 = vmul.f32 0.044715, %v1965_v21  ;;  %v658_v29 = vadd.f32 %v657_v25, %v536_v22  ;;  %v1516_v30 = vpop.f32.mrf.mxu0 }
  0xfb   : > { %v1552_v31 = vpop.f32.mrf.mxu1  ;;  %v715_v30 = vmul.f32 0.5, %v1954_v63 }
  0xfc   : > { %1679 = vtanh.f32 %v765_v26  ;;  %v756_v33 = vadd.f32 %v746_v27, %v1959_v10  ;;  %v737_v34 = vmul.f32 %v727_v28, %v1965_v21  ;;  %v1972_v35 = vadd.f32 %v1395_v23, %v658_v29  ;;  %v541_v36 = vpop.f32.mrf.mxu0 }
  0xfd   : > { %v662_v37 = vpop.f32.mrf.mxu1  ;;  %v1406_v27 = vunpack.c.l.bf16 %v1436_v14  ;;  %v716_v31 = vmul.f32 0.5, %v1959_v10 }
  0xfe   : > { %v766_v38 = vmul.f32 0.7978846, %v756_v33  ;;  %v728_v39 = vmul.f32 0.044715, %v1972_v35  ;;  %v663_v40 = vadd.f32 %v662_v37, %v541_v36  ;;  %v1519_v41 = vpop.f32.mrf.mxu0  ;;  %v747_v43 = vmul.f32 %v737_v34, %v1965_v21 }
  0xff   : > { %v1555_v42 = vpop.f32.mrf.mxu1 }
 0x100   : > { %1681 = vtanh.f32 %v766_v38  ;;  %v738_v44 = vmul.f32 %v728_v39, %v1972_v35  ;;  %v1977_v45 = vadd.f32 %v1398_v32, %v663_v40  ;;  %v544_v46 = vpop.f32.mrf.mxu0  ;;  %v757_v50 = vadd.f32 %v747_v43, %v1965_v21 }
 0x101   : > { %v665_v48 = vpop.f32.mrf.mxu1  ;;  %v1407_v40 = vunpack.c.h.bf16 %v1436_v14 }
 0x102   : > { %v729_v51 = vmul.f32 0.044715, %v1977_v45  ;;  %v666_v52 = vadd.f32 %v665_v48, %v544_v46  ;;  %v1520_v53 = vpop.f32.mrf.mxu0  ;;  %v748_v54 = vmul.f32 %v738_v44, %v1972_v35  ;;  %v767_v56 = vmul.f32 0.7978846, %v757_v50 }
 0x103   : > { %v1556_v55 = vpop.f32.mrf.mxu1 }
 0x104   : > { %v739_v57 = vmul.f32 %v729_v51, %v1977_v45  ;;  %v1984_v58 = vadd.f32 %v1399_v47, %v666_v52  ;;  %v549_v59 = vpop.f32.mrf.mxu0  ;;  %v758_v61 = vadd.f32 %v748_v54, %v1972_v35  ;;  %1683 = vtanh.f32 %v767_v56 }
 0x105   : > { %v670_v62 = vpop.f32.mrf.mxu1 }
 0x106   : > { %v730_v0 = vmul.f32 0.044715, %v1984_v58  ;;  %v671_v2 = vadd.f32 %v670_v62, %v549_v59  ;;  %v1523_v3 = vpop.f32.mrf.mxu0  ;;  %v768_v4 = vmul.f32 0.7978846, %v758_v61  ;;  %v749_v6 = vmul.f32 %v739_v57, %v1977_v45 }
 0x107   : > { %v1559_v5 = vpop.f32.mrf.mxu1  ;;  %v717_v62 = vmul.f32 0.5, %v1965_v21 }
 0x108   : > { %v740_v7 = vmul.f32 %v730_v0, %v1984_v58  ;;  %v1990_v8 = vadd.f32 %v1402_v60, %v671_v2  ;;  %v552_v9 = vpop.f32.mrf.mxu0  ;;  %1685 = vtanh.f32 %v768_v4  ;;  %v759_v15 = vadd.f32 %v749_v6, %v1977_v45 }
 0x109   : > { %v1680_v12 = vpop.eup %1679  ;;  %v673_v13 = vpop.f32.mrf.mxu1  ;;  %v718_v2 = vmul.f32 0.5, %v1972_v35  ;;  %v719_v35 = vmul.f32 0.5, %v1977_v45 }
 0x10a   : > { %v731_v16 = vmul.f32 0.044715, %v1990_v8  ;;  %v674_v17 = vadd.f32 %v673_v13, %v552_v9  ;;  %v1524_v18 = vpop.f32.mrf.mxu0  ;;  %v750_v19 = vmul.f32 %v740_v7, %v1984_v58  ;;  %v785_v22 = vadd.f32 1.0, %v1680_v12 }
 0x10b   : > { %v1560_v20 = vpop.f32.mrf.mxu1  ;;  %v769_v23 = vmul.f32 0.7978846, %v759_v15  ;;  %v720_v18 = vmul.f32 0.5, %v1984_v58 }
 0x10c   : > { %v741_v24 = vmul.f32 %v731_v16, %v1990_v8  ;;  %v1997_v25 = vadd.f32 %v1403_v11, %v674_v17  ;;  %v557_v26 = vpop.f32.mrf.mxu0  ;;  %v760_v28 = vadd.f32 %v750_v19, %v1984_v58  ;;  %v795_v41 = vmul.f32 %v785_v22, %v715_v30 }
 0x10d   : > { %v1682_v29 = vpop.eup %1681  ;;  %v678_v32 = vpop.f32.mrf.mxu1  ;;  %1687 = vtanh.f32 %v769_v23 }
 0x10e   : > { %v732_v33 = vmul.f32 0.044715, %v1997_v25  ;;  %v679_v34 = vadd.f32 %v678_v32, %v557_v26  ;;  %v1527_v36 = vpop.f32.mrf.mxu0  ;;  %v786_v37 = vadd.f32 1.0, %v1682_v29  ;;  %v770_v38 = vmul.f32 0.7978846, %v760_v28 }
 0x10f   : > { %v1563_v39 = vpop.f32.mrf.mxu1  ;;  %v751_v42 = vmul.f32 %v741_v24, %v1990_v8  ;;  %v721_v29 = vmul.f32 0.5, %v1990_v8  ;;  %v722_v30 = vmul.f32 0.5, %v1997_v25 }
 0x110   : > { %v742_v43 = vmul.f32 %v732_v33, %v1997_v25  ;;  %v2005_v44 = vadd.f32 %v1406_v27, %v679_v34  ;;  %v560_v63 = vpop.f32.mrf.mxu0  ;;  %v796_v46 = vmul.f32 %v786_v37, %v716_v31  ;;  %1689 = vtanh.f32 %v770_v38 }
 0x111   : > { %v681_v10 = vpop.f32.mrf.mxu1  ;;  %v761_v47 = vadd.f32 %v751_v42, %v1990_v8  ;;  %v1684_v48 = vpop.eup %1683  ;;  %v1673_v42 = vld [vmem:[%s2153_s7 + $0x28] sm:$0xff]  }
 0x112   : > { %v733_v49 = vmul.f32 0.044715, %v2005_v44  ;;  %v682_v50 = vadd.f32 %v681_v10, %v560_v63  ;;  %v1528_v51 = vpop.f32.mrf.mxu0  ;;  %v805_v52 = vpack.c.bf16 %v796_v46, %v795_v41  ;;  %v752_v53 = vmul.f32 %v742_v43, %v1997_v25  ;;  %v1674_v43 = vld [vmem:[%s2153_s7 + $0x20] sm:$0xff]   ;;  %v1676_v63 = vld [vmem:[%s2153_s7 + $0x10] sm:$0xff]   ;;  %v1677_v46 = vld [vmem:[%s2153_s7 + $0x8] sm:$0xff]  }
 0x113   : > { %v1564_v54 = vpop.f32.mrf.mxu1  ;;  %v771_v55 = vmul.f32 0.7978846, %v761_v47  ;;  %v787_v59 = vadd.f32 1.0, %v1684_v48  ;;  %v723_v37 = vmul.f32 0.5, %v2005_v44  ;;  %v1678_v10 = vld [vmem:[%s2153_s7] sm:$0xff]  }
 0x114   : > { %v743_v56 = vmul.f32 %v733_v49, %v2005_v44  ;;  %v714_v57 = vadd.f32 %v1407_v40, %v682_v50  ;;  %1582 = vmatmul.mubr.bf16.vlgmr.msra.gmra.mxu0 %v805_v52  ;;  %v762_v60 = vadd.f32 %v752_v53, %v1997_v25  ;;  %v1672_v25 = vld [vmem:[%s2153_s7 + $0x30] sm:$0xff]   ;;  %v2059_v47 = vld [vmem:[%s2152_s6] ss:$0 sm:$0xff] }
 0x115   : > { %v1686_v61 = vpop.eup %1685  ;;  %1585 = vmatprep.mubr.msk.bf16.mxu0 %vm1728_vm0, %v1727_v1  ;;  %1691 = vtanh.f32 %v771_v55  ;;  %v797_v7 = vmul.f32 %v787_v59, %v717_v62  ;;  %1604 = vmatpush3.bf16.msra.mxu1 %v1672_v25 }
 0x116   : > { %v734_v0 = vmul.f32 0.044715, %v714_v57  ;;  %v788_v3 = vadd.f32 1.0, %v1686_v61  ;;  %v772_v4 = vmul.f32 0.7978846, %v762_v60  ;;  %v753_v5 = vmul.f32 %v743_v56, %v2005_v44  ;;  %1605 = vmatprep.subr.bf16.mxu1 %v1727_v1 }
 0x117   : > { %v724_v38 = vmul.f32 0.5, %v714_v57 }
 0x118   : > { %v744_v6 = vmul.f32 %v734_v0, %v714_v57  ;;  %v798_v9 = vmul.f32 %v788_v3, %v718_v2  ;;  %1693 = vtanh.f32 %v772_v4  ;;  %v763_v11 = vadd.f32 %v753_v5, %v2005_v44  ;;  %v1675_v44 = vld [vmem:[%s2153_s7 + $0x18] sm:$0xff]  }
 0x119   : > { %1606 = vmatpush3.bf16.msra.mxu1 %v1673_v42 }
 0x11a   : > { %v1688_v12 = vpop.eup %1687  ;;  %v806_v13 = vpack.c.bf16 %v798_v9, %v797_v7  ;;  %v754_v14 = vmul.f32 %v744_v6, %v714_v57  ;;  %v773_v15 = vmul.f32 0.7978846, %v763_v11  ;;  %1607 = vmatprep.subr.bf16.mxu1 %v1727_v1 }
 0x11b   : > { %v789_v21 = vadd.f32 1.0, %v1688_v12 }
 0x11c   : > { %1586 = vmatmul.mubr.bf16.gmra.mxu0 %v806_v13  ;;  %v764_v16 = vadd.f32 %v754_v14, %v714_v57  ;;  %1695 = vtanh.f32 %v773_v15 }
 0x11d   : > { %v1690_v17 = vpop.eup %1689  ;;  %1589 = vmatprep.mubr.msk.bf16.mxu0 %vm1728_vm0, %v1727_v1  ;;  %v799_v22 = vmul.f32 %v789_v21, %v719_v35  ;;  %1608 = vmatpush3.bf16.msra.mxu1 %v1674_v43 }
 0x11e   : > { %v790_v19 = vadd.f32 1.0, %v1690_v17  ;;  %v774_v20 = vmul.f32 0.7978846, %v764_v16  ;;  %1609 = vmatprep.subr.bf16.mxu1 %v1727_v1 }
 0x120   : > { %v800_v23 = vmul.f32 %v790_v19, %v720_v18  ;;  %1697 = vtanh.f32 %v774_v20 }
 0x121   : > { %1610 = vmatpush3.bf16.msra.mxu1 %v1675_v44 }
 0x122   : > { %v1692_v24 = vpop.eup %1691  ;;  %v807_v26 = vpack.c.bf16 %v800_v23, %v799_v22  ;;  %1611 = vmatprep.subr.bf16.mxu1 %v1727_v1 }
 0x123   : > { %v791_v27 = vadd.f32 1.0, %v1692_v24 }
 0x124   : > { %1590 = vmatmul.mubr.bf16.gmra.mxu0 %v807_v26 }
 0x125   : > { %v1694_v28 = vpop.eup %1693  ;;  %1593 = vmatprep.mubr.msk.bf16.mxu0 %vm1728_vm0, %v1727_v1  ;;  %v801_v31 = vmul.f32 %v791_v27, %v721_v29  ;;  %1612 = vmatpush3.bf16.msra.mxu1 %v1676_v63 }
 0x126   : > { %v792_v45 = vadd.f32 1.0, %v1694_v28  ;;  %1613 = vmatprep.subr.bf16.mxu1 %v1727_v1 }
 0x128   : > { %v802_v58 = vmul.f32 %v792_v45, %v722_v30 }
 0x129   : > { %v1696_v32 = vpop.eup %1695  ;;  %1614 = vmatpush3.bf16.msra.mxu1 %v1677_v46 }
 0x12a   : > { %v808_v33 = vpack.c.bf16 %v802_v58, %v801_v31  ;;  %v793_v34 = vadd.f32 1.0, %v1696_v32  ;;  %1615 = vmatprep.subr.bf16.mxu1 %v1727_v1 }
 0x12c   : > { %1594 = vmatmul.mubr.bf16.gmra.mxu0 %v808_v33  ;;  %v803_v40 = vmul.f32 %v793_v34, %v723_v37 }
 0x12d   : > { %v1698_v36 = vpop.eup %1697  ;;  %1597 = vmatprep.mubr.msk.bf16.mxu0 %vm1728_vm0, %v1727_v1  ;;  %1616 = vmatpush3.bf16.msra.mxu1 %v1678_v10 }
 0x12e   : > { %v794_v39 = vadd.f32 1.0, %v1698_v36 }
 0x130   : > { %v804_v41 = vmul.f32 %v794_v39, %v724_v38 }
 0x132   : > { %v809_v8 = vpack.c.bf16 %v804_v41, %v803_v40 }
 0x134   : > { %1598 = vmatmul.mubr.bf16.gmra.mxu0 %v809_v8 }
 0x1d4   : > { %v915_v48 = vpop.f32.mrf.mxu0 }
 0x1d5   : > { %v916_v49 = vadd.f32 %v2059_v47, %v915_v48 }
 0x1d6   : > { %v1583_v50 = vpop.f32.mrf.mxu0 }
 0x1d7   : > { %v964_v51 = vmul.f32 0.044715, %v916_v49  ;;  %v954_v43 = vmul.f32 0.5, %v916_v49 }
 0x1d8   : > { %v918_v52 = vpop.f32.mrf.mxu0 }
 0x1d9   : > { %v974_v53 = vmul.f32 %v964_v51, %v916_v49  ;;  %v919_v54 = vadd.f32 %v2059_v47, %v918_v52 }
 0x1da   : > { %v1584_v55 = vpop.f32.mrf.mxu0 }
 0x1db   : > { %v984_v56 = vmul.f32 %v974_v53, %v916_v49  ;;  %v965_v57 = vmul.f32 0.044715, %v919_v54  ;;  %v955_v44 = vmul.f32 0.5, %v919_v54 }
 0x1dc   : > { %v923_v59 = vpop.f32.mrf.mxu0 }
 0x1dd   : > { %v994_v60 = vadd.f32 %v984_v56, %v916_v49  ;;  %v975_v61 = vmul.f32 %v965_v57, %v919_v54  ;;  %v2064_v62 = vadd.f32 %v2059_v47, %v923_v59 }
 0x1de   : > { %v1587_v0 = vpop.f32.mrf.mxu0 }
 0x1df   : > { %v1004_v2 = vmul.f32 0.7978846, %v994_v60  ;;  %v985_v3 = vmul.f32 %v975_v61, %v919_v54  ;;  %v966_v4 = vmul.f32 0.044715, %v2064_v62 }
 0x1e0   : > { %v926_v5 = vpop.f32.mrf.mxu0 }
 0x1e1   : > { %1699 = vtanh.f32 %v1004_v2  ;;  %v995_v6 = vadd.f32 %v985_v3, %v919_v54  ;;  %v976_v7 = vmul.f32 %v966_v4, %v2064_v62  ;;  %v2069_v9 = vadd.f32 %v2059_v47, %v926_v5 }
 0x1e2   : > { %v1588_v11 = vpop.f32.mrf.mxu0 }
 0x1e3   : > { %v1005_v12 = vmul.f32 0.7978846, %v995_v6  ;;  %v986_v13 = vmul.f32 %v976_v7, %v2064_v62  ;;  %v967_v14 = vmul.f32 0.044715, %v2069_v9 }
 0x1e4   : > { %v931_v15 = vpop.f32.mrf.mxu0 }
 0x1e5   : > { %1701 = vtanh.f32 %v1005_v12  ;;  %v977_v21 = vmul.f32 %v967_v14, %v2069_v9  ;;  %v2075_v16 = vadd.f32 %v2059_v47, %v931_v15  ;;  %v996_v17 = vadd.f32 %v986_v13, %v2064_v62 }
 0x1e6   : > { %v1591_v35 = vpop.f32.mrf.mxu0  ;;  %v956_v12 = vmul.f32 0.5, %v2064_v62  ;;  %v957_v13 = vmul.f32 0.5, %v2069_v9 }
 0x1e7   : > { %v987_v18 = vmul.f32 %v977_v21, %v2069_v9  ;;  %v968_v19 = vmul.f32 0.044715, %v2075_v16  ;;  %v1006_v20 = vmul.f32 0.7978846, %v996_v17 }
 0x1e8   : > { %v934_v22 = vpop.f32.mrf.mxu0 }
 0x1e9   : > { %v978_v23 = vmul.f32 %v968_v19, %v2075_v16  ;;  %v2082_v24 = vadd.f32 %v2059_v47, %v934_v22  ;;  %v997_v26 = vadd.f32 %v987_v18, %v2069_v9  ;;  %1703 = vtanh.f32 %v1006_v20 }
 0x1ea   : > { %v1592_v27 = vpop.f32.mrf.mxu0 }
 0x1eb   : > { %v988_v28 = vmul.f32 %v978_v23, %v2075_v16  ;;  %v969_v29 = vmul.f32 0.044715, %v2082_v24  ;;  %v1007_v30 = vmul.f32 0.7978846, %v997_v26 }
 0x1ec   : > { %v939_v45 = vpop.f32.mrf.mxu0 }
 0x1ed   : > { %v979_v31 = vmul.f32 %v969_v29, %v2082_v24  ;;  %v2089_v58 = vadd.f32 %v2059_v47, %v939_v45  ;;  %1705 = vtanh.f32 %v1007_v30  ;;  %v998_v32 = vadd.f32 %v988_v28, %v2075_v16 }
 0x1ee   : > { %v1700_v33 = vpop.eup %1699  ;;  %v1595_v34 = vpop.f32.mrf.mxu0  ;;  %v958_v28 = vmul.f32 0.5, %v2075_v16  ;;  %v959_v29 = vmul.f32 0.5, %v2082_v24 }
 0x1ef   : > { %v989_v36 = vmul.f32 %v979_v31, %v2082_v24  ;;  %v970_v37 = vmul.f32 0.044715, %v2089_v58  ;;  %v1008_v38 = vmul.f32 0.7978846, %v998_v32  ;;  %v1024_v40 = vadd.f32 1.0, %v1700_v33 }
 0x1f0   : > { %v942_v39 = vpop.f32.mrf.mxu0 }
 0x1f1   : > { %v980_v41 = vmul.f32 %v970_v37, %v2089_v58  ;;  %v2096_v8 = vadd.f32 %v2059_v47, %v942_v39  ;;  %v999_v25 = vadd.f32 %v989_v36, %v2082_v24  ;;  %1707 = vtanh.f32 %v1008_v38 }
 0x1f2   : > { %v1702_v42 = vpop.eup %1701  ;;  %v1596_v63 = vpop.f32.mrf.mxu0  ;;  %v1034_v52 = vmul.f32 %v1024_v40, %v954_v43  ;;  %v960_v38 = vmul.f32 0.5, %v2089_v58 }
 0x1f3   : > { %v990_v46 = vmul.f32 %v980_v41, %v2089_v58  ;;  %v971_v10 = vmul.f32 0.044715, %v2096_v8  ;;  %v1025_v48 = vadd.f32 1.0, %v1702_v42  ;;  %v1009_v50 = vmul.f32 0.7978846, %v999_v25 }
 0x1f4   : > { %v947_v51 = vpop.f32.mrf.mxu0  ;;  %v961_v39 = vmul.f32 0.5, %v2096_v8 }
 0x1f5   : > { %v981_v53 = vmul.f32 %v971_v10, %v2096_v8  ;;  %v2103_v55 = vadd.f32 %v2059_v47, %v947_v51  ;;  %v1035_v56 = vmul.f32 %v1025_v48, %v955_v44  ;;  %1709 = vtanh.f32 %v1009_v50  ;;  %v1357_v50 = vld [vmem:[%s2154_s8] ss:$0 sm:$0xff] }
 0x1f6   : > { %v1704_v57 = vpop.eup %1703  ;;  %v1599_v49 = vpop.f32.mrf.mxu0  ;;  %v1000_v54 = vadd.f32 %v990_v46, %v2089_v58 }
 0x1f7   : > { %v991_v59 = vmul.f32 %v981_v53, %v2096_v8  ;;  %v972_v60 = vmul.f32 0.044715, %v2103_v55  ;;  %v1044_v61 = vpack.c.bf16 %v1035_v56, %v1034_v52  ;;  %v1026_v2 = vadd.f32 1.0, %v1704_v57 }
 0x1f8   : > { %v950_v0 = vpop.f32.mrf.mxu0  ;;  %v1010_v3 = vmul.f32 0.7978846, %v1000_v54  ;;  %v962_v44 = vmul.f32 0.5, %v2103_v55 }
 0x1f9   : > { %v982_v4 = vmul.f32 %v972_v60, %v2103_v55  ;;  %v951_v5 = vadd.f32 %v2059_v47, %v950_v0  ;;  %1618 = vmatmul.mubr.bf16.vlgmr.msra.gmra.mxu1 %v1044_v61  ;;  %v1001_v6 = vadd.f32 %v991_v59, %v2096_v8  ;;  %v1036_v35 = vmul.f32 %v1026_v2, %v956_v12 }
 0x1fa   : > { %v1706_v7 = vpop.eup %1705  ;;  %v1600_v11 = vpop.f32.mrf.mxu0  ;;  %1621 = vmatprep.mubr.msk.bf16.mxu1 %vm1728_vm0, %v1727_v1  ;;  %1711 = vtanh.f32 %v1010_v3 }
 0x1fb   : > { %v992_v14 = vmul.f32 %v982_v4, %v2103_v55  ;;  %v973_v15 = vmul.f32 0.044715, %v951_v5  ;;  %v1027_v21 = vadd.f32 1.0, %v1706_v7  ;;  %v1011_v17 = vmul.f32 0.7978846, %v1001_v6 }
 0x1fc   : > { %v963_v63 = vmul.f32 0.5, %v951_v5 }
 0x1fd   : > { %v983_v47 = vmul.f32 %v973_v15, %v951_v5  ;;  %v1037_v18 = vmul.f32 %v1027_v21, %v957_v13  ;;  %1713 = vtanh.f32 %v1011_v17  ;;  %v1002_v19 = vadd.f32 %v992_v14, %v2103_v55 }
 0x1fe   : > { %v1708_v20 = vpop.eup %1707 }
 0x1ff   : > { %v993_v22 = vmul.f32 %v983_v47, %v951_v5  ;;  %v1045_v23 = vpack.c.bf16 %v1037_v18, %v1036_v35  ;;  %v1012_v26 = vmul.f32 0.7978846, %v1002_v19  ;;  %v1028_v62 = vadd.f32 1.0, %v1708_v20 }
 0x201   : > { %1622 = vmatmul.mubr.bf16.gmra.mxu1 %v1045_v23  ;;  %v1003_v27 = vadd.f32 %v993_v22, %v951_v5  ;;  %1715 = vtanh.f32 %v1012_v26  ;;  %v1038_v31 = vmul.f32 %v1028_v62, %v958_v28 }
 0x202   : > { %v1710_v9 = vpop.eup %1709  ;;  %1625 = vmatprep.mubr.msk.bf16.mxu1 %vm1728_vm0, %v1727_v1 }
 0x203   : > { %v1029_v30 = vadd.f32 1.0, %v1710_v9  ;;  %v1013_v45 = vmul.f32 0.7978846, %v1003_v27 }
 0x205   : > { %v1039_v32 = vmul.f32 %v1029_v30, %v959_v29  ;;  %1717 = vtanh.f32 %v1013_v45 }
 0x207   : > { %v1712_v33 = vpop.eup %1711  ;;  %v1046_v34 = vpack.c.bf16 %v1039_v32, %v1038_v31 }
 0x208   : > { %v1030_v36 = vadd.f32 1.0, %v1712_v33 }
 0x209   : > { %1626 = vmatmul.mubr.bf16.gmra.mxu1 %v1046_v34 }
 0x20a   : > { %v1714_v37 = vpop.eup %1713  ;;  %1629 = vmatprep.mubr.msk.bf16.mxu1 %vm1728_vm0, %v1727_v1  ;;  %v1040_v40 = vmul.f32 %v1030_v36, %v960_v38 }
 0x20b   : > { %v1031_v16 = vadd.f32 1.0, %v1714_v37 }
 0x20d   : > { %v1041_v24 = vmul.f32 %v1031_v16, %v961_v39 }
 0x20e   : > { %v1716_v41 = vpop.eup %1715 }
 0x20f   : > { %v1047_v25 = vpack.c.bf16 %v1041_v24, %v1040_v40  ;;  %v1032_v42 = vadd.f32 1.0, %v1716_v41 }
 0x211   : > { %1630 = vmatmul.mubr.bf16.gmra.mxu1 %v1047_v25  ;;  %v1042_v10 = vmul.f32 %v1032_v42, %v962_v44 }
 0x212   : > { %v1718_v43 = vpop.eup %1717  ;;  %1633 = vmatprep.mubr.msk.bf16.mxu1 %vm1728_vm0, %v1727_v1 }
 0x213   : > { %v1033_v46 = vadd.f32 1.0, %v1718_v43 }
 0x215   : > { %v1043_v58 = vmul.f32 %v1033_v46, %v963_v63 }
 0x217   : > { %v1048_v48 = vpack.c.bf16 %v1043_v58, %v1042_v10 }
 0x219   : > { %1634 = vmatmul.mubr.bf16.gmra.mxu1 %v1048_v48 }
 0x2b9   : > { %v1154_v8 = vpop.f32.mrf.mxu1 }
 0x2ba   : > { %v1155_v53 = vadd.f32 %v1357_v50, %v1154_v8 }
 0x2bb   : > { %v1619_v51 = vpop.f32.mrf.mxu1 }
 0x2bd   : > { %v1157_v52 = vpop.f32.mrf.mxu1 }
 0x2be   : > { %v1158_v56 = vadd.f32 %v1357_v50, %v1157_v52 }
 0x2bf   : > { %v1620_v1 = vpop.f32.mrf.mxu1 }
 0x2c0   : > { %v1411_v55 = vpack.c.bf16 %v1158_v56, %v1155_v53 }
 0x2c1   : > { %v1162_v57 = vpop.f32.mrf.mxu1 }
 0x2c2   : > { %1412 = vst [vmem:[%s2136_s17] sm:$0xff] %v1411_v55   ;;  %v1163_v59 = vadd.f32 %v1357_v50, %v1162_v57 }
 0x2c3   : > { %v1623_v49 = vpop.f32.mrf.mxu1 }
 0x2c5   : > { %v1165_v54 = vpop.f32.mrf.mxu1 }
 0x2c6   : > { %v1166_v60 = vadd.f32 %v1357_v50, %v1165_v54 }
 0x2c7   : > { %v1624_v61 = vpop.f32.mrf.mxu1 }
 0x2c8   : > { %v1416_v0 = vpack.c.bf16 %v1166_v60, %v1163_v59 }
 0x2c9   : > { %v1170_v2 = vpop.f32.mrf.mxu1 }
 0x2ca   : > { %1437 = vst [vmem:[%s2136_s17 + $0x8] sm:$0xff] %v1416_v0   ;;  %v1171_v5 = vadd.f32 %v1357_v50, %v1170_v2 }
 0x2cb   : > { %v1627_v3 = vpop.f32.mrf.mxu1 }
 0x2cd   : > { %v1173_v4 = vpop.f32.mrf.mxu1 }
 0x2ce   : > { %v1174_v6 = vadd.f32 %v1357_v50, %v1173_v4 }
 0x2cf   : > { %v1628_v7 = vpop.f32.mrf.mxu1 }
 0x2d0   : > { %v1421_v11 = vpack.c.bf16 %v1174_v6, %v1171_v5 }
 0x2d1   : > { %v1178_v12 = vpop.f32.mrf.mxu1 }
 0x2d2   : > { %1438 = vst [vmem:[%s2136_s17 + $0x10] sm:$0xff] %v1421_v11   ;;  %v1179_v15 = vadd.f32 %v1357_v50, %v1178_v12 }
 0x2d3   : > { %v1631_v13 = vpop.f32.mrf.mxu1 }
 0x2d5   : > { %v1181_v14 = vpop.f32.mrf.mxu1 }
 0x2d6   : > { %v1182_v21 = vadd.f32 %v1357_v50, %v1181_v14 }
 0x2d7   : > { %v1632_v17 = vpop.f32.mrf.mxu1 }
 0x2d8   : > { %v1426_v35 = vpack.c.bf16 %v1182_v21, %v1179_v15 }
 0x2d9   : > { %v1186_v47 = vpop.f32.mrf.mxu1 }
 0x2da   : > { %1439 = vst [vmem:[%s2136_s17 + $0x18] sm:$0xff] %v1426_v35   ;;  %v1187_v20 = vadd.f32 %v1357_v50, %v1186_v47 }
 0x2db   : > { %v1635_v18 = vpop.f32.mrf.mxu1 }
 0x2dd   : > { %v1189_v19 = vpop.f32.mrf.mxu1 }
 0x2de   : > { %v1190_v22 = vadd.f32 %v1357_v50, %v1189_v19 }
 0x2df   : > { %v1636_v23 = vpop.f32.mrf.mxu1 }
 0x2e0   : > { %v1431_v26 = vpack.c.bf16 %v1190_v22, %v1187_v20 }
 0x2e2   : > { %1440 = vst [vmem:[%s2136_s17 + $0x20] sm:$0xff] %v1431_v26  }
 0x2e3 PF: > { %s19_s30 = sadd.s32 1, %s1725_s30  }
 0x2e4   : > { %p16_p4 = scmp.ge.s32.totalorder %s19_s30, 4  }
 0x2e6   :  { %18 = sbr.rel (!%p16_p4) target bundleno = 1 (0x1), region = 92 }

// kernel: run.3
= control target key start
LH: loop header
LB: loop body
LE: loop exit
PB: predicated region body
PF: predicated region fallthrough
CT: control target
= control target key end

     0   :  { %s5704_s0 = inlined_call_operand.vmem [shape: f32[160,128], index: 0, kind: input, shape index: {}]   ;;  %s5705_s1 = inlined_call_operand.vmem [shape: f32[160,128], index: 1, kind: input, shape index: {}]   ;;  %s5706_s2 = inlined_call_operand.vmem [shape: f32[160,128], index: 2, kind: input, shape index: {}]   ;;  %s5707_s3 = inlined_call_operand.vmem [shape: bf16[160,128], index: 3, kind: input, shape index: {}]   ;;  %s5708_s4 = inlined_call_operand.vmem [shape: f32[160,1], index: 4, kind: input, shape index: {}]   ;;  %s5709_s5 = inlined_call_operand.vmem [shape: bf16[128,512], index: 5, kind: input, shape index: {}]   ;;  %s5710_s6 = inlined_call_operand.vmem [shape: f32[1,512], index: 6, kind: input, shape index: {}]   ;;  %s5711_s7 = inlined_call_operand.vmem [shape: bf16[512,128], index: 7, kind: input, shape index: {}]   ;;  %s5712_s8 = inlined_call_operand.vmem [shape: f32[1,128], index: 8, kind: input, shape index: {}]   ;;  %s5713_s9 = inlined_call_operand.vmem [shape: bf16[128,128], index: 9, kind: input, shape index: {}]   ;;  %s5714_s10 = inlined_call_operand.vmem [shape: bf16[128,128], index: 10, kind: input, shape index: {}]   ;;  %s5715_s11 = inlined_call_operand.vmem [shape: bf16[128,128], index: 11, kind: input, shape index: {}]   ;;  %s5716_s12 = inlined_call_operand.vmem [shape: f32[1,128], index: 12, kind: input, shape index: {}]   ;;  %s5717_s13 = inlined_call_operand.vmem [shape: bf16[128,128], index: 13, kind: input, shape index: {}]   ;;  %s5718_s14 = inlined_call_operand.vmem [shape: f32[1,128], index: 14, kind: input, shape index: {}]   ;;  %s5719_s15 = inlined_call_operand.vmem [shape: f32[1,128], index: 15, kind: input, shape index: {}]   ;;  %s5720_s16 = inlined_call_operand.vmem [shape: f32[1,128], index: 16, kind: input, shape index: {}]   ;;  %s5721_s17 = inlined_call_operand.vmem [shape: f32[1,128], index: 17, kind: input, shape index: {}]   ;;  %s5722_s18 = inlined_call_operand.vmem [shape: f32[1,128], index: 18, kind: input, shape index: {}]   ;;  %s5723_s19 = inlined_call_operand.vmem [shape: f32[1,128], index: 19, kind: input, shape index: {}]   ;;  %s5724_s20 = inlined_call_operand.vmem [shape: f32[1,128], index: 20, kind: input, shape index: {}]   ;;  %s5725_s21 = inlined_call_operand.vmem [shape: f32[160,128], index: 21, kind: output, shape index: {0}]   ;;  %s5726_s22 = inlined_call_operand.vmem [shape: f32[160,128], index: 22, kind: output, shape index: {1}]  }
   0x1   :  { %5760 = sst [smem:[#allocation41_spill]] %s5704_s0 }
   0x2   :  { %5761 = sst [smem:[#allocation42_spill]] %s5705_s1 }
   0x3   :  { %5762 = sst [smem:[#allocation43_spill]] %s5706_s2 }
   0x4   :  { %5763 = sst [smem:[#allocation44_spill]] %s5707_s3  ;;  %s4359_s3 = smov 0  }
   0x5   :  { %5764 = sst [smem:[#allocation45_spill]] %s5708_s4 }
   0x6   :  { %5765 = sst [smem:[#allocation46_spill]] %s5709_s5 }
   0x7   :  { %5766 = sst [smem:[#allocation47_spill]] %s5710_s6 }
   0x8 LB: > { %s3487_s28 = sadd.s32 4294967295, %s4239_s3   ;;  %p3491_p0 = scmp.ge.s32.totalorder %s4239_s3, 1  ;;  %s4239_s3 = sphi %s4359_s3, %s33_s3  }
   0x9   : > { %p660_p1 = scmp.lt.s32.totalorder %s4239_s3, 3 }
   0xb   : > { %p661_p2 = pnand %p3491_p0, %p660_p1 }
   0xd   : > { %664 = sbr.rel (%p661_p2) target bundleno = 2187 (0x88b), region = 104 }
  0x12   : > { %s747_s29 = smul.u32 10, %s3487_s28  ;;  %s5767_s23 = sld [smem:[#allocation41_spill]]  ;;  %vm4243_vm0 = vmmov 0  }
  0x13   : > { %s5768_s6 = sld [smem:[#allocation43_spill]] }
  0x14   : > { %p748_p3 = scmp.lt.s32.totalorder %s747_s29, 19  ;;  %s5769_s27 = sld [smem:[#allocation46_spill]] }
  0x15   : > { %s5780_s28 = sld [smem:[#allocation47_spill]] }
  0x16   : > { %s5853_s29 = smov (!%p748_p3, %s747_s29), 19  ;;  %s5848_s5 = sld [smem:[#allocation45_spill]] }
  0x17   : > { %s4370_s30 = sshll.u32 %s5853_s29, 3 }
  0x18   : > { %s4376_s1 = scalar_lea.vmem %s5767_s23, %s4370_s30 }
  0x19   : > { %s4382_s25 = scalar_lea.vmem %s5768_s6, %s4370_s30  ;;  %v790_v0 = vld [vmem:[%s4376_s1] sm:$0xff]  ;;  %v792_v2 = vld [vmem:[%s4376_s1 + $0x10] sm:$0xff]  ;;  %v791_v5 = vld [vmem:[%s4376_s1 + $0x8] sm:$0xff] }
  0x1a   : > { %v800_v1 = vld [vmem:[%s4382_s25] sm:$0xff]  ;;  %v802_v4 = vld [vmem:[%s4382_s25 + $0x10] sm:$0xff]  ;;  %v801_v6 = vld [vmem:[%s4382_s25 + $0x8] sm:$0xff] }
  0x1b   : > { %v810_v3 = vadd.f32 %v800_v1, %v790_v0  ;;  %v812_v7 = vadd.f32 %v802_v4, %v792_v2  ;;  %v793_v8 = vld [vmem:[%s4376_s1 + $0x18] sm:$0xff]  ;;  %v811_v10 = vadd.f32 %v801_v6, %v791_v5  ;;  %v794_v12 = vld [vmem:[%s4376_s1 + $0x20] sm:$0xff]  ;;  %v795_v14 = vld [vmem:[%s4376_s1 + $0x28] sm:$0xff] }
  0x1c   : > { %v803_v9 = vld [vmem:[%s4382_s25 + $0x18] sm:$0xff]  ;;  %v804_v13 = vld [vmem:[%s4382_s25 + $0x20] sm:$0xff]  ;;  %v805_v15 = vld [vmem:[%s4382_s25 + $0x28] sm:$0xff]  ;;  %s5225_s24 = scalar_lea.vmem %s5848_s5, %s4370_s30 }
  0x1d   : > { %822 = vadd.xlane.f32.xlu0 %v810_v3  ;;  %826 = vadd.xlane.f32.xlu1 %v812_v7  ;;  %v813_v11 = vadd.f32 %v803_v9, %v793_v8  ;;  %v796_v16 = vld [vmem:[%s4376_s1 + $0x30] sm:$0xff]  ;;  %v814_v18 = vadd.f32 %v804_v13, %v794_v12  ;;  %v797_v19 = vld [vmem:[%s4376_s1 + $0x38] sm:$0xff]  ;;  %v815_v21 = vadd.f32 %v805_v15, %v795_v14  ;;  %v798_v22 = vld [vmem:[%s4376_s1 + $0x40] sm:$0xff] }
  0x1e   : > { %v806_v17 = vld [vmem:[%s4382_s25 + $0x30] sm:$0xff]  ;;  %v807_v20 = vld [vmem:[%s4382_s25 + $0x38] sm:$0xff]  ;;  %v808_v23 = vld [vmem:[%s4382_s25 + $0x40] sm:$0xff] }
  0x1f   : > { %v816_v24 = vadd.f32 %v806_v17, %v796_v16  ;;  %v799_v25 = vld [vmem:[%s4376_s1 + $0x48] sm:$0xff]  ;;  %v817_v27 = vadd.f32 %v807_v20, %v797_v19  ;;  %v818_v28 = vadd.f32 %v808_v23, %v798_v22  ;;  %v3931_v30 = vld [vmem:[%s5769_s27 + $0xe4] ss:$16 sps:$4 sm:$0xff]   ;;  %v3935_v32 = vld [vmem:[%s5769_s27 + $0xe0] ss:$16 sps:$4 sm:$0xff]   ;;  %s3495_s1 = sshll.u32 %s5853_s29, 2 }
  0x20   : > { %v809_v26 = vld [vmem:[%s4382_s25 + $0x48] sm:$0xff]  ;;  %1184 = vmatprep.subr.bf16.mxu0 %v3931_v30  ;;  %v3937_v4 = vld [vmem:[%s5769_s27 + $0xc4] ss:$16 sps:$4 sm:$0xff]   ;;  %v3947_v16 = vld [vmem:[%s5769_s27 + $0xa0] ss:$16 sps:$4 sm:$0xff]   ;;  %s5411_s25 = scalar_lea.vmem %s5725_s21, %s4370_s30 }
  0x21   : > { %824 = vadd.xlane.f32.xlu0 %v811_v10  ;;  %828 = vadd.xlane.f32.xlu1 %v813_v11  ;;  %v819_v29 = vadd.f32 %v809_v26, %v799_v25  ;;  %v3933_v31 = vld [vmem:[%s5769_s27 + $0xec] ss:$16 sps:$4 sm:$0xff]   ;;  %v3936_v33 = vld [vmem:[%s5769_s27 + $0xe8] ss:$16 sps:$4 sm:$0xff]   ;;  %v3943_v13 = vld [vmem:[%s5769_s27 + $0xa4] ss:$16 sps:$4 sm:$0xff]  }
  0x22   : > { %1267 = vmatprep.subr.bf16.mxu1 %v3933_v31  ;;  %1185 = vmatpush1.bf16.msra.mxu0 %v3935_v32  ;;  %v3939_v5 = vld [vmem:[%s5769_s27 + $0xcc] ss:$16 sps:$4 sm:$0xff]   ;;  %v3942_v8 = vld [vmem:[%s5769_s27 + $0xc8] ss:$16 sps:$4 sm:$0xff]   ;;  %v3953_v20 = vld [vmem:[%s5769_s27 + $0x80] ss:$16 sps:$4 sm:$0xff]  }
  0x23   : > { %1268 = vmatpush1.bf16.msra.mxu1 %v3936_v33  ;;  %1186 = vmatprep.subr.bf16.mxu0 %v3937_v4  ;;  %v3945_v14 = vld [vmem:[%s5769_s27 + $0xac] ss:$16 sps:$4 sm:$0xff]   ;;  %v3948_v17 = vld [vmem:[%s5769_s27 + $0xa8] ss:$16 sps:$4 sm:$0xff]   ;;  %v3955_v22 = vld [vmem:[%s5769_s27 + $0x64] ss:$16 sps:$4 sm:$0xff]  }
  0x24   : > { %1269 = vmatprep.subr.bf16.mxu1 %v3939_v5  ;;  %v3951_v19 = vld [vmem:[%s5769_s27 + $0x8c] ss:$16 sps:$4 sm:$0xff]   ;;  %v3960_v25 = vld [vmem:[%s5769_s27 + $0x68] ss:$16 sps:$4 sm:$0xff]   ;;  %v3961_v26 = vld [vmem:[%s5769_s27 + $0x44] ss:$16 sps:$4 sm:$0xff]  }
  0x25   : > { %830 = vadd.xlane.f32.xlu0 %v814_v18  ;;  %832 = vadd.xlane.f32.xlu1 %v815_v21  ;;  %v3957_v23 = vld [vmem:[%s5769_s27 + $0x6c] ss:$16 sps:$4 sm:$0xff]   ;;  %v3967_v30 = vld [vmem:[%s5769_s27 + $0x24] ss:$16 sps:$4 sm:$0xff]   ;;  %v3971_v32 = vld [vmem:[%s5769_s27 + $0x20] ss:$16 sps:$4 sm:$0xff]  }
  0x26   : > { %v3969_v31 = vld [vmem:[%s5769_s27 + $0x2c] ss:$16 sps:$4 sm:$0xff]   ;;  %v3972_v33 = vld [vmem:[%s5769_s27 + $0x28] ss:$16 sps:$4 sm:$0xff]  }
  0x27   : > { %1270 = vmatpush1.bf16.msra.mxu1 %v3942_v8 }
  0x28   : > { %1271 = vmatprep.subr.bf16.mxu1 %v3945_v14 }
  0x29   : > { %834 = vadd.xlane.f32.xlu0 %v816_v24  ;;  %836 = vadd.xlane.f32.xlu1 %v817_v27 }
  0x2b   : > { %1272 = vmatpush1.bf16.msra.mxu1 %v3948_v17 }
  0x2c   : > { %1273 = vmatprep.subr.bf16.mxu1 %v3951_v19 }
  0x2d   : > { %838 = vadd.xlane.f32.xlu0 %v818_v28  ;;  %840 = vadd.xlane.f32.xlu1 %v819_v29 }
  0xa6   : > { %v823_v34 = vpop.xlane.xlu0 %822  ;;  %v827_v36 = vpop.xlane.xlu1 %826 }
  0xa7   : > { %v843_v35 = vmul.f32 0.0078125, %v823_v34  ;;  %v845_v37 = vmul.f32 0.0078125, %v827_v36  ;;  %v3973_v34 = vld [vmem:[%s5769_s27 + $0x4] ss:$16 sps:$4 sm:$0xff]   ;;  %v3977_v36 = vld [vmem:[%s5769_s27] ss:$16 sps:$4 sm:$0xff]  }
  0xa9   : > { %v4416_v38 = vsub.f32 %v810_v3, %v843_v35  ;;  %v4418_v39 = vsub.f32 %v812_v7, %v845_v37  ;;  %v3941_v7 = vld [vmem:[%s5769_s27 + $0xc0] ss:$16 sps:$4 sm:$0xff]   ;;  %v3975_v35 = vld [vmem:[%s5769_s27 + $0xc] ss:$16 sps:$4 sm:$0xff]   ;;  %v3978_v37 = vld [vmem:[%s5769_s27 + $0x8] ss:$16 sps:$4 sm:$0xff]  }
  0xaa   : > { %v825_v40 = vpop.xlane.xlu0 %824  ;;  %v829_v43 = vpop.xlane.xlu1 %828  ;;  %1187 = vmatpush1.bf16.msra.mxu0 %v3941_v7 }
  0xab   : > { %v844_v41 = vmul.f32 0.0078125, %v825_v40  ;;  %v863_v42 = vmul.f32 %v4416_v38, %v4416_v38  ;;  %v846_v44 = vmul.f32 0.0078125, %v829_v43  ;;  %v865_v46 = vmul.f32 %v4418_v39, %v4418_v39  ;;  %1188 = vmatprep.subr.bf16.mxu0 %v3943_v13 }
  0xac   : > { %v4241_v40 = vmov 0  }
  0xad   : > { %v4422_v45 = vsub.f32 %v811_v10, %v844_v41  ;;  %873 = vadd.xlane.f32.xlu0 %v863_v42  ;;  %v4426_v47 = vsub.f32 %v813_v11, %v846_v44  ;;  %1216 = vmatprep.mubr.bf16.mxu0 %v4241_v40  ;;  %v3979_v41 = vld [vmem:[%s5711_s7 + $0x78] sm:$0xff]  }
  0xae   : > { %v831_v48 = vpop.xlane.xlu0 %830  ;;  %v833_v51 = vpop.xlane.xlu1 %832  ;;  %1189 = vmatpush1.bf16.msra.mxu0 %v3947_v16  ;;  %1299 = vmatprep.mubr.bf16.mxu1 %v4241_v40  ;;  %v3980_v42 = vld [vmem:[%s5711_s7 + $0xf8] sm:$0xff]  }
  0xaf   : > { %v847_v49 = vmul.f32 0.0078125, %v831_v48  ;;  %v864_v50 = vmul.f32 %v4422_v45, %v4422_v45  ;;  %v848_v52 = vmul.f32 0.0078125, %v833_v51  ;;  %v866_v54 = vmul.f32 %v4426_v47, %v4426_v47  ;;  %3930 = vset.pattern.permute.xlu1 %v4241_v40  ;;  %3929 = vset.pattern.permute.xlu0 %v4241_v40 }
  0xb1   : > { %v4430_v53 = vsub.f32 %v814_v18, %v847_v49  ;;  %877 = vadd.xlane.f32.xlu0 %v865_v46  ;;  %875 = vadd.xlane.f32.xlu1 %v864_v50  ;;  %v4434_v55 = vsub.f32 %v815_v21, %v848_v52  ;;  %v3949_v18 = vld [vmem:[%s5769_s27 + $0x84] ss:$16 sps:$4 sm:$0xff]   ;;  %v3954_v21 = vld [vmem:[%s5769_s27 + $0x88] ss:$16 sps:$4 sm:$0xff]  }
  0xb2   : > { %v835_v56 = vpop.xlane.xlu0 %834  ;;  %v837_v59 = vpop.xlane.xlu1 %836  ;;  %1190 = vmatprep.subr.bf16.mxu0 %v3949_v18  ;;  %1274 = vmatpush1.bf16.msra.mxu1 %v3954_v21 }
  0xb3   : > { %v849_v57 = vmul.f32 0.0078125, %v835_v56  ;;  %v867_v58 = vmul.f32 %v4430_v53, %v4430_v53  ;;  %v850_v60 = vmul.f32 0.0078125, %v837_v59  ;;  %v868_v62 = vmul.f32 %v4434_v55, %v4434_v55  ;;  %1191 = vmatpush1.bf16.msra.mxu0 %v3953_v20  ;;  %1275 = vmatprep.subr.bf16.mxu1 %v3957_v23  ;;  %v3500_v20 = vld [vmem:[%s5720_s16] ss:$0 sm:$0xff] }
  0xb4   : > { %1192 = vmatprep.subr.bf16.mxu0 %v3955_v22 }
  0xb5   : > { %v4438_v61 = vsub.f32 %v816_v24, %v849_v57  ;;  %879 = vadd.xlane.f32.xlu1 %v866_v54  ;;  %881 = vadd.xlane.f32.xlu0 %v867_v58  ;;  %v4442_v63 = vsub.f32 %v817_v27, %v850_v60  ;;  %v3959_v24 = vld [vmem:[%s5769_s27 + $0x60] ss:$16 sps:$4 sm:$0xff]   ;;  %v3963_v27 = vld [vmem:[%s5769_s27 + $0x4c] ss:$16 sps:$4 sm:$0xff]  }
  0xb6   : > { %v839_v0 = vpop.xlane.xlu0 %838  ;;  %v841_v3 = vpop.xlane.xlu1 %840  ;;  %1276 = vmatpush1.bf16.msra.mxu1 %v3960_v25 }
  0xb7   : > { %v851_v1 = vmul.f32 0.0078125, %v839_v0  ;;  %v869_v2 = vmul.f32 %v4438_v61, %v4438_v61  ;;  %v852_v6 = vmul.f32 0.0078125, %v841_v3  ;;  %v870_v10 = vmul.f32 %v4442_v63, %v4442_v63  ;;  %1193 = vmatpush1.bf16.msra.mxu0 %v3959_v24  ;;  %1277 = vmatprep.subr.bf16.mxu1 %v3963_v27 }
  0xb8   : > { %1194 = vmatprep.subr.bf16.mxu0 %v3961_v26 }
  0xb9   : > { %v4458_v9 = vsub.f32 %v818_v28, %v851_v1  ;;  %883 = vadd.xlane.f32.xlu1 %v868_v62  ;;  %885 = vadd.xlane.f32.xlu0 %v869_v2  ;;  %v4462_v11 = vsub.f32 %v819_v29, %v852_v6  ;;  %v3965_v28 = vld [vmem:[%s5769_s27 + $0x40] ss:$16 sps:$4 sm:$0xff]   ;;  %v3966_v29 = vld [vmem:[%s5769_s27 + $0x48] ss:$16 sps:$4 sm:$0xff]  }
  0xba   : > { %1278 = vmatpush1.bf16.msra.mxu1 %v3966_v29 }
  0xbb   : > { %v871_v12 = vmul.f32 %v4458_v9, %v4458_v9  ;;  %v872_v15 = vmul.f32 %v4462_v11, %v4462_v11  ;;  %1195 = vmatpush1.bf16.msra.mxu0 %v3965_v28  ;;  %1279 = vmatprep.subr.bf16.mxu1 %v3969_v31 }
  0xbc   : > { %1196 = vmatprep.subr.bf16.mxu0 %v3967_v30 }
  0xbd   : > { %887 = vadd.xlane.f32.xlu1 %v870_v10  ;;  %889 = vadd.xlane.f32.xlu0 %v871_v12  ;;  %v4554_v10 = vld [vmem:[%s5719_s15] ss:$0 sm:$0xff] }
  0xbe   : > { %1280 = vmatpush1.bf16.msra.mxu1 %v3972_v33 }
  0xbf   : > { %1197 = vmatpush1.bf16.msra.mxu0 %v3971_v32  ;;  %1281 = vmatprep.subr.bf16.mxu1 %v3975_v35 }
  0xc0   : > { %1198 = vmatprep.subr.bf16.mxu0 %v3973_v34 }
  0xc1   : > { %891 = vadd.xlane.f32.xlu1 %v872_v15 }
  0xc2   : > { %1282 = vmatpush1.bf16.msra.mxu1 %v3978_v37 }
  0xc3   : > { %1199 = vmatpush1.bf16.msra.mxu0 %v3977_v36  ;;  %3676 = vmatprep.subr.bf16.mxu1 %v3980_v42 }
  0xc4   : > { %3630 = vmatprep.subr.bf16.mxu0 %v3979_v41 }
 0x136   : > { %v874_v43 = vpop.xlane.xlu0 %873 }
 0x137   : > { %v893_v44 = vmul.f32 0.0078125, %v874_v43 }
 0x139   : > { %v903_v46 = vadd.f32 1e-05, %v893_v44 }
 0x13a   : > { %v876_v48 = vpop.xlane.xlu1 %875  ;;  %v878_v49 = vpop.xlane.xlu0 %877 }
 0x13b   : > { %4043 = vrsqrt.f32 %v903_v46  ;;  %v894_v50 = vmul.f32 0.0078125, %v876_v48  ;;  %v895_v51 = vmul.f32 0.0078125, %v878_v49 }
 0x13d   : > { %v904_v52 = vadd.f32 1e-05, %v894_v50  ;;  %v905_v54 = vadd.f32 1e-05, %v895_v51 }
 0x13e   : > { %v880_v56 = vpop.xlane.xlu1 %879  ;;  %v882_v57 = vpop.xlane.xlu0 %881 }
 0x13f   : > { %4045 = vrsqrt.f32 %v904_v52  ;;  %v896_v58 = vmul.f32 0.0078125, %v880_v56  ;;  %v897_v60 = vmul.f32 0.0078125, %v882_v57 }
 0x140   : > { %4047 = vrsqrt.f32 %v905_v54 }
 0x141   : > { %v906_v59 = vadd.f32 1e-05, %v896_v58  ;;  %v907_v1 = vadd.f32 1e-05, %v897_v60 }
 0x142   : > { %v884_v62 = vpop.xlane.xlu1 %883  ;;  %v886_v3 = vpop.xlane.xlu0 %885 }
 0x143   : > { %4049 = vrsqrt.f32 %v906_v59  ;;  %v898_v0 = vmul.f32 0.0078125, %v884_v62  ;;  %v899_v7 = vmul.f32 0.0078125, %v886_v3  ;;  %v3981_v62 = vld [vmem:[%s5711_s7 + $0x38] sm:$0xff]   ;;  %v3986_v3 = vld [vmem:[%s5711_s7 + $0xb0] sm:$0xff]  }
 0x145   : > { %v908_v2 = vadd.f32 1e-05, %v898_v0  ;;  %v909_v14 = vadd.f32 1e-05, %v899_v7  ;;  %v3982_v0 = vld [vmem:[%s5711_s7 + $0xb8] sm:$0xff]   ;;  %v3990_v7 = vld [vmem:[%s5711_s7 + $0xa8] sm:$0xff]  }
 0x146   : > { %v888_v4 = vpop.xlane.xlu1 %887  ;;  %v890_v16 = vpop.xlane.xlu0 %889 }
 0x147   : > { %4051 = vrsqrt.f32 %v908_v2  ;;  %v900_v5 = vmul.f32 0.0078125, %v888_v4  ;;  %v901_v23 = vmul.f32 0.0078125, %v890_v16  ;;  %v3985_v2 = vld [vmem:[%s5711_s7 + $0x30] sm:$0xff]   ;;  %v3987_v4 = vld [vmem:[%s5711_s7 + $0x68] sm:$0xff]   ;;  %v3997_v16 = vld [vmem:[%s5711_s7 + $0x18] sm:$0xff]  }
 0x148   : > { %v4044_v6 = vpop.eup %4043  ;;  %4053 = vrsqrt.f32 %v907_v1  ;;  %v3984_v1 = vld [vmem:[%s5711_s7 + $0xf0] sm:$0xff]  }
 0x149   : > { %v923_v8 = vmul.f32 %v4044_v6, %v4416_v38  ;;  %v910_v12 = vadd.f32 1e-05, %v900_v5  ;;  %v911_v31 = vadd.f32 1e-05, %v901_v23  ;;  %v3988_v5 = vld [vmem:[%s5711_s7 + $0xe8] sm:$0xff]  }
 0x14a   : > { %v892_v15 = vpop.xlane.xlu1 %891  ;;  %v3989_v6 = vld [vmem:[%s5711_s7 + $0x28] sm:$0xff]  }
 0x14b   : > { %v939_v18 = vmul.f32 %v4554_v10, %v923_v8  ;;  %4055 = vrsqrt.f32 %v910_v12  ;;  %v902_v38 = vmul.f32 0.0078125, %v892_v15  ;;  %v3991_v8 = vld [vmem:[%s5711_s7 + $0x60] sm:$0xff]   ;;  %v3996_v15 = vld [vmem:[%s5711_s7 + $0xd8] sm:$0xff]   ;;  %v4005_v23 = vld [vmem:[%s5711_s7 + $0x8] sm:$0xff]  }
 0x14c   : > { %v4046_v13 = vpop.eup %4045  ;;  %4057 = vrsqrt.f32 %v909_v14  ;;  %v3993_v12 = vld [vmem:[%s5711_s7 + $0x20] sm:$0xff]   ;;  %v3995_v14 = vld [vmem:[%s5711_s7 + $0x58] sm:$0xff]  }
 0x14d   : > { %v924_v17 = vmul.f32 %v4046_v13, %v4422_v45  ;;  %v4048_v19 = vpop.eup %4047  ;;  %v4562_v24 = vadd.f32 %v3500_v20, %v939_v18  ;;  %v912_v27 = vadd.f32 1e-05, %v902_v38  ;;  %v3994_v13 = vld [vmem:[%s5711_s7 + $0xa0] sm:$0xff]   ;;  %v3999_v18 = vld [vmem:[%s5711_s7 + $0x50] sm:$0xff]  }
 0x14e   : > { %v925_v45 = vmul.f32 %v4048_v19, %v4418_v39  ;;  %v4000_v19 = vld [vmem:[%s5711_s7 + $0xd0] sm:$0xff]  }
 0x14f   : > { %v940_v21 = vmul.f32 %v4554_v10, %v924_v17  ;;  %5770 = vst [vmem:[#allocation2_spill] sm:$0xff] %v4562_v24  ;;  %4059 = vrsqrt.f32 %v912_v27  ;;  %v3998_v17 = vld [vmem:[%s5711_s7 + $0x98] sm:$0xff]   ;;  %v4002_v38 = vld [vmem:[%s5711_s7 + $0x90] sm:$0xff]   ;;  %v4008_v27 = vld [vmem:[%s5711_s7 + $0xc0] sm:$0xff]  }
 0x150   : > { %v4050_v22 = vpop.eup %4049  ;;  %v941_v32 = vmul.f32 %v4554_v10, %v925_v45  ;;  %4061 = vrsqrt.f32 %v911_v31  ;;  %v4006_v45 = vld [vmem:[%s5711_s7 + $0x88] sm:$0xff]  }
 0x151   : > { %v4564_v25 = vadd.f32 %v3500_v20, %v940_v21  ;;  %v926_v26 = vmul.f32 %v4050_v22, %v4426_v47  ;;  %v4003_v21 = vld [vmem:[%s5711_s7 + $0x48] sm:$0xff]  }
 0x152   : > { %v4577_v34 = vadd.f32 %v3500_v20, %v941_v32  ;;  %v4004_v22 = vld [vmem:[%s5711_s7 + $0xc8] sm:$0xff]  }
 0x153   : > { %5771 = vst [vmem:[#allocation3_spill] sm:$0xff] %v4564_v25  ;;  %v965_v28 = vpack.c.bf16 %v4564_v25, %v4562_v24  ;;  %v942_v29 = vmul.f32 %v4554_v10, %v926_v26  ;;  %v4007_v26 = vld [vmem:[%s5711_s7 + $0x40] sm:$0xff]  }
 0x154   : > { %v4052_v30 = vpop.eup %4051  ;;  %5773 = vst [vmem:[#allocation5_spill] sm:$0xff] %v4577_v34 }
 0x155   : > { %1217 = vmatmul.mubr.bf16.vlgmr.msra.gmra.mxu0 %v965_v28  ;;  %1300 = vmatmul.mubr.bf16.vlgmr.msra.gmra.mxu1 %v965_v28  ;;  %v4054_v33 = vpop.eup %4053  ;;  %v4574_v39 = vadd.f32 %v3500_v20, %v942_v29  ;;  %v928_v47 = vmul.f32 %v4052_v30, %v4434_v55  ;;  %v4009_v28 = vld [vmem:[%s5711_s7] sm:$0xff]   ;;  %v1004_v30 = vlaneseq }
 0x156   : > { %1226 = vmatprep.mubr.bf16.mxu0 %v4241_v40  ;;  %1309 = vmatprep.mubr.bf16.mxu1 %v4241_v40  ;;  %v927_v35 = vmul.f32 %v4054_v33, %v4430_v53  ;;  %v4010_v29 = vld [vmem:[%s5711_s7 + $0x80] sm:$0xff]  }
 0x157   : > { %5772 = vst [vmem:[#allocation4_spill] sm:$0xff] %v4574_v39  ;;  %v966_v36 = vpack.c.bf16 %v4574_v39, %v4577_v34  ;;  %v944_v37 = vmul.f32 %v4554_v10, %v928_v47  ;;  %3631 = vmatpush3.bf16.msra.mxu0 %v3981_v62  ;;  %3677 = vmatpush3.bf16.msra.mxu1 %v3982_v0  ;;  %v1005_v31 = vshrl.u32 %v1004_v30, 7  ;;  %v1002_v47 = vld [vmem:[%s5780_s28] sm:$0xf]  ;;  %s5850_s28 = sld [smem:[#allocation42_spill]] }
 0x158   : > { %v4056_v41 = vpop.eup %4055  ;;  %v943_v43 = vmul.f32 %v4554_v10, %v927_v35  ;;  %3678 = vmatprep.subr.bf16.mxu1 %v3984_v1 }
 0x159   : > { %v4058_v42 = vpop.eup %4057  ;;  %v4586_v55 = vadd.f32 %v3500_v20, %v944_v37  ;;  %v930_v44 = vmul.f32 %v4056_v41, %v4442_v63  ;;  %v1006_v32 = vsub.s32 0, %v1005_v31  ;;  %v1014_v33 = vsub.s32 2, %v1005_v31 }
 0x15a   : > { %v4589_v53 = vadd.f32 %v3500_v20, %v943_v43  ;;  %v929_v46 = vmul.f32 %v4058_v42, %v4438_v61  ;;  %v1010_v35 = vsub.s32 1, %v1005_v31  ;;  %v1018_v41 = vsub.s32 3, %v1005_v31 }
 0x15b   : > { %5774 = vst [vmem:[#allocation6_spill] sm:$0xff] %v4586_v55  ;;  %v946_v49 = vmul.f32 %v4554_v10, %v930_v44  ;;  %3679 = vmatpush3.bf16.msra.mxu1 %v3986_v3  ;;  %v4711_v37 = vrot.slane %v1002_v47, %v1014_v33 }
 0x15c   : > { %5775 = vst [vmem:[#allocation7_spill] sm:$0xff] %v4589_v53  ;;  %v967_v48 = vpack.c.bf16 %v4586_v55, %v4589_v53  ;;  %v4060_v50 = vpop.eup %4059  ;;  %v945_v51 = vmul.f32 %v4554_v10, %v929_v46  ;;  %3680 = vmatprep.subr.bf16.mxu1 %v3988_v5  ;;  %v4713_v44 = vrot.slane %v1002_v47, %v1010_v35 }
 0x15d   : > { %1227 = vmatmul.mubr.bf16.gmra.mxu0 %v966_v36  ;;  %1310 = vmatmul.mubr.bf16.gmra.mxu1 %v966_v36  ;;  %v4062_v52 = vpop.eup %4061  ;;  %v4598_v63 = vadd.f32 %v3500_v20, %v946_v49  ;;  %v932_v54 = vmul.f32 %v4060_v50, %v4462_v11  ;;  %v4709_v36 = vrot.slane %v1002_v47, %v1006_v32  ;;  %s5355_s4 = scalar_lea.vmem %s5850_s28, %s4370_s30 }
 0x15e   : > { %1236 = vmatprep.mubr.bf16.mxu0 %v4241_v40  ;;  %1319 = vmatprep.mubr.bf16.mxu1 %v4241_v40  ;;  %v4601_v61 = vadd.f32 %v3500_v20, %v945_v51  ;;  %v931_v56 = vmul.f32 %v4062_v52, %v4458_v9  ;;  %v4717_v50 = vrot.slane %v1002_v47, %v1018_v41 }
 0x15f   : > { %5776 = vst [vmem:[#allocation8_spill] sm:$0xff] %v4598_v63  ;;  %v948_v58 = vmul.f32 %v4554_v10, %v932_v54  ;;  %3681 = vmatpush3.bf16.msra.mxu1 %v3990_v7 }
 0x160   : > { %5777 = vst [vmem:[#allocation9_spill] sm:$0xff] %v4601_v61  ;;  %v968_v57 = vpack.c.bf16 %v4598_v63, %v4601_v61  ;;  %v947_v59 = vmul.f32 %v4554_v10, %v931_v56  ;;  %v3992_v10 = vld [vmem:[%s5711_s7 + $0xe0] sm:$0xff]  }
 0x161   : > { %v4610_v60 = vadd.f32 %v3500_v20, %v948_v58  ;;  %3682 = vmatprep.subr.bf16.mxu1 %v3992_v10 }
 0x162   : > { %v4612_v11 = vadd.f32 %v3500_v20, %v947_v59  ;;  %v4001_v20 = vld [vmem:[%s5711_s7 + $0x10] sm:$0xff]  }
 0x163   : > { %5778 = vst [vmem:[#allocation10_spill] sm:$0xff] %v4610_v60  ;;  %3683 = vmatpush3.bf16.msra.mxu1 %v3994_v13 }
 0x164   : > { %5779 = vst [vmem:[#allocation11_spill] sm:$0xff] %v4612_v11  ;;  %v969_v9 = vpack.c.bf16 %v4610_v60, %v4612_v11  ;;  %3684 = vmatprep.subr.bf16.mxu1 %v3996_v15 }
 0x165   : > { %1237 = vmatmul.mubr.bf16.gmra.mxu0 %v967_v48  ;;  %1320 = vmatmul.mubr.bf16.gmra.mxu1 %v967_v48 }
 0x166   : > { %1246 = vmatprep.mubr.bf16.mxu0 %v4241_v40  ;;  %1329 = vmatprep.mubr.bf16.mxu1 %v4241_v40 }
 0x167   : > { %3685 = vmatpush3.bf16.msra.mxu1 %v3998_v17 }
 0x168   : > { %3686 = vmatprep.subr.bf16.mxu1 %v4000_v19 }
 0x16b   : > { %3687 = vmatpush3.bf16.msra.mxu1 %v4002_v38 }
 0x16c   : > { %3688 = vmatprep.subr.bf16.mxu1 %v4004_v22 }
 0x16d   : > { %1247 = vmatmul.mubr.bf16.gmra.mxu0 %v968_v57  ;;  %1330 = vmatmul.mubr.bf16.gmra.mxu1 %v968_v57 }
 0x16e   : > { %1256 = vmatprep.mubr.bf16.mxu0 %v4241_v40  ;;  %1339 = vmatprep.mubr.bf16.mxu1 %v4241_v40  ;;  %v3983_v40 = vld [vmem:[%s5711_s7 + $0x70] sm:$0xff]  }
 0x16f   : > { %3632 = vmatprep.subr.bf16.mxu0 %v3983_v40  ;;  %3689 = vmatpush3.bf16.msra.mxu1 %v4006_v45 }
 0x170   : > { %3633 = vmatpush3.bf16.msra.mxu0 %v3985_v2  ;;  %3690 = vmatprep.subr.bf16.mxu1 %v4008_v27 }
 0x171   : > { %3634 = vmatprep.subr.bf16.mxu0 %v3987_v4 }
 0x173   : > { %3691 = vmatpush3.bf16.msra.mxu1 %v4010_v29 }
 0x174   : > { %3635 = vmatpush3.bf16.msra.mxu0 %v3989_v6 }
 0x175   : > { %1257 = vmatmul.mubr.bf16.gmra.mxu0 %v969_v9  ;;  %1340 = vmatmul.mubr.bf16.gmra.mxu1 %v969_v9 }
 0x176   : > { %3636 = vmatprep.subr.bf16.mxu0 %v3991_v8 }
 0x178   : > { %3637 = vmatpush3.bf16.msra.mxu0 %v3993_v12 }
 0x179   : > { %3638 = vmatprep.subr.bf16.mxu0 %v3995_v14 }
 0x17c   : > { %3639 = vmatpush3.bf16.msra.mxu0 %v3997_v16 }
 0x17d   : > { %3640 = vmatprep.subr.bf16.mxu0 %v3999_v18 }
 0x180   : > { %3641 = vmatpush3.bf16.msra.mxu0 %v4001_v20 }
 0x181   : > { %3642 = vmatprep.subr.bf16.mxu0 %v4003_v21 }
 0x184   : > { %3643 = vmatpush3.bf16.msra.mxu0 %v4005_v23 }
 0x185   : > { %3644 = vmatprep.subr.bf16.mxu0 %v4007_v26 }
 0x188   : > { %3645 = vmatpush3.bf16.msra.mxu0 %v4009_v28 }
 0x215   : > { %v1218_v42 = vpop.f32.mrf.mxu0  ;;  %v1301_v43 = vpop.f32.mrf.mxu1 }
 0x216   : > { %v1219_v46 = vadd.f32 %v1218_v42, %v4709_v36  ;;  %v1302_v48 = vadd.f32 %v1301_v43, %v4711_v37 }
 0x217   : > { %v1220_v49 = vpop.f32.mrf.mxu0  ;;  %v1303_v51 = vpop.f32.mrf.mxu1 }
 0x218   : > { %v1390_v52 = vmul.f32 0.044715, %v1219_v46  ;;  %v1392_v54 = vmul.f32 0.044715, %v1302_v48  ;;  %v4720_v56 = vadd.f32 %v1220_v49, %v4713_v44  ;;  %v4725_v40 = vadd.f32 %v1303_v51, %v4717_v50 }
 0x219   : > { %v1222_v57 = vpop.f32.mrf.mxu0  ;;  %v1305_v58 = vpop.f32.mrf.mxu1  ;;  %v4732_v20 = vmul.f32 0.5, %v1219_v46  ;;  %v4738_v23 = vmul.f32 0.5, %v1302_v48 }
 0x21a   : > { %v1430_v59 = vmul.f32 %v1390_v52, %v1219_v46  ;;  %v1432_v9 = vmul.f32 %v1392_v54, %v1302_v48  ;;  %v1223_v62 = vadd.f32 %v1222_v57, %v4709_v36  ;;  %v1306_v0 = vadd.f32 %v1305_v58, %v4711_v37 }
 0x21b   : > { %v1224_v1 = vpop.f32.mrf.mxu0  ;;  %v1307_v2 = vpop.f32.mrf.mxu1  ;;  %v1391_v6 = vmul.f32 0.044715, %v4720_v56  ;;  %v1393_v16 = vmul.f32 0.044715, %v4725_v40  ;;  %5781 = vst [vmem:[#allocation12_spill] sm:$0xff] %v4738_v23  ;;  %v4751_v33 = vmul.f32 0.5, %v4720_v56 }
 0x21c   : > { %v1470_v3 = vmul.f32 %v1430_v59, %v1219_v46  ;;  %v1472_v4 = vmul.f32 %v1432_v9, %v1302_v48  ;;  %v1394_v5 = vmul.f32 0.044715, %v1223_v62  ;;  %v1396_v7 = vmul.f32 0.044715, %v1306_v0 }
 0x21d   : > { %v1228_v8 = vpop.f32.mrf.mxu0  ;;  %v1311_v10 = vpop.f32.mrf.mxu1  ;;  %v4729_v14 = vadd.f32 %v1224_v1, %v4713_v44  ;;  %v4736_v22 = vadd.f32 %v1307_v2, %v4717_v50  ;;  %v1431_v45 = vmul.f32 %v1391_v6, %v4720_v56  ;;  %5783 = vst [vmem:[#allocation14_spill] sm:$0xff] %v4751_v33  ;;  %v1433_v35 = vmul.f32 %v1393_v16, %v4725_v40 }
 0x21e   : > { %v1510_v12 = vadd.f32 %v1470_v3, %v1219_v46  ;;  %v1434_v13 = vmul.f32 %v1394_v5, %v1223_v62  ;;  %v1512_v15 = vadd.f32 %v1472_v4, %v1302_v48  ;;  %v1436_v17 = vmul.f32 %v1396_v7, %v1306_v0 }
 0x21f   : > { %v1230_v18 = vpop.f32.mrf.mxu0  ;;  %v1313_v19 = vpop.f32.mrf.mxu1  ;;  %v1395_v21 = vmul.f32 0.044715, %v4729_v14  ;;  %v4742_v27 = vadd.f32 %v1228_v8, %v4709_v36  ;;  %v4745_v31 = vadd.f32 %v1311_v10, %v4711_v37  ;;  %v4755_v46 = vmul.f32 0.5, %v4725_v40 }
 0x220   : > { %v1474_v38 = vmul.f32 %v1434_v13, %v1223_v62  ;;  %v1476_v26 = vmul.f32 %v1436_v17, %v1306_v0  ;;  %v1550_v30 = vmul.f32 0.7978846, %v1510_v12  ;;  %v4748_v32 = vadd.f32 %v1230_v18, %v4713_v44 }
 0x221   : > { %v1232_v28 = vpop.f32.mrf.mxu0  ;;  %v1315_v29 = vpop.f32.mrf.mxu1  ;;  %5782 = vst [vmem:[#allocation13_spill] sm:$0xff] %v4745_v31  ;;  %v1552_v47 = vmul.f32 0.7978846, %v1512_v15  ;;  %5784 = vst [vmem:[#allocation15_spill] sm:$0xff] %v4755_v46  ;;  %v4757_v48 = vmul.f32 0.5, %v1223_v62  ;;  %v1435_v51 = vmul.f32 %v1395_v21, %v4729_v14  ;;  %v4762_v54 = vmul.f32 %v1431_v45, %v4720_v56 }
 0x222   : > { %v1514_v41 = vadd.f32 %v1474_v38, %v1223_v62  ;;  %v1516_v49 = vadd.f32 %v1476_v26, %v1306_v0  ;;  %v1397_v52 = vmul.f32 0.044715, %v4736_v22  ;;  %v4764_v57 = vmul.f32 0.5, %v1306_v0 }
 0x223   : > { %v1234_v42 = vpop.f32.mrf.mxu0  ;;  %v1317_v43 = vpop.f32.mrf.mxu1  ;;  %v1398_v58 = vmul.f32 0.044715, %v4742_v27  ;;  %v4768_v59 = vadd.f32 %v1313_v19, %v4717_v50  ;;  %4063 = vtanh.f32 %v1550_v30  ;;  %v1400_v62 = vmul.f32 0.044715, %v4745_v31 }
 0x224   : > { %5785 = vst [vmem:[#allocation16_spill] sm:$0xff] %v4764_v57  ;;  %v1399_v2 = vmul.f32 0.044715, %v4748_v32  ;;  %v4773_v3 = vadd.f32 %v1232_v28, %v4709_v36  ;;  %4065 = vtanh.f32 %v1552_v47  ;;  %v4776_v4 = vmul.f32 %v1433_v35, %v4725_v40 }
 0x225   : > { %v1238_v9 = vpop.f32.mrf.mxu0  ;;  %v1321_v1 = vpop.f32.mrf.mxu1  ;;  %v1554_v0 = vmul.f32 0.7978846, %v1514_v41  ;;  %v4779_v5 = vadd.f32 %v1315_v29, %v4711_v37  ;;  %v1556_v8 = vmul.f32 0.7978846, %v1516_v49  ;;  %v4782_v10 = vmul.f32 %v1435_v51, %v4729_v14 }
 0x226   : > { %5786 = vst [vmem:[#allocation17_spill] sm:$0xff] %v4773_v3  ;;  %v1437_v12 = vmul.f32 %v1397_v52, %v4736_v22  ;;  %v4786_v13 = vadd.f32 %v1234_v42, %v4713_v44  ;;  %v1438_v15 = vmul.f32 %v1398_v58, %v4742_v27  ;;  %v1401_v16 = vmul.f32 0.044715, %v4768_v59 }
 0x227   : > { %5787 = vst [vmem:[#allocation18_spill] sm:$0xff] %v4779_v5  ;;  %v1240_v6 = vpop.f32.mrf.mxu0  ;;  %v1323_v7 = vpop.f32.mrf.mxu1  ;;  %v4791_v17 = vadd.f32 %v1317_v43, %v4717_v50  ;;  %v4794_v18 = vadd.f32 %v1238_v9, %v4709_v36  ;;  %v1440_v21 = vmul.f32 %v1400_v62, %v4745_v31  ;;  %v1439_v45 = vmul.f32 %v1399_v2, %v4748_v32 }
 0x228   : > { %v1402_v26 = vmul.f32 0.044715, %v4773_v3  ;;  %v4800_v28 = vadd.f32 %v1321_v1, %v4711_v37  ;;  %4067 = vtanh.f32 %v1554_v0  ;;  %v1404_v29 = vmul.f32 0.044715, %v4779_v5 }
 0x229   : > { %5788 = vst [vmem:[#allocation19_spill] sm:$0xff] %v4794_v18  ;;  %v1242_v19 = vpop.f32.mrf.mxu0  ;;  %v1325_v38 = vpop.f32.mrf.mxu1  ;;  %v1403_v30 = vmul.f32 0.044715, %v4786_v13  ;;  %v4805_v47 = vadd.f32 %v1240_v6, %v4713_v44  ;;  %4069 = vtanh.f32 %v1556_v8  ;;  %v4808_v42 = vmul.f32 %v1437_v12, %v4736_v22 }
 0x22a   : > { %5789 = vst [vmem:[#allocation20_spill] sm:$0xff] %v4800_v28  ;;  %v1405_v43 = vmul.f32 0.044715, %v4791_v17  ;;  %v1406_v49 = vmul.f32 0.044715, %v4794_v18  ;;  %v4813_v51 = vmul.f32 %v1438_v15, %v4742_v27  ;;  %v1441_v52 = vmul.f32 %v1401_v16, %v4768_v59 }
 0x22b   : > { %5790 = vst [vmem:[#allocation21_spill] sm:$0xff] %v4805_v47  ;;  %v1244_v35 = vpop.f32.mrf.mxu0  ;;  %v1327_v41 = vpop.f32.mrf.mxu1  ;;  %v1408_v58 = vmul.f32 0.044715, %v4800_v28  ;;  %v4818_v9 = vadd.f32 %v1323_v7, %v4717_v50  ;;  %v4821_v2 = vmul.f32 %v1440_v21, %v4745_v31  ;;  %v4824_v0 = vmul.f32 %v1439_v45, %v4748_v32 }
 0x22c   : > { %v1442_v6 = vmul.f32 %v1402_v26, %v4773_v3  ;;  %v4828_v8 = vadd.f32 %v1242_v19, %v4709_v36  ;;  %v1444_v12 = vmul.f32 %v1404_v29, %v4779_v5  ;;  %v1443_v15 = vmul.f32 %v1403_v30, %v4786_v13 }
 0x22d   : > { %5791 = vst [vmem:[#allocation22_spill] sm:$0xff] %v4818_v9  ;;  %v1248_v1 = vpop.f32.mrf.mxu0  ;;  %v1331_v62 = vpop.f32.mrf.mxu1  ;;  %5792 = vst [vmem:[#allocation23_spill] sm:$0xff] %v4821_v2  ;;  %v1407_v7 = vmul.f32 0.044715, %v4805_v47  ;;  %v1409_v16 = vmul.f32 0.044715, %v4818_v9  ;;  %v1445_v21 = vmul.f32 %v1405_v43, %v4791_v17  ;;  %v1446_v45 = vmul.f32 %v1406_v49, %v4794_v18 }
 0x22e   : > { %5793 = vst [vmem:[#allocation24_spill] sm:$0xff] %v4828_v8  ;;  %v4837_v63 = vadd.f32 %v1325_v38, %v4711_v37  ;;  %v4840_v19 = vadd.f32 %v1244_v35, %v4713_v44  ;;  %v4843_v26 = vmul.f32 %v1441_v52, %v4768_v59  ;;  %v1448_v29 = vmul.f32 %v1408_v58, %v4800_v28 }
 0x22f   : > { %v1250_v60 = vpop.f32.mrf.mxu0  ;;  %v1333_v11 = vpop.f32.mrf.mxu1  ;;  %v1410_v30 = vmul.f32 0.044715, %v4828_v8  ;;  %v4848_v61 = vadd.f32 %v1327_v41, %v4717_v50  ;;  %v4851_v49 = vmul.f32 %v1442_v6, %v4773_v3  ;;  %v4854_v38 = vadd.f32 %v1248_v1, %v4709_v36 }
 0x230   : > { %5794 = vst [vmem:[#allocation25_spill] sm:$0xff] %v4837_v63  ;;  %v4857_v35 = vadd.f32 %v1331_v62, %v4711_v37  ;;  %v4860_v52 = vadd.f32 %v1250_v60, %v4713_v44  ;;  %v4862_v58 = vpop.eup %4063  ;;  %v4865_v53 = vmul.f32 %v1444_v12, %v4779_v5  ;;  %v4868_v41 = vmul.f32 %v1443_v15, %v4786_v13 }
 0x231   : > { %v1252_v55 = vpop.f32.mrf.mxu0  ;;  %v1335_v43 = vpop.f32.mrf.mxu1  ;;  %5795 = vst [vmem:[#allocation26_spill] sm:$0xff] %v4851_v49  ;;  %v1447_v6 = vmul.f32 %v1407_v7, %v4805_v47  ;;  %v1449_v39 = vmul.f32 %v1409_v16, %v4818_v9  ;;  %v4875_v62 = vmul.f32 %v1445_v21, %v4791_v17  ;;  %v4878_v60 = vmul.f32 %v1446_v45, %v4794_v18 }
 0x232   : > { %5796 = vst [vmem:[#allocation27_spill] sm:$0xff] %v4865_v53  ;;  %v4872_v25 = vpop.eup %4065  ;;  %v1412_v12 = vmul.f32 0.044715, %v4837_v63  ;;  %v1411_v24 = vmul.f32 0.044715, %v4840_v19  ;;  %v4883_v15 = vmul.f32 %v1448_v29, %v4800_v28  ;;  %v1450_v7 = vmul.f32 %v1410_v30, %v4828_v8 }
 0x233   : > { %v1254_v1 = vpop.f32.mrf.mxu0  ;;  %v1337_v34 = vpop.f32.mrf.mxu1  ;;  %5797 = vst [vmem:[#allocation28_spill] sm:$0xff] %v4878_v60  ;;  %v1413_v16 = vmul.f32 0.044715, %v4848_v61  ;;  %v4888_v46 = vadd.f32 %v1333_v11, %v4717_v50  ;;  %v1414_v57 = vmul.f32 0.044715, %v4854_v38  ;;  %v4894_v18 = vadd.f32 %v1252_v55, %v4709_v36 }
 0x234   : > { %5798 = vst [vmem:[#allocation29_spill] sm:$0xff] %v4883_v15  ;;  %v1416_v45 = vmul.f32 0.044715, %v4857_v35  ;;  %v1415_v60 = vmul.f32 0.044715, %v4860_v52  ;;  %v4897_v29 = vmul.f32 %v1447_v6, %v4805_v47  ;;  %v4900_v30 = vmul.f32 %v1449_v39, %v4818_v9 }
 0x235   : > { %v1258_v33 = vpop.f32.mrf.mxu0  ;;  %v1341_v21 = vpop.f32.mrf.mxu1  ;;  %v1417_v11 = vmul.f32 0.044715, %v4888_v46  ;;  %v4904_v15 = vadd.f32 %v1335_v43, %v4711_v37  ;;  %v1452_v5 = vmul.f32 %v1412_v12, %v4837_v63  ;;  %v1451_v55 = vmul.f32 %v1411_v24, %v4840_v19 }
 0x236   : > { %5799 = vst [vmem:[#allocation30_spill] sm:$0xff] %v4897_v29  ;;  %5800 = vst [vmem:[#allocation31_spill] sm:$0xff] %v4900_v30  ;;  %v4906_v53 = vpop.eup %4067  ;;  %v1418_v2 = vmul.f32 0.044715, %v4894_v18  ;;  %v4912_v6 = vadd.f32 %v1254_v1, %v4713_v44  ;;  %v1453_v30 = vmul.f32 %v1413_v16, %v4848_v61  ;;  %v4919_v9 = vadd.f32 %v1337_v34, %v4717_v50 }
 0x237   : > { %5801 = vst [vmem:[#allocation32_spill] sm:$0xff] %v4904_v15  ;;  %v1260_v28 = vpop.f32.mrf.mxu0  ;;  %v1343_v23 = vpop.f32.mrf.mxu1  ;;  %v1420_v43 = vmul.f32 0.044715, %v4904_v15  ;;  %v4922_v29 = vadd.f32 %v1258_v33, %v4709_v36  ;;  %v4925_v24 = vmul.f32 %v1450_v7, %v4828_v8  ;;  %v1454_v47 = vmul.f32 %v1414_v57, %v4854_v38 }
 0x238   : > { %v4914_v39 = vpop.eup %4069  ;;  %v1456_v1 = vmul.f32 %v1416_v45, %v4857_v35  ;;  %v1455_v31 = vmul.f32 %v1415_v60, %v4860_v52  ;;  %v1457_v16 = vmul.f32 %v1417_v11, %v4888_v46  ;;  %v1419_v3 = vmul.f32 0.044715, %v4912_v6 }
 0x239   : > { %v1262_v12 = vpop.f32.mrf.mxu0  ;;  %5802 = vst [vmem:[#allocation33_spill] sm:$0xff] %v4925_v24  ;;  %v1345_v49 = vpop.f32.mrf.mxu1  ;;  %v4933_v34 = vadd.f32 %v1341_v21, %v4711_v37  ;;  %v4936_v33 = vadd.f32 %v1260_v28, %v4713_v44  ;;  %v4939_v7 = vmul.f32 %v1452_v5, %v4837_v63  ;;  %v1458_v57 = vmul.f32 %v1418_v2, %v4894_v18 }
 0x23a   : > { %v1421_v45 = vmul.f32 0.044715, %v4919_v9  ;;  %v1422_v60 = vmul.f32 0.044715, %v4922_v29  ;;  %v4945_v24 = vmul.f32 %v1451_v55, %v4840_v19  ;;  %v4948_v11 = vmul.f32 %v1453_v30, %v4848_v61 }
 0x23b   : > { %5803 = vst [vmem:[#allocation34_spill] sm:$0xff] %v4933_v34  ;;  %5804 = vst [vmem:[#allocation35_spill] sm:$0xff] %v4939_v7  ;;  %v1460_v21 = vmul.f32 %v1420_v43, %v4904_v15  ;;  %v4952_v28 = vadd.f32 %v1343_v23, %v4717_v50  ;;  %v1264_v8 = vpop.f32.mrf.mxu0  ;;  %v4955_v5 = vmul.f32 %v1454_v47, %v4854_v38  ;;  %v1347_v30 = vpop.f32.mrf.mxu1  ;;  %v1424_v43 = vmul.f32 0.044715, %v4933_v34 }
 0x23c   : > { %v4958_v2 = vmul.f32 %v1456_v1, %v4857_v35  ;;  %v4961_v7 = vmul.f32 %v1455_v31, %v4860_v52  ;;  %v4964_v55 = vadd.f32 %v1262_v12, %v4709_v36  ;;  %v4967_v63 = vmul.f32 %v1457_v16, %v4888_v46 }
 0x23d   : > { %5805 = vst [vmem:[#allocation36_spill] sm:$0xff] %v4955_v5  ;;  %v1459_v23 = vmul.f32 %v1419_v3, %v4912_v6  ;;  %v1423_v47 = vmul.f32 0.044715, %v4936_v33  ;;  %v4973_v5 = vmul.f32 %v1458_v57, %v4894_v18  ;;  %v1461_v1 = vmul.f32 %v1421_v45, %v4919_v9 }
 0x23e   : > { %5806 = vst [vmem:[#allocation37_spill] sm:$0xff] %v4958_v2  ;;  %v1462_v31 = vmul.f32 %v1422_v60, %v4922_v29  ;;  %v4978_v36 = vadd.f32 %v1264_v8, %v4713_v44  ;;  %v4981_v12 = vmul.f32 %v1460_v21, %v4904_v15  ;;  %v1425_v16 = vmul.f32 0.044715, %v4952_v28 }
 0x23f   : > { %v4985_v3 = vadd.f32 %v1345_v49, %v4711_v37  ;;  %v4988_v2 = vadd.f32 %v1347_v30, %v4717_v50  ;;  %v1426_v57 = vmul.f32 0.044715, %v4964_v55  ;;  %v1511_v60 = vadd.f32 %v4762_v54, %v4720_v56 }
 0x240   : > { %5807 = vst [vmem:[#allocation38_spill] sm:$0xff] %v4981_v12  ;;  %v1427_v45 = vmul.f32 0.044715, %v4978_v36  ;;  %v1515_v44 = vadd.f32 %v4782_v10, %v4729_v14  ;;  %v4997_v8 = vmul.f32 %v1459_v23, %v4912_v6  ;;  %v1464_v21 = vmul.f32 %v1424_v43, %v4933_v34 }
 0x241   : > { %v1463_v37 = vmul.f32 %v1423_v47, %v4936_v33  ;;  %v1429_v50 = vmul.f32 0.044715, %v4988_v2  ;;  %v5003_v49 = vmul.f32 %v1461_v1, %v4919_v9  ;;  %v5006_v30 = vmul.f32 %v1462_v31, %v4922_v29 }
 0x242   : > { %v1551_v12 = vmul.f32 0.7978846, %v1511_v60  ;;  %v1555_v56 = vmul.f32 0.7978846, %v1515_v44  ;;  %v1465_v54 = vmul.f32 %v1425_v16, %v4952_v28  ;;  %v1428_v10 = vmul.f32 0.044715, %v4985_v3 }
 0x243   : > { %v1513_v23 = vadd.f32 %v4776_v4, %v4725_v40  ;;  %v1517_v43 = vadd.f32 %v4808_v42, %v4736_v22  ;;  %v1466_v47 = vmul.f32 %v1426_v57, %v4964_v55  ;;  %v1467_v1 = vmul.f32 %v1427_v45, %v4978_v36 }
 0x244   : > { %v1469_v15 = vmul.f32 %v1429_v50, %v4988_v2  ;;  %4071 = vtanh.f32 %v1551_v12  ;;  %v1630_v16 = vadd.f32 1.0, %v4862_v58  ;;  %v5019_v44 = vmul.f32 %v1464_v21, %v4933_v34  ;;  %v5824_v34 = vld [vmem:[#allocation28_spill] sm:$0xff] }
 0x245   : > { %4073 = vtanh.f32 %v1555_v56  ;;  %v1553_v31 = vmul.f32 0.7978846, %v1513_v23  ;;  %v1557_v60 = vmul.f32 0.7978846, %v1517_v43  ;;  %v5022_v40 = vmul.f32 %v1463_v37, %v4936_v33 }
 0x246   : > { %5808 = vst [vmem:[#allocation39_spill] sm:$0xff] %v5019_v44  ;;  %v1355_v4 = vmul.f32 0.5, %v4729_v14  ;;  %v1634_v42 = vadd.f32 1.0, %v4906_v53  ;;  %v5027_v57 = vmul.f32 %v1465_v54, %v4952_v28  ;;  %v5030_v12 = vmul.f32 %v1428_v10, %v4985_v3 }
 0x247   : > { %4075 = vtanh.f32 %v1553_v31  ;;  %v1519_v58 = vadd.f32 %v4824_v0, %v4748_v32  ;;  %v5035_v45 = vmul.f32 %v1466_v47, %v4964_v55  ;;  %v5038_v21 = vmul.f32 %v1467_v1, %v4978_v36  ;;  %v5810_v47 = vld [vmem:[#allocation17_spill] sm:$0xff] }
 0x248   : > { %v5041_v14 = vmul.f32 0.5, %v4736_v22  ;;  %4077 = vtanh.f32 %v1557_v60  ;;  %v5044_v53 = vmul.f32 %v1469_v15, %v4988_v2  ;;  %v5047_v37 = vmul.f32 %v1630_v16, %v4732_v20  ;;  %v5812_v31 = vld [vmem:[#allocation13_spill] sm:$0xff] }
 0x249   : > { %5809 = vst [vmem:[#allocation40_spill] sm:$0xff] %v5035_v45  ;;  %v1523_v50 = vadd.f32 %v4868_v41, %v4786_v13  ;;  %v1559_v0 = vmul.f32 0.7978846, %v1519_v58  ;;  %v5052_v56 = vmul.f32 %v1634_v42, %v4757_v48  ;;  %v1632_v54 = vadd.f32 1.0, %v4872_v25  ;;  %v5811_v25 = vld [vmem:[#allocation26_spill] sm:$0xff]  ;;  %v5815_v42 = vld [vmem:[#allocation27_spill] sm:$0xff] }
 0x24a   : > { %v1521_v22 = vadd.f32 %v4843_v26, %v4768_v59  ;;  %v1525_v10 = vadd.f32 %v4875_v62, %v4791_v17  ;;  %v1636_v15 = vadd.f32 1.0, %v4914_v39  ;;  %v1518_v20 = vadd.f32 %v4813_v51, %v4742_v27  ;;  %v5813_v39 = vld [vmem:[#allocation23_spill] sm:$0xff] }
 0x24b   : > { %v1563_v23 = vmul.f32 0.7978846, %v1523_v50  ;;  %4079 = vtanh.f32 %v1559_v0  ;;  %v5063_v41 = vmul.f32 0.5, %v4748_v32  ;;  %v1522_v1 = vadd.f32 %v5811_v25, %v5810_v47  ;;  %v5814_v32 = vld [vmem:[#allocation18_spill] sm:$0xff]  ;;  %v5816_v50 = vld [vmem:[#allocation12_spill] sm:$0xff] }
 0x24c   : > { %v1561_v48 = vmul.f32 0.7978846, %v1521_v22  ;;  %v1565_v43 = vmul.f32 0.7978846, %v1525_v10  ;;  %v5068_v26 = vmul.f32 0.5, %v4786_v13  ;;  %v1520_v60 = vadd.f32 %v5813_v39, %v5812_v31  ;;  %v5817_v13 = vld [vmem:[#allocation21_spill] sm:$0xff] }
 0x24d   : > { %4081 = vtanh.f32 %v1563_v23  ;;  %v1558_v62 = vmul.f32 0.7978846, %v1518_v20  ;;  %v1710_v16 = vpack.c.bf16 %v5052_v56, %v5047_v37  ;;  %v1562_v51 = vmul.f32 0.7978846, %v1522_v1  ;;  %v5818_v10 = vld [vmem:[#allocation30_spill] sm:$0xff]  ;;  %v5819_v20 = vld [vmem:[#allocation16_spill] sm:$0xff] }
 0x24e   : > { %4083 = vtanh.f32 %v1561_v48  ;;  %v1524_v58 = vadd.f32 %v5815_v42, %v5814_v32  ;;  %v5077_v0 = vmul.f32 %v1632_v54, %v5816_v50  ;;  %v1560_v22 = vmul.f32 0.7978846, %v1520_v60  ;;  %v5820_v1 = vld [vmem:[#allocation22_spill] sm:$0xff] }
 0x24f   : > { %4085 = vtanh.f32 %v1565_v43  ;;  %v1527_v23 = vadd.f32 %v5818_v10, %v5817_v13  ;;  %v5082_v25 = vmul.f32 %v1636_v15, %v5819_v20  ;;  %v1531_v37 = vadd.f32 %v4945_v24, %v4840_v19  ;;  %v5821_v43 = vld [vmem:[#allocation31_spill] sm:$0xff] }
 0x250   : > { %4087 = vtanh.f32 %v1558_v62  ;;  %v1564_v39 = vmul.f32 0.7978846, %v1524_v58  ;;  %v5087_v48 = vmul.f32 0.5, %v4768_v59  ;;  %v1529_v60 = vadd.f32 %v5821_v43, %v5820_v1  ;;  %v5822_v59 = vld [vmem:[#allocation14_spill] sm:$0xff] }
 0x251   : > { %v4072_v56 = vpop.eup %4071  ;;  %4089 = vtanh.f32 %v1562_v51  ;;  %v1567_v54 = vmul.f32 0.7978846, %v1527_v23  ;;  %v1571_v10 = vmul.f32 0.7978846, %v1531_v37  ;;  %v1533_v15 = vadd.f32 %v4948_v11, %v4848_v61  ;;  %v5823_v37 = vld [vmem:[#allocation19_spill] sm:$0xff] }
 0x252   : > { %v4074_v42 = vpop.eup %4073  ;;  %v1631_v50 = vadd.f32 1.0, %v4072_v56  ;;  %4091 = vtanh.f32 %v1560_v22  ;;  %v1365_v58 = vmul.f32 0.5, %v4791_v17  ;;  %v1569_v24 = vmul.f32 0.7978846, %v1529_v60  ;;  %v5826_v60 = vld [vmem:[#allocation33_spill] sm:$0xff] }
 0x253   : > { %v1635_v62 = vadd.f32 1.0, %v4074_v42  ;;  %4093 = vtanh.f32 %v1564_v39  ;;  %v1712_v51 = vpack.c.bf16 %v5082_v25, %v5077_v0  ;;  %v1573_v23 = vmul.f32 0.7978846, %v1533_v15  ;;  %v5825_v39 = vld [vmem:[#allocation24_spill] sm:$0xff] }
 0x254   : > { %v4076_v20 = vpop.eup %4075  ;;  %v1671_v44 = vmul.f32 %v1631_v50, %v5822_v59  ;;  %4095 = vtanh.f32 %v1567_v54  ;;  %v1526_v11 = vadd.f32 %v5824_v34, %v5823_v37  ;;  %v1358_v17 = vmul.f32 0.5, %v4742_v27  ;;  %v5827_v54 = vld [vmem:[#allocation15_spill] sm:$0xff]  ;;  %v5829_v34 = vld [vmem:[#allocation29_spill] sm:$0xff] }
 0x255   : > { %v4078_v43 = vpop.eup %4077  ;;  %v1675_v56 = vmul.f32 %v1635_v62, %v1355_v4  ;;  %v1633_v22 = vadd.f32 1.0, %v4076_v20  ;;  %4097 = vtanh.f32 %v1571_v10  ;;  %v1530_v45 = vadd.f32 %v5826_v60, %v5825_v39  ;;  %v5828_v62 = vld [vmem:[#allocation20_spill] sm:$0xff] }
 0x256   : > { %v1637_v42 = vadd.f32 1.0, %v4078_v43  ;;  %4099 = vtanh.f32 %v1569_v24  ;;  %v1362_v59 = vmul.f32 0.5, %v5810_v47  ;;  %v1566_v0 = vmul.f32 0.7978846, %v1526_v11  ;;  %v5830_v43 = vld [vmem:[#allocation25_spill] sm:$0xff] }
 0x257   : > { %v1711_v50 = vpack.c.bf16 %v1675_v56, %v1671_v44  ;;  %4101 = vtanh.f32 %v1573_v23  ;;  %v1673_v4 = vmul.f32 %v1633_v22, %v5827_v54  ;;  %v1570_v15 = vmul.f32 0.7978846, %v1530_v45  ;;  %v5831_v44 = vld [vmem:[#allocation35_spill] sm:$0xff] }
 0x258   : > { %v4080_v25 = vpop.eup %4079  ;;  %v1677_v10 = vmul.f32 %v1637_v42, %v5041_v14  ;;  %v1528_v20 = vadd.f32 %v5829_v34, %v5828_v62  ;;  %v1360_v24 = vmul.f32 0.5, %v5812_v31  ;;  %4103 = vtanh.f32 %v1566_v0 }
 0x259   : > { %2018 = vmatprep.mubr.bf16.mxu0 %v1711_v50  ;;  %v1639_v27 = vadd.f32 1.0, %v4080_v25  ;;  %v1532_v56 = vadd.f32 %v5831_v44, %v5830_v43  ;;  %v1364_v11 = vmul.f32 0.5, %v5814_v32  ;;  %4105 = vtanh.f32 %v1570_v15 }
 0x25a   : > { %v4082_v47 = vpop.eup %4081  ;;  %v1713_v23 = vpack.c.bf16 %v1677_v10, %v1673_v4  ;;  %2019 = vmatmul.mubr.bf16.vlgmr.msra.gmra.mxu0 %v1710_v16  ;;  %v1568_v22 = vmul.f32 0.7978846, %v1528_v20  ;;  %v1367_v42 = vmul.f32 0.5, %v5817_v13  ;;  %v1535_v50 = vadd.f32 %v4961_v7, %v4860_v52 }
 0x25b   : > { %v4084_v14 = vpop.eup %4083  ;;  %v1643_v45 = vadd.f32 1.0, %v4082_v47  ;;  %v1572_v60 = vmul.f32 0.7978846, %v1532_v56  ;;  %v1679_v0 = vmul.f32 %v1639_v27, %v5063_v41  ;;  %v1539_v16 = vadd.f32 %v4997_v8, %v4912_v6 }
 0x25c   : > { %v4086_v31 = vpop.eup %4085  ;;  %2091 = vmatprep.mubr.bf16.mxu1 %v1713_v23  ;;  %v1641_v25 = vadd.f32 1.0, %v4084_v14  ;;  %4107 = vtanh.f32 %v1568_v22  ;;  %v1575_v13 = vmul.f32 0.7978846, %v1535_v50  ;;  %v1371_v34 = vmul.f32 0.5, %v4840_v19 }
 0x25d   : > { %v4088_v32 = vpop.eup %4087  ;;  %2092 = vmatmul.mubr.bf16.vlgmr.msra.gmra.mxu1 %v1712_v51  ;;  %v1683_v54 = vmul.f32 %v1643_v45, %v5068_v26  ;;  %v1645_v4 = vadd.f32 1.0, %v4086_v31  ;;  %4109 = vtanh.f32 %v1572_v60  ;;  %v1579_v20 = vmul.f32 0.7978846, %v1539_v16 }
 0x25e   : > { %v4090_v10 = vpop.eup %4089  ;;  %v1681_v15 = vmul.f32 %v1641_v25, %v5087_v48  ;;  %v1638_v7 = vadd.f32 1.0, %v4088_v32  ;;  %4111 = vtanh.f32 %v1575_v13  ;;  %v1537_v26 = vadd.f32 %v4967_v63, %v4888_v46 }
 0x25f   : > { %v4092_v41 = vpop.eup %4091  ;;  %v1715_v27 = vpack.c.bf16 %v1683_v54, %v1679_v0  ;;  %v1685_v44 = vmul.f32 %v1645_v4, %v1365_v58  ;;  %v1642_v56 = vadd.f32 1.0, %v4090_v10  ;;  %4113 = vtanh.f32 %v1579_v20 }
 0x260   : > { %v4094_v8 = vpop.eup %4093  ;;  %v1678_v47 = vmul.f32 %v1638_v7, %v1358_v17  ;;  %v1640_v51 = vadd.f32 1.0, %v4092_v41  ;;  %v1541_v19 = vadd.f32 %v5003_v49, %v4919_v9  ;;  %v1369_v50 = vmul.f32 0.5, %v5820_v1 }
 0x261   : > { %v4096_v23 = vpop.eup %4095  ;;  %2026 = vmatprep.mubr.bf16.mxu0 %v1715_v27  ;;  %v1717_v22 = vpack.c.bf16 %v1685_v44, %v1681_v15  ;;  %v1682_v48 = vmul.f32 %v1642_v56, %v1362_v59  ;;  %v1644_v14 = vadd.f32 1.0, %v4094_v8  ;;  %v1577_v31 = vmul.f32 0.7978846, %v1537_v26 }
 0x262   : > { %v4098_v45 = vpop.eup %4097  ;;  %v1680_v60 = vmul.f32 %v1640_v51, %v1360_v24  ;;  %v1647_v58 = vadd.f32 1.0, %v4096_v23  ;;  %v1581_v63 = vmul.f32 0.7978846, %v1541_v19  ;;  %v1373_v59 = vmul.f32 0.5, %v4848_v61 }
 0x263   : > { %v4100_v17 = vpop.eup %4099  ;;  %2099 = vmatprep.mubr.bf16.mxu1 %v1717_v22  ;;  %v1714_v0 = vpack.c.bf16 %v1682_v48, %v1678_v47  ;;  %v1684_v25 = vmul.f32 %v1644_v14, %v1364_v11  ;;  %v1651_v16 = vadd.f32 1.0, %v4098_v45  ;;  %4115 = vtanh.f32 %v1577_v31  ;;  %v5832_v11 = vld [vmem:[#allocation36_spill] sm:$0xff]  ;;  %v5833_v47 = vld [vmem:[#allocation37_spill] sm:$0xff] }
 0x264   : > { %v4102_v32 = vpop.eup %4101  ;;  %v1687_v54 = vmul.f32 %v1647_v58, %v1367_v42  ;;  %v1649_v4 = vadd.f32 1.0, %v4100_v17  ;;  %4117 = vtanh.f32 %v1581_v63  ;;  %v1366_v1 = vmul.f32 0.5, %v5823_v37  ;;  %v5834_v22 = vld [vmem:[#allocation32_spill] sm:$0xff] }
 0x265   : > { %2027 = vmatmul.mubr.bf16.gmra.mxu0 %v1714_v0  ;;  %v1716_v49 = vpack.c.bf16 %v1684_v25, %v1680_v60  ;;  %v1691_v13 = vmul.f32 %v1651_v16, %v1371_v34  ;;  %v1653_v24 = vadd.f32 1.0, %v4102_v32  ;;  %v4104_v10 = vpop.eup %4103  ;;  %v1370_v15 = vmul.f32 0.5, %v5825_v39 }
 0x266   : > { %v1534_v7 = vadd.f32 %v5832_v11, %v4854_v38  ;;  %v1538_v42 = vadd.f32 %v4973_v5, %v4894_v18  ;;  %v4106_v20 = vpop.eup %4105  ;;  %v1689_v41 = vmul.f32 %v1649_v4, %v1369_v50  ;;  %v1646_v44 = vadd.f32 1.0, %v4104_v10  ;;  %v5835_v5 = vld [vmem:[#allocation38_spill] sm:$0xff] }
 0x267   : > { %2100 = vmatmul.mubr.bf16.gmra.mxu1 %v1716_v49  ;;  %v1719_v61 = vpack.c.bf16 %v1691_v13, %v1687_v54  ;;  %v1693_v27 = vmul.f32 %v1653_v24, %v1373_v59  ;;  %v1650_v34 = vadd.f32 1.0, %v4106_v20  ;;  %v1536_v37 = vadd.f32 %v5833_v47, %v4857_v35 }
 0x268   : > { %v1574_v56 = vmul.f32 0.7978846, %v1534_v7  ;;  %v1578_v8 = vmul.f32 0.7978846, %v1538_v42  ;;  %v1686_v26 = vmul.f32 %v1646_v44, %v1366_v1  ;;  %v1368_v23 = vmul.f32 0.5, %v5828_v62 }
 0x269   : > { %v4108_v51 = vpop.eup %4107  ;;  %2034 = vmatprep.mubr.bf16.mxu0 %v1719_v61  ;;  %v1721_v39 = vpack.c.bf16 %v1693_v27, %v1689_v41  ;;  %v1540_v48 = vadd.f32 %v5835_v5, %v5834_v22  ;;  %v1690_v19 = vmul.f32 %v1650_v34, %v1370_v15  ;;  %v1576_v60 = vmul.f32 0.7978846, %v1536_v37 }
 0x26a   : > { %v4110_v14 = vpop.eup %4109  ;;  %v1648_v45 = vadd.f32 1.0, %v4108_v51  ;;  %4119 = vtanh.f32 %v1574_v56  ;;  %v1372_v58 = vmul.f32 0.5, %v5830_v43  ;;  %v1543_v62 = vadd.f32 %v5022_v40, %v4936_v33 }
 0x26b   : > { %2107 = vmatprep.mubr.bf16.mxu1 %v1721_v39  ;;  %v1652_v50 = vadd.f32 1.0, %v4110_v14  ;;  %4121 = vtanh.f32 %v1578_v8  ;;  %v1580_v31 = vmul.f32 0.7978846, %v1540_v48  ;;  %v4112_v17 = vpop.eup %4111  ;;  %v1718_v0 = vpack.c.bf16 %v1690_v19, %v1686_v26  ;;  %v5837_v8 = vld [vmem:[#allocation34_spill] sm:$0xff] }
 0x26c   : > { %v1688_v25 = vmul.f32 %v1648_v45, %v1368_v23  ;;  %4123 = vtanh.f32 %v1576_v60  ;;  %v4114_v16 = vpop.eup %4113  ;;  %v1655_v32 = vadd.f32 1.0, %v4112_v17  ;;  %v1547_v54 = vadd.f32 %v5038_v21, %v4978_v36 }
 0x26d   : > { %v1692_v63 = vmul.f32 %v1652_v50, %v1372_v58  ;;  %4125 = vtanh.f32 %v1580_v31  ;;  %2035 = vmatmul.mubr.bf16.gmra.mxu0 %v1718_v0  ;;  %v1375_v43 = vmul.f32 0.5, %v4860_v52  ;;  %v1379_v59 = vmul.f32 0.5, %v4912_v6 }
 0x26e   : > { %v1659_v4 = vadd.f32 1.0, %v4114_v16  ;;  %v1583_v49 = vmul.f32 0.7978846, %v1543_v62  ;;  %v1508_v13 = vmul.f32 %v5030_v12, %v4985_v3  ;;  %v1587_v10 = vmul.f32 0.7978846, %v1547_v54 }
 0x26f   : > { %v1720_v24 = vpack.c.bf16 %v1692_v63, %v1688_v25  ;;  %v1545_v40 = vadd.f32 %v5027_v57, %v4952_v28  ;;  %v1695_v1 = vmul.f32 %v1655_v32, %v1375_v43  ;;  %v1549_v21 = vadd.f32 %v5044_v53, %v4988_v2  ;;  %v5836_v57 = vld [vmem:[#allocation40_spill] sm:$0xff] }
 0x270   : > { %v1699_v15 = vmul.f32 %v1659_v4, %v1379_v59  ;;  %4127 = vtanh.f32 %v1583_v49  ;;  %v4116_v11 = vpop.eup %4115  ;;  %v1377_v52 = vmul.f32 0.5, %v4888_v46  ;;  %v1542_v12 = vadd.f32 %v5006_v30, %v4922_v29  ;;  %v5838_v30 = vld [vmem:[#allocation39_spill] sm:$0xff] }
 0x271   : > { %2108 = vmatmul.mubr.bf16.gmra.mxu1 %v1720_v24  ;;  %4129 = vtanh.f32 %v1587_v10  ;;  %v1585_v6 = vmul.f32 0.7978846, %v1545_v40  ;;  %v4118_v7 = vpop.eup %4117  ;;  %v1657_v20 = vadd.f32 1.0, %v4116_v11  ;;  %v1589_v61 = vmul.f32 0.7978846, %v1549_v21 }
 0x272   : > { %v1723_v42 = vpack.c.bf16 %v1699_v15, %v1695_v1  ;;  %v1546_v41 = vadd.f32 %v5836_v57, %v4964_v55  ;;  %v1381_v27 = vmul.f32 0.5, %v4919_v9  ;;  %v1661_v44 = vadd.f32 1.0, %v4118_v7 }
 0x273   : > { %4131 = vtanh.f32 %v1585_v6  ;;  %v1582_v53 = vmul.f32 0.7978846, %v1542_v12  ;;  %v1697_v34 = vmul.f32 %v1657_v20, %v1377_v52  ;;  %v1544_v47 = vadd.f32 %v5838_v30, %v5837_v8 }
 0x274   : > { %2042 = vmatprep.mubr.bf16.mxu0 %v1723_v42  ;;  %4133 = vtanh.f32 %v1589_v61  ;;  %v1586_v46 = vmul.f32 0.7978846, %v1546_v41  ;;  %v1701_v56 = vmul.f32 %v1661_v44, %v1381_v27  ;;  %v1548_v37 = vadd.f32 %v1508_v13, %v4985_v3 }
 0x275   : > { %4135 = vtanh.f32 %v1582_v53  ;;  %v1584_v26 = vmul.f32 0.7978846, %v1544_v47  ;;  %v1374_v14 = vmul.f32 0.5, %v4854_v38  ;;  %v1378_v19 = vmul.f32 0.5, %v4894_v18 }
 0x276   : > { %4137 = vtanh.f32 %v1586_v46  ;;  %v1725_v39 = vpack.c.bf16 %v1701_v56, %v1697_v34  ;;  %v1588_v23 = vmul.f32 0.7978846, %v1548_v37  ;;  %v1376_v58 = vmul.f32 0.5, %v4857_v35 }
 0x277   : > { %v4120_v51 = vpop.eup %4119  ;;  %4139 = vtanh.f32 %v1584_v26  ;;  %v1380_v0 = vmul.f32 0.5, %v5834_v22  ;;  %v1383_v43 = vmul.f32 0.5, %v4936_v33  ;;  %v1387_v59 = vmul.f32 0.5, %v4978_v36 }
 0x278   : > { %v4122_v9 = vpop.eup %4121  ;;  %v1654_v5 = vadd.f32 1.0, %v4120_v51  ;;  %2115 = vmatprep.mubr.bf16.mxu1 %v1725_v39  ;;  %4141 = vtanh.f32 %v1588_v23  ;;  %v1385_v40 = vmul.f32 0.5, %v4952_v28  ;;  %v1389_v1 = vmul.f32 0.5, %v4988_v2 }
 0x279   : > { %v4124_v48 = vpop.eup %4123  ;;  %v1658_v45 = vadd.f32 1.0, %v4122_v9  ;;  %v1382_v52 = vmul.f32 0.5, %v4922_v29  ;;  %v1386_v12 = vmul.f32 0.5, %v4964_v55  ;;  %v1384_v27 = vmul.f32 0.5, %v5837_v8 }
 0x27a   : > { %v4126_v60 = vpop.eup %4125  ;;  %v1656_v50 = vadd.f32 1.0, %v4124_v48  ;;  %v1694_v31 = vmul.f32 %v1654_v5, %v1374_v14  ;;  %v1388_v44 = vmul.f32 0.5, %v4985_v3  ;;  %v5174_v3 = vld [vmem:[%s5712_s8] ss:$0 sm:$0xff] }
 0x27b   : > { %v1698_v17 = vmul.f32 %v1658_v45, %v1378_v19  ;;  %v1660_v25 = vadd.f32 1.0, %v4126_v60  ;;  %v5839_v14 = vld [vmem:[#allocation2_spill] sm:$0xff] }
 0x27c   : > { %v1696_v63 = vmul.f32 %v1656_v50, %v1376_v58 }
 0x27d   : > { %v4128_v62 = vpop.eup %4127  ;;  %v1722_v16 = vpack.c.bf16 %v1698_v17, %v1694_v31  ;;  %v1700_v32 = vmul.f32 %v1660_v25, %v1380_v0  ;;  %v5840_v0 = vld [vmem:[#allocation3_spill] sm:$0xff] }
 0x27e   : > { %v4130_v54 = vpop.eup %4129  ;;  %v1663_v38 = vadd.f32 1.0, %v4128_v62 }
 0x27f   : > { %2043 = vmatmul.mubr.bf16.gmra.mxu0 %v1722_v16  ;;  %v1724_v18 = vpack.c.bf16 %v1700_v32, %v1696_v63  ;;  %v1667_v35 = vadd.f32 1.0, %v4130_v54 }
 0x280   : > { %v4132_v4 = vpop.eup %4131  ;;  %v1703_v13 = vmul.f32 %v1663_v38, %v1383_v43 }
 0x281   : > { %v4134_v49 = vpop.eup %4133  ;;  %2116 = vmatmul.mubr.bf16.gmra.mxu1 %v1724_v18  ;;  %v1707_v24 = vmul.f32 %v1667_v35, %v1387_v59  ;;  %v1665_v22 = vadd.f32 1.0, %v4132_v4 }
 0x282   : > { %v4136_v10 = vpop.eup %4135  ;;  %v1669_v15 = vadd.f32 1.0, %v4134_v49  ;;  %v5841_v49 = vld [vmem:[#allocation5_spill] sm:$0xff] }
 0x283   : > { %v4138_v21 = vpop.eup %4137  ;;  %v1727_v11 = vpack.c.bf16 %v1707_v24, %v1703_v13  ;;  %v1662_v33 = vadd.f32 1.0, %v4136_v10  ;;  %v1705_v6 = vmul.f32 %v1665_v22, %v1385_v40 }
 0x284   : > { %v1709_v36 = vmul.f32 %v1669_v15, %v1389_v1  ;;  %v1666_v7 = vadd.f32 1.0, %v4138_v21  ;;  %v4140_v42 = vpop.eup %4139  ;;  %v5842_v21 = vld [vmem:[#allocation4_spill] sm:$0xff] }
 0x285   : > { %2050 = vmatprep.mubr.bf16.mxu0 %v1727_v11  ;;  %v1702_v61 = vmul.f32 %v1662_v33, %v1382_v52  ;;  %v4142_v41 = vpop.eup %4141  ;;  %v1664_v28 = vadd.f32 1.0, %v4140_v42 }
 0x286   : > { %v1729_v20 = vpack.c.bf16 %v1709_v36, %v1705_v6  ;;  %v1706_v57 = vmul.f32 %v1666_v7, %v1386_v12  ;;  %v1668_v29 = vadd.f32 1.0, %v4142_v41 }
 0x287   : > { %v1704_v53 = vmul.f32 %v1664_v28, %v1384_v27  ;;  %v5844_v27 = vld [vmem:[#allocation6_spill] sm:$0xff] }
 0x288   : > { %2123 = vmatprep.mubr.bf16.mxu1 %v1729_v20  ;;  %v1726_v2 = vpack.c.bf16 %v1706_v57, %v1702_v61  ;;  %v1708_v34 = vmul.f32 %v1668_v29, %v1388_v44  ;;  %v5843_v57 = vld [vmem:[#allocation7_spill] sm:$0xff] }
 0x28a   : > { %2051 = vmatmul.mubr.bf16.gmra.mxu0 %v1726_v2  ;;  %v1728_v46 = vpack.c.bf16 %v1708_v34, %v1704_v53 }
 0x28c   : > { %2124 = vmatmul.mubr.bf16.gmra.mxu1 %v1728_v46 }
 0x31a   : > { %v3646_v55 = vpop.f32.mrf.mxu0 }
 0x31c   : > { %v3647_v56 = vpop.f32.mrf.mxu0 }
 0x31d   : > { %v3692_v30 = vpop.f32.mrf.mxu1  ;;  %v3648_v47 = vadd.f32 %v3647_v56, %v3646_v55 }
 0x31e   : > { %v3649_v37 = vpop.f32.mrf.mxu0 }
 0x31f   : > { %v3693_v51 = vpop.f32.mrf.mxu1 }
 0x320   : > { %v3694_v39 = vadd.f32 %v3693_v51, %v3692_v30  ;;  %v3650_v26 = vpop.f32.mrf.mxu0 }
 0x321   : > { %v3695_v23 = vpop.f32.mrf.mxu1  ;;  %v3651_v5 = vadd.f32 %v3650_v26, %v3649_v37 }
 0x322   : > { %v2094_v9 = vadd.f32 %v3694_v39, %v3648_v47 }
 0x323   : > { %v3696_v8 = vpop.f32.mrf.mxu1 }
 0x324   : > { %v3697_v48 = vadd.f32 %v3696_v8, %v3695_v23  ;;  %v2132_v19 = vadd.f32 %v2094_v9, %v5839_v14 }
 0x325   : > { %v3652_v45 = vpop.f32.mrf.mxu0 }
 0x326   : > { %v2097_v60 = vadd.f32 %v3697_v48, %v3651_v5  ;;  %v5178_v58 = vadd.f32 %v5174_v3, %v2132_v19  ;;  %v5845_v5 = vld [vmem:[#allocation9_spill] sm:$0xff] }
 0x327   : > { %v3698_v50 = vpop.f32.mrf.mxu1  ;;  %v3653_v31 = vpop.f32.mrf.mxu0 }
 0x328   : > { %v3654_v17 = vadd.f32 %v3653_v31, %v3652_v45  ;;  %2171 = vadd.xlane.f32.xlu0 %v5178_v58  ;;  %v2133_v25 = vadd.f32 %v2097_v60, %v5840_v0  ;;  %v5846_v60 = vld [vmem:[#allocation8_spill] sm:$0xff] }
 0x329   : > { %v3699_v62 = vpop.f32.mrf.mxu1  ;;  %v3655_v16 = vpop.f32.mrf.mxu0 }
 0x32a   : > { %v3700_v63 = vadd.f32 %v3699_v62, %v3698_v50  ;;  %v5183_v32 = vadd.f32 %v5174_v3, %v2133_v25 }
 0x32b   : > { %v3701_v54 = vpop.f32.mrf.mxu1  ;;  %v3656_v38 = vpop.f32.mrf.mxu0 }
 0x32c   : > { %v2102_v18 = vadd.f32 %v3700_v63, %v3654_v17  ;;  %v3657_v43 = vadd.f32 %v3656_v38, %v3655_v16  ;;  %2173 = vadd.xlane.f32.xlu1 %v5183_v32  ;;  %v5847_v63 = vld [vmem:[#allocation11_spill] sm:$0xff] }
 0x32d   : > { %v3702_v59 = vpop.f32.mrf.mxu1  ;;  %v3658_v4 = vpop.f32.mrf.mxu0 }
 0x32e   : > { %v3703_v35 = vadd.f32 %v3702_v59, %v3701_v54  ;;  %v2134_v13 = vadd.f32 %v2102_v18, %v5841_v49  ;;  %v2160_v18 = vld [vmem:[%s5225_s24 + $0x8] sm:$0xff]  ;;  %v2162_v59 = vld [vmem:[%s5225_s24 + $0x18] sm:$0xff] }
 0x32f   : > { %v3659_v22 = vpop.f32.mrf.mxu0 }
 0x330   : > { %v2105_v24 = vadd.f32 %v3703_v35, %v3657_v43  ;;  %v5188_v10 = vadd.f32 %v5174_v3, %v2134_v13  ;;  %v3660_v1 = vadd.f32 %v3659_v22, %v3658_v4  ;;  %v2161_v43 = vld [vmem:[%s5225_s24 + $0x10] sm:$0xff]  ;;  %v2159_v35 = vld [vmem:[%s5225_s24] sm:$0xff] }
 0x331   : > { %v3704_v40 = vpop.f32.mrf.mxu1  ;;  %v3661_v15 = vpop.f32.mrf.mxu0 }
 0x332   : > { %2175 = vadd.xlane.f32.xlu0 %v5188_v10  ;;  %v2135_v11 = vadd.f32 %v2105_v24, %v5842_v21 }
 0x333   : > { %v3705_v52 = vpop.f32.mrf.mxu1  ;;  %v3662_v6 = vpop.f32.mrf.mxu0 }
 0x334   : > { %v3706_v33 = vadd.f32 %v3705_v52, %v3704_v40  ;;  %v5193_v36 = vadd.f32 %v5174_v3, %v2135_v11  ;;  %v3663_v42 = vadd.f32 %v3662_v6, %v3661_v15  ;;  %v5849_v15 = vld [vmem:[#allocation10_spill] sm:$0xff] }
 0x335   : > { %v3707_v12 = vpop.f32.mrf.mxu1  ;;  %v2163_v52 = vld [vmem:[%s5225_s24 + $0x20] sm:$0xff] }
 0x336   : > { %v2110_v7 = vadd.f32 %v3706_v33, %v3660_v1  ;;  %2177 = vadd.xlane.f32.xlu1 %v5193_v36 }
 0x337   : > { %v3708_v20 = vpop.f32.mrf.mxu1 }
 0x338   : > { %v3709_v61 = vadd.f32 %v3708_v20, %v3707_v12  ;;  %v2136_v41 = vadd.f32 %v2110_v7, %v5843_v57 }
 0x33a   : > { %v2113_v28 = vadd.f32 %v3709_v61, %v3663_v42  ;;  %v5198_v2 = vadd.f32 %v5174_v3, %v2136_v41 }
 0x33c   : > { %2179 = vadd.xlane.f32.xlu0 %v5198_v2  ;;  %v2137_v44 = vadd.f32 %v2113_v28, %v5844_v27 }
 0x33e   : > { %v5203_v29 = vadd.f32 %v5174_v3, %v2137_v44 }
 0x33f   : > { %v3664_v53 = vpop.f32.mrf.mxu0 }
 0x340   : > { %2181 = vadd.xlane.f32.xlu1 %v5203_v29 }
 0x341   : > { %v3710_v34 = vpop.f32.mrf.mxu1  ;;  %v3665_v46 = vpop.f32.mrf.mxu0 }
 0x342   : > { %v3666_v55 = vadd.f32 %v3665_v46, %v3664_v53 }
 0x343   : > { %v3711_v56 = vpop.f32.mrf.mxu1  ;;  %v3667_v30 = vpop.f32.mrf.mxu0 }
 0x344   : > { %v3712_v47 = vadd.f32 %v3711_v56, %v3710_v34 }
 0x345   : > { %v3713_v37 = vpop.f32.mrf.mxu1  ;;  %v3668_v51 = vpop.f32.mrf.mxu0 }
 0x346   : > { %v2118_v39 = vadd.f32 %v3712_v47, %v3666_v55  ;;  %v3669_v26 = vadd.f32 %v3668_v51, %v3667_v30 }
 0x347   : > { %v3714_v23 = vpop.f32.mrf.mxu1 }
 0x348   : > { %v3715_v9 = vadd.f32 %v3714_v23, %v3713_v37  ;;  %v2138_v8 = vadd.f32 %v2118_v39, %v5845_v5  ;;  %v4012_v39 = vld [vmem:[%s5713_s9 + $0x38] sm:$0xff]  }
 0x34a   : > { %v2121_v48 = vadd.f32 %v3715_v9, %v3669_v26  ;;  %v3670_v14 = vpop.f32.mrf.mxu0  ;;  %v5208_v19 = vadd.f32 %v5174_v3, %v2138_v8  ;;  %v4242_v26 = vmov 0.0  }
 0x34b   : > { %3774 = vmatprep.subr.bf16.mxu0 %v4242_v26  ;;  %3810 = vmatprep.subr.bf16.mxu1 %v4242_v26 }
 0x34c   : > { %v3671_v45 = vpop.f32.mrf.mxu0  ;;  %2183 = vadd.xlane.f32.xlu0 %v5208_v19  ;;  %v2139_v50 = vadd.f32 %v2121_v48, %v5846_v60  ;;  %v3716_v31 = vpop.f32.mrf.mxu1  ;;  %3811 = vmatpush3.bf16.msra.mxu1 %v4012_v39  ;;  %v4015_v60 = vld [vmem:[%s5714_s10 + $0x28] sm:$0xff]  }
 0x34d   : > { %v3672_v0 = vadd.f32 %v3671_v45, %v3670_v14  ;;  %3812 = vmatprep.subr.bf16.mxu1 %v4242_v26  ;;  %v4013_v14 = vld [vmem:[%s5714_s10 + $0x30] sm:$0xff]   ;;  %3790 = vmatprep.mubr.msk.bf16.mxu0 %vm4243_vm0, %v4242_v26 }
 0x34e   : > { %v5213_v17 = vadd.f32 %v5174_v3, %v2139_v50  ;;  %v3717_v25 = vpop.f32.mrf.mxu1  ;;  %v3673_v4 = vpop.f32.mrf.mxu0  ;;  %v4016_v50 = vld [vmem:[%s5713_s9 + $0x28] sm:$0xff]   ;;  %3826 = vmatprep.mubr.msk.bf16.mxu1 %vm4243_vm0, %v4242_v26 }
 0x34f   : > { %v3718_v62 = vadd.f32 %v3717_v25, %v3716_v31  ;;  %v4018_v25 = vld [vmem:[%s5713_s9 + $0x20] sm:$0xff]  }
 0x350   : > { %2185 = vadd.xlane.f32.xlu1 %v5213_v17  ;;  %v3719_v49 = vpop.f32.mrf.mxu1  ;;  %v3674_v13 = vpop.f32.mrf.mxu0 }
 0x351   : > { %v2126_v16 = vadd.f32 %v3718_v62, %v3672_v0  ;;  %v3675_v22 = vadd.f32 %v3674_v13, %v3673_v4  ;;  %v4017_v0 = vld [vmem:[%s5714_s10 + $0x20] sm:$0xff]   ;;  %v2405_v13 = vld [vmem:[%s5355_s4 + $0x8] sm:$0xff] }
 0x352   : > { %v3720_v24 = vpop.f32.mrf.mxu1  ;;  %v4026_v4 = vld [vmem:[%s5713_s9] sm:$0xff]  }
 0x353   : > { %v2140_v54 = vadd.f32 %v2126_v16, %v5847_v63  ;;  %v3721_v40 = vadd.f32 %v3720_v24, %v3719_v49  ;;  %v4019_v16 = vld [vmem:[%s5714_s10 + $0x18] sm:$0xff]   ;;  %v2404_v49 = vld [vmem:[%s5355_s4] sm:$0xff] }
 0x354   : > { %v4020_v63 = vld [vmem:[%s5713_s9 + $0x18] sm:$0xff]   ;;  %v2414_v24 = vpack.c.bf16 %v2405_v13, %v2404_v49 }
 0x355   : > { %v5218_v38 = vadd.f32 %v5174_v3, %v2140_v54  ;;  %v2129_v1 = vadd.f32 %v3721_v40, %v3675_v22  ;;  %v4021_v54 = vld [vmem:[%s5714_s10 + $0x10] sm:$0xff]   ;;  %v2166_v22 = vld [vmem:[%s5225_s24 + $0x38] sm:$0xff]  ;;  %v2167_v40 = vld [vmem:[%s5225_s24 + $0x40] sm:$0xff] }
 0x357   : > { %2187 = vadd.xlane.f32.xlu0 %v5218_v38  ;;  %v2141_v21 = vadd.f32 %v2129_v1, %v5849_v15  ;;  %v2406_v1 = vld [vmem:[%s5355_s4 + $0x10] sm:$0xff]  ;;  %v2407_v15 = vld [vmem:[%s5355_s4 + $0x18] sm:$0xff] }
 0x359   : > { %v5233_v11 = vadd.f32 %v5174_v3, %v2141_v21  ;;  %v2168_v21 = vld [vmem:[%s5225_s24 + $0x48] sm:$0xff] }
 0x361   : > { %2320 = vperm.xlu1 %3930, %v2160_v18   ;;  %v4023_v18 = vld [vmem:[%s5714_s10 + $0x8] sm:$0xff]  }
 0x365   : > { %2325 = vperm.xlu1 %3930, %v2161_v43   ;;  %v4024_v43 = vld [vmem:[%s5713_s9 + $0x8] sm:$0xff]  }
 0x369   : > { %2330 = vperm.xlu1 %3930, %v2162_v59   ;;  %v4025_v59 = vld [vmem:[%s5714_s10] sm:$0xff]  }
 0x36d   : > { %2315 = vperm.xlu0 %3929, %v2159_v35   ;;  %v2165_v35 = vld [vmem:[%s5225_s24 + $0x30] sm:$0xff] }
 0x38d   : > { %2189 = vadd.xlane.f32.xlu1 %v5233_v11 }
 0x39e   : > { %2335 = vperm.xlu1 %3930, %v2163_v52   ;;  %v2415_v52 = vpack.c.bf16 %v2407_v15, %v2406_v1 }
 0x3b1   : > { %v2172_v33 = vpop.xlane.xlu0 %2171 }
 0x3b2   : > { %v2191_v6 = vmul.f32 0.0078125, %v2172_v33 }
 0x3b4   : > { %v5238_v12 = vsub.f32 %v5178_v58, %v2191_v6 }
 0x3b5   : > { %v2174_v7 = vpop.xlane.xlu1 %2173 }
 0x3b6   : > { %v2192_v42 = vmul.f32 0.0078125, %v2174_v7  ;;  %v2211_v20 = vmul.f32 %v5238_v12, %v5238_v12 }
 0x3b8   : > { %2221 = vadd.xlane.f32.xlu0 %v2211_v20  ;;  %v5243_v61 = vsub.f32 %v5183_v32, %v2192_v42 }
 0x3ba   : > { %v2212_v28 = vmul.f32 %v5243_v61, %v5243_v61 }
 0x3bb   : > { %v2176_v3 = vpop.xlane.xlu0 %2175 }
 0x3bc   : > { %v2193_v57 = vmul.f32 0.0078125, %v2176_v3 }
 0x3be   : > { %v5246_v41 = vsub.f32 %v5188_v10, %v2193_v57 }
 0x3bf   : > { %v2178_v27 = vpop.xlane.xlu1 %2177 }
 0x3c0   : > { %v2194_v58 = vmul.f32 0.0078125, %v2178_v27  ;;  %v2213_v44 = vmul.f32 %v5246_v41, %v5246_v41  ;;  %v2409_v27 = vld [vmem:[%s5355_s4 + $0x28] sm:$0xff] }
 0x3c2   : > { %2223 = vadd.xlane.f32.xlu1 %v2212_v28  ;;  %v5253_v53 = vsub.f32 %v5193_v36, %v2194_v58  ;;  %2225 = vadd.xlane.f32.xlu0 %v2213_v44  ;;  %v2408_v28 = vld [vmem:[%s5355_s4 + $0x20] sm:$0xff]  ;;  %v2164_v44 = vld [vmem:[%s5225_s24 + $0x28] sm:$0xff]  ;;  %s5661_s24 = scalar_lea.vmem %s5726_s22, %s4370_s30 }
 0x3c3   : > { %v2416_v58 = vpack.c.bf16 %v2409_v27, %v2408_v28 }
 0x3c4   : > { %v2214_v32 = vmul.f32 %v5253_v53, %v5253_v53 }
 0x3c5   : > { %v2180_v34 = vpop.xlane.xlu0 %2179 }
 0x3c6   : > { %v2195_v46 = vmul.f32 0.0078125, %v2180_v34  ;;  %2227 = vadd.xlane.f32.xlu1 %v2214_v32  ;;  %v2410_v32 = vld [vmem:[%s5355_s4 + $0x30] sm:$0xff]  ;;  %v2411_v34 = vld [vmem:[%s5355_s4 + $0x38] sm:$0xff] }
 0x3c8   : > { %v5258_v10 = vsub.f32 %v5198_v2, %v2195_v46  ;;  %v4011_v2 = vld [vmem:[%s5714_s10 + $0x38] sm:$0xff]   ;;  %v2417_v46 = vpack.c.bf16 %v2411_v34, %v2410_v32 }
 0x3c9   : > { %v2182_v55 = vpop.xlane.xlu1 %2181  ;;  %3775 = vmatpush3.bf16.msra.mxu0 %v4011_v2 }
 0x3ca   : > { %v2196_v56 = vmul.f32 0.0078125, %v2182_v55  ;;  %v2215_v30 = vmul.f32 %v5258_v10, %v5258_v10  ;;  %3776 = vmatprep.subr.bf16.mxu0 %v4242_v26  ;;  %v2412_v55 = vld [vmem:[%s5355_s4 + $0x40] sm:$0xff] }
 0x3cc   : > { %v5263_v47 = vsub.f32 %v5203_v29, %v2196_v56  ;;  %2229 = vadd.xlane.f32.xlu0 %v2215_v30  ;;  %v2413_v56 = vld [vmem:[%s5355_s4 + $0x48] sm:$0xff] }
 0x3cd   : > { %3777 = vmatpush3.bf16.msra.mxu0 %v4013_v14  ;;  %v2418_v30 = vpack.c.bf16 %v2413_v56, %v2412_v55 }
 0x3ce   : > { %v2216_v36 = vmul.f32 %v5263_v47, %v5263_v47  ;;  %3778 = vmatprep.subr.bf16.mxu0 %v4242_v26 }
 0x3d0   : > { %2231 = vadd.xlane.f32.xlu1 %v2216_v36 }
 0x3d1   : > { %3779 = vmatpush3.bf16.msra.mxu0 %v4015_v60 }
 0x3d2   : > { %3780 = vmatprep.subr.bf16.mxu0 %v4242_v26 }
 0x3d5   : > { %v2184_v37 = vpop.xlane.xlu0 %2183  ;;  %3781 = vmatpush3.bf16.msra.mxu0 %v4017_v0 }
 0x3d6   : > { %v2197_v51 = vmul.f32 0.0078125, %v2184_v37  ;;  %3782 = vmatprep.subr.bf16.mxu0 %v4242_v26 }
 0x3d8   : > { %v5276_v29 = vsub.f32 %v5208_v19, %v2197_v51  ;;  %v4014_v19 = vld [vmem:[%s5713_s9 + $0x30] sm:$0xff]  }
 0x3d9   : > { %v2186_v23 = vpop.xlane.xlu1 %2185  ;;  %3813 = vmatpush3.bf16.msra.mxu1 %v4014_v19  ;;  %3783 = vmatpush3.bf16.msra.mxu0 %v4019_v16 }
 0x3da   : > { %v2198_v9 = vmul.f32 0.0078125, %v2186_v23  ;;  %v2217_v5 = vmul.f32 %v5276_v29, %v5276_v29  ;;  %3814 = vmatprep.subr.bf16.mxu1 %v4242_v26  ;;  %3784 = vmatprep.subr.bf16.mxu0 %v4242_v26 }
 0x3dc   : > { %v5283_v8 = vsub.f32 %v5213_v17, %v2198_v9  ;;  %2233 = vadd.xlane.f32.xlu0 %v2217_v5 }
 0x3dd   : > { %3815 = vmatpush3.bf16.msra.mxu1 %v4016_v50  ;;  %3785 = vmatpush3.bf16.msra.mxu0 %v4021_v54  ;;  %v5368_v33 = vpop.permute.xlu1 %2320 }
 0x3de   : > { %v2218_v48 = vmul.f32 %v5283_v8, %v5283_v8  ;;  %3816 = vmatprep.subr.bf16.mxu1 %v4242_v26  ;;  %3786 = vmatprep.subr.bf16.mxu0 %v4242_v26 }
 0x3e0   : > { %2235 = vadd.xlane.f32.xlu1 %v2218_v48  ;;  %v2188_v45 = vpop.xlane.xlu0 %2187 }
 0x3e1   : > { %v2199_v31 = vmul.f32 0.0078125, %v2188_v45  ;;  %3817 = vmatpush3.bf16.msra.mxu1 %v4018_v25  ;;  %3787 = vmatpush3.bf16.msra.mxu0 %v4023_v18  ;;  %v5372_v6 = vpop.permute.xlu1 %2325 }
 0x3e2   : > { %3818 = vmatprep.subr.bf16.mxu1 %v4242_v26  ;;  %3788 = vmatprep.subr.bf16.mxu0 %v4242_v26 }
 0x3e3   : > { %v5302_v17 = vsub.f32 %v5218_v38, %v2199_v31  ;;  %v4022_v38 = vld [vmem:[%s5713_s9 + $0x10] sm:$0xff]   ;;  %v5397_v31 = vld [vmem:[%s5721_s17] ss:$0 sm:$0xff] }
 0x3e5   : > { %v2219_v62 = vmul.f32 %v5302_v17, %v5302_v17  ;;  %3819 = vmatpush3.bf16.msra.mxu1 %v4020_v63  ;;  %3789 = vmatpush3.bf16.msra.mxu0 %v4025_v59  ;;  %v5374_v7 = vpop.permute.xlu1 %2330 }
 0x3e6   : > { %3820 = vmatprep.subr.bf16.mxu1 %v4242_v26  ;;  %3846 = vmatprep.subr.bf16.mxu0 %v4242_v26 }
 0x3e7   : > { %2237 = vadd.xlane.f32.xlu1 %v2219_v62  ;;  %v5403_v62 = vld [vmem:[%s5722_s18] ss:$0 sm:$0xff] }
 0x3e8   : > { %3791 = vmatmul.mubr.bf16.vlgmr.msra.gmra.mxu0 %v2414_v24 }
 0x3e9   : > { %3821 = vmatpush3.bf16.msra.mxu1 %v4022_v38  ;;  %3794 = vmatprep.mubr.msk.bf16.mxu0 %vm4243_vm0, %v4242_v26 }
 0x3ea   : > { %3822 = vmatprep.subr.bf16.mxu1 %v4242_v26 }
 0x3ed   : > { %3823 = vmatpush3.bf16.msra.mxu1 %v4024_v43 }
 0x3ee   : > { %3824 = vmatprep.subr.bf16.mxu1 %v4242_v26 }
 0x3f0   : > { %3795 = vmatmul.mubr.bf16.gmra.mxu0 %v2415_v52 }
 0x3f1   : > { %3825 = vmatpush3.bf16.msra.mxu1 %v4026_v4  ;;  %3798 = vmatprep.mubr.msk.bf16.mxu0 %vm4243_vm0, %v4242_v26 }
 0x3f2   : > { %3882 = vmatprep.subr.bf16.mxu1 %v4242_v26 }
 0x3f8   : > { %2345 = vperm.xlu1 %3930, %v2165_v35   ;;  %3799 = vmatmul.mubr.bf16.gmra.mxu0 %v2416_v58 }
 0x3f9   : > { %3802 = vmatprep.mubr.msk.bf16.mxu0 %vm4243_vm0, %v4242_v26 }
 0x3fc   : > { %2350 = vperm.xlu1 %3930, %v2166_v22  }
 0x400   : > { %2355 = vperm.xlu1 %3930, %v2167_v40   ;;  %3803 = vmatmul.mubr.bf16.gmra.mxu0 %v2417_v46 }
 0x401   : > { %3806 = vmatprep.mubr.msk.bf16.mxu0 %vm4243_vm0, %v4242_v26 }
 0x404   : > { %2360 = vperm.xlu1 %3930, %v2168_v21  }
 0x408   : > { %3807 = vmatmul.mubr.bf16.gmra.mxu0 %v2418_v30 }
 0x409   : > { %3862 = vmatprep.mubr.msk.bf16.mxu0 %vm4243_vm0, %v4242_v26 }
 0x416   : > { %v2190_v42 = vpop.xlane.xlu1 %2189 }
 0x417   : > { %v2200_v20 = vmul.f32 0.0078125, %v2190_v42 }
 0x419   : > { %v5377_v3 = vsub.f32 %v5233_v11, %v2200_v20  ;;  %v2316_v11 = vpop.permute.xlu0 %2315 }
 0x41a   : > { %v2336_v2 = vpop.permute.xlu1 %2335 }
 0x41b   : > { %v2220_v57 = vmul.f32 %v5377_v3, %v5377_v3 }
 0x41d   : > { %2239 = vadd.xlane.f32.xlu0 %v2220_v57 }
 0x433   : > { %2340 = vperm.xlu0 %3929, %v2164_v44  }
 0x441   : > { %v2222_v36 = vpop.xlane.xlu0 %2221 }
 0x442   : > { %v2241_v37 = vmul.f32 0.0078125, %v2222_v36 }
 0x444   : > { %v2251_v51 = vadd.f32 1e-05, %v2241_v37 }
 0x446   : > { %4143 = vrsqrt.f32 %v2251_v51 }
 0x44b   : > { %v2224_v39 = vpop.xlane.xlu1 %2223  ;;  %v2226_v23 = vpop.xlane.xlu0 %2225 }
 0x44c   : > { %v2242_v9 = vmul.f32 0.0078125, %v2224_v39  ;;  %v2243_v5 = vmul.f32 0.0078125, %v2226_v23 }
 0x44e   : > { %v2252_v48 = vadd.f32 1e-05, %v2242_v9  ;;  %v2253_v14 = vadd.f32 1e-05, %v2243_v5 }
 0x44f   : > { %v2228_v19 = vpop.xlane.xlu1 %2227 }
 0x450   : > { %4145 = vrsqrt.f32 %v2252_v48  ;;  %v2244_v45 = vmul.f32 0.0078125, %v2228_v19 }
 0x451   : > { %4147 = vrsqrt.f32 %v2253_v14 }
 0x452   : > { %v2254_v60 = vadd.f32 1e-05, %v2244_v45 }
 0x453   : > { %v4144_v50 = vpop.eup %4143 }
 0x454   : > { %v2271_v0 = vmul.f32 %v4144_v50, %v5238_v12  ;;  %4149 = vrsqrt.f32 %v2254_v60 }
 0x455   : > { %v2230_v25 = vpop.xlane.xlu0 %2229 }
 0x456   : > { %v2287_v16 = vmul.f32 %v5397_v31, %v2271_v0  ;;  %v2245_v63 = vmul.f32 0.0078125, %v2230_v25 }
 0x458   : > { %v2255_v54 = vadd.f32 1e-05, %v2245_v63  ;;  %v2303_v38 = vadd.f32 %v5403_v62, %v2287_v16 }
 0x459   : > { %v2232_v21 = vpop.xlane.xlu1 %2231 }
 0x45a   : > { %4151 = vrsqrt.f32 %v2255_v54  ;;  %v2363_v12 = vmul.f32 %v2316_v11, %v2303_v38 }
 0x45c   : > { %2373 = vst [vmem:[%s5411_s25] sm:$0xff] %v2363_v12 }
 0x45d   : > { %v4146_v18 = vpop.eup %4145 }
 0x45e   : > { %v4148_v43 = vpop.eup %4147  ;;  %v2272_v59 = vmul.f32 %v4146_v18, %v5243_v61 }
 0x45f   : > { %v2273_v35 = vmul.f32 %v4148_v43, %v5246_v41 }
 0x460   : > { %v2288_v4 = vmul.f32 %v5397_v31, %v2272_v59 }
 0x461   : > { %v4150_v49 = vpop.eup %4149  ;;  %v2289_v13 = vmul.f32 %v5397_v31, %v2273_v35 }
 0x462   : > { %v2304_v24 = vadd.f32 %v5403_v62, %v2288_v4  ;;  %v2274_v22 = vmul.f32 %v4150_v49, %v5253_v53 }
 0x463   : > { %v2305_v40 = vadd.f32 %v5403_v62, %v2289_v13  ;;  %v4027_v13 = vld [vmem:[%s5715_s11 + $0x38] sm:$0xff]  }
 0x464   : > { %v2364_v1 = vmul.f32 %v5368_v33, %v2304_v24  ;;  %v2290_v15 = vmul.f32 %v5397_v31, %v2274_v22  ;;  %3847 = vmatpush3.bf16.msra.mxu0 %v4027_v13 }
 0x465   : > { %v2234_v61 = vpop.xlane.xlu0 %2233  ;;  %v2365_v41 = vmul.f32 %v5372_v6, %v2305_v40  ;;  %v4028_v40 = vld [vmem:[%s5715_s11 + $0x30] sm:$0xff]   ;;  %3848 = vmatprep.subr.bf16.mxu0 %v4242_v26 }
 0x466   : > { %v2247_v52 = vmul.f32 0.0078125, %v2234_v61  ;;  %2374 = vst [vmem:[%s5411_s25 + $0x8] sm:$0xff] %v2364_v1  ;;  %v2383_v42 = vpack.c.bf16 %v2364_v1, %v2363_v12  ;;  %v2306_v20 = vadd.f32 %v5403_v62, %v2290_v15  ;;  %v4029_v61 = vld [vmem:[%s5715_s11 + $0x28] sm:$0xff]  }
 0x467   : > { %v4152_v57 = vpop.eup %4151  ;;  %2375 = vst [vmem:[%s5411_s25 + $0x10] sm:$0xff] %v2365_v41 }
 0x468   : > { %v2257_v28 = vadd.f32 1e-05, %v2247_v52  ;;  %3827 = vmatmul.mubr.bf16.vlgmr.msra.gmra.mxu1 %v2383_v42  ;;  %v2366_v53 = vmul.f32 %v5374_v7, %v2306_v20  ;;  %v2275_v33 = vmul.f32 %v4152_v57, %v5258_v10  ;;  %3849 = vmatpush3.bf16.msra.mxu0 %v4028_v40  ;;  %v4030_v52 = vld [vmem:[%s5715_s11 + $0x20] sm:$0xff]   ;;  %v4031_v57 = vld [vmem:[%s5715_s11 + $0x18] sm:$0xff]  }
 0x469   : > { %v2236_v27 = vpop.xlane.xlu1 %2235  ;;  %3830 = vmatprep.mubr.msk.bf16.mxu1 %vm4243_vm0, %v4242_v26  ;;  %3850 = vmatprep.subr.bf16.mxu0 %v4242_v26 }
 0x46a   : > { %4153 = vrsqrt.f32 %v2257_v28  ;;  %v2248_v6 = vmul.f32 0.0078125, %v2236_v27  ;;  %2376 = vst [vmem:[%s5411_s25 + $0x18] sm:$0xff] %v2366_v53  ;;  %v2291_v58 = vmul.f32 %v5397_v31, %v2275_v33  ;;  %v2384_v32 = vpack.c.bf16 %v2366_v53, %v2365_v41  ;;  %v4032_v53 = vld [vmem:[%s5715_s11 + $0x10] sm:$0xff]   ;;  %v4033_v33 = vld [vmem:[%s5715_s11 + $0x8] sm:$0xff]   ;;  %v4034_v27 = vld [vmem:[%s5715_s11] sm:$0xff]  }
 0x46c   : > { %v2258_v44 = vadd.f32 1e-05, %v2248_v6  ;;  %v2307_v34 = vadd.f32 %v5403_v62, %v2291_v58  ;;  %3851 = vmatpush3.bf16.msra.mxu0 %v4029_v61 }
 0x46d   : > { %3852 = vmatprep.subr.bf16.mxu0 %v4242_v26 }
 0x46e   : > { %4155 = vrsqrt.f32 %v2258_v44  ;;  %v2367_v46 = vmul.f32 %v2336_v2, %v2307_v34 }
 0x470   : > { %3831 = vmatmul.mubr.bf16.gmra.mxu1 %v2384_v32  ;;  %2377 = vst [vmem:[%s5411_s25 + $0x20] sm:$0xff] %v2367_v46  ;;  %v2238_v10 = vpop.xlane.xlu1 %2237  ;;  %3853 = vmatpush3.bf16.msra.mxu0 %v4030_v52 }
 0x471   : > { %3834 = vmatprep.mubr.msk.bf16.mxu1 %vm4243_vm0, %v4242_v26  ;;  %v2249_v7 = vmul.f32 0.0078125, %v2238_v10  ;;  %3854 = vmatprep.subr.bf16.mxu0 %v4242_v26 }
 0x473   : > { %v2259_v11 = vadd.f32 1e-05, %v2249_v7 }
 0x474   : > { %v2346_v37 = vpop.permute.xlu1 %2345  ;;  %3855 = vmatpush3.bf16.msra.mxu0 %v4031_v57 }
 0x475   : > { %4157 = vrsqrt.f32 %v2259_v11  ;;  %3856 = vmatprep.subr.bf16.mxu0 %v4242_v26 }
 0x477   : > { %v4154_v55 = vpop.eup %4153 }
 0x478   : > { %v2277_v56 = vmul.f32 %v4154_v55, %v5276_v29  ;;  %v2351_v5 = vpop.permute.xlu1 %2350  ;;  %3857 = vmatpush3.bf16.msra.mxu0 %v4032_v53 }
 0x479   : > { %3858 = vmatprep.subr.bf16.mxu0 %v4242_v26 }
 0x47a   : > { %v2293_v30 = vmul.f32 %v5397_v31, %v2277_v56 }
 0x47b   : > { %v4156_v36 = vpop.eup %4155 }
 0x47c   : > { %v2309_v51 = vadd.f32 %v5403_v62, %v2293_v30  ;;  %v2278_v2 = vmul.f32 %v4156_v36, %v5283_v8  ;;  %v2356_v60 = vpop.permute.xlu1 %2355  ;;  %v2246_v8 = vmul.f32 0.0078125, %v2232_v21  ;;  %3859 = vmatpush3.bf16.msra.mxu0 %v4033_v33 }
 0x47d   : > { %3860 = vmatprep.subr.bf16.mxu0 %v4242_v26 }
 0x47e   : > { %v2369_v39 = vmul.f32 %v2346_v37, %v2309_v51  ;;  %v2294_v23 = vmul.f32 %v5397_v31, %v2278_v2  ;;  %v2256_v0 = vadd.f32 1e-05, %v2246_v8 }
 0x480   : > { %2379 = vst [vmem:[%s5411_s25 + $0x30] sm:$0xff] %v2369_v39  ;;  %v2310_v9 = vadd.f32 %v5403_v62, %v2294_v23  ;;  %4159 = vrsqrt.f32 %v2256_v0  ;;  %v2361_v1 = vpop.permute.xlu1 %2360  ;;  %3861 = vmatpush3.bf16.msra.mxu0 %v4034_v27 }
 0x482   : > { %v2370_v48 = vmul.f32 %v2351_v5, %v2310_v9  ;;  %v4158_v14 = vpop.eup %4157 }
 0x483   : > { %v2279_v29 = vmul.f32 %v4158_v14, %v5302_v17 }
 0x484   : > { %2380 = vst [vmem:[%s5411_s25 + $0x38] sm:$0xff] %v2370_v48  ;;  %v2386_v4 = vpack.c.bf16 %v2370_v48, %v2369_v39 }
 0x485   : > { %v2295_v19 = vmul.f32 %v5397_v31, %v2279_v29 }
 0x487   : > { %v2311_v45 = vadd.f32 %v5403_v62, %v2295_v19 }
 0x489   : > { %v2371_v50 = vmul.f32 %v2356_v60, %v2311_v45 }
 0x48b   : > { %2381 = vst [vmem:[%s5411_s25 + $0x40] sm:$0xff] %v2371_v50 }
 0x48d   : > { %v4160_v25 = vpop.eup %4159 }
 0x48e   : > { %v2276_v16 = vmul.f32 %v4160_v25, %v5263_v47 }
 0x490   : > { %v2292_v12 = vmul.f32 %v5397_v31, %v2276_v16 }
 0x492   : > { %v2308_v17 = vadd.f32 %v5403_v62, %v2292_v12 }
 0x4a6   : > { %v2240_v63 = vpop.xlane.xlu0 %2239 }
 0x4a7   : > { %v2250_v54 = vmul.f32 0.0078125, %v2240_v63 }
 0x4a8   : > { %v2517_v22 = vpop.f32.mrf.mxu0 }
 0x4a9   : > { %v2260_v38 = vadd.f32 1e-05, %v2250_v54 }
 0x4ab   : > { %4161 = vrsqrt.f32 %v2260_v38 }
 0x4ae   : > { %v2341_v18 = vpop.permute.xlu0 %2340 }
 0x4af   : > { %v2368_v43 = vmul.f32 %v2341_v18, %v2308_v17 }
 0x4b1   : > { %2378 = vst [vmem:[%s5411_s25 + $0x28] sm:$0xff] %v2368_v43  ;;  %v2385_v59 = vpack.c.bf16 %v2368_v43, %v2367_v46 }
 0x4b3   : > { %3835 = vmatmul.mubr.bf16.gmra.mxu1 %v2385_v59 }
 0x4b4   : > { %3838 = vmatprep.mubr.msk.bf16.mxu1 %vm4243_vm0, %v4242_v26 }
 0x4b8   : > { %v4162_v35 = vpop.eup %4161 }
 0x4b9   : > { %v2280_v47 = vmul.f32 %v4162_v35, %v5377_v3 }
 0x4bb   : > { %3839 = vmatmul.mubr.bf16.gmra.mxu1 %v2386_v4  ;;  %v2296_v49 = vmul.f32 %v5397_v31, %v2280_v47  ;;  %v3792_v31 = vpop.f32.mrf.mxu0 }
 0x4bc   : > { %3842 = vmatprep.mubr.msk.bf16.mxu1 %vm4243_vm0, %v4242_v26 }
 0x4bd   : > { %v2312_v24 = vadd.f32 %v5403_v62, %v2296_v49  ;;  %v2520_v21 = vpop.f32.mrf.mxu0 }
 0x4bf   : > { %v2372_v3 = vmul.f32 %v2361_v1, %v2312_v24  ;;  %v3793_v62 = vpop.f32.mrf.mxu0 }
 0x4c1   : > { %2382 = vst [vmem:[%s5411_s25 + $0x48] sm:$0xff] %v2372_v3  ;;  %v2387_v15 = vpack.c.bf16 %v2372_v3, %v2371_v50  ;;  %v2525_v41 = vpop.f32.mrf.mxu0  ;;  %s5851_s25 = sld [smem:[#allocation44_spill]] }
 0x4c3   : > { %3843 = vmatmul.mubr.bf16.gmra.mxu1 %v2387_v15  ;;  %v3796_v42 = vpop.f32.mrf.mxu0 }
 0x4c4   : > { %3898 = vmatprep.mubr.msk.bf16.mxu1 %vm4243_vm0, %v4242_v26 }
 0x4c5   : > { %v2528_v20 = vpop.f32.mrf.mxu0 }
 0x4c7   : > { %v3797_v28 = vpop.f32.mrf.mxu0  ;;  %s5510_s26 = scalar_lea.vmem %s5851_s25, %s3495_s1 }
 0x4c8   : > { %v3607_v36 = vld [vmem:[%s5510_s26] sm:$0xff]   ;;  %v3626_v48 = vld [vmem:[%s5510_s26 + $0x8] sm:$0xff]  }
 0x4c9   : > { %v5494_v6 = vpop.f32.mrf.mxu0  ;;  %v3608_v37 = vunpack.c.l.bf16 %v3607_v36  ;;  %v3609_v9 = vunpack.c.h.bf16 %v3607_v36  ;;  %v3612_v50 = vunpack.c.l.bf16 %v3626_v48  ;;  %v3613_v17 = vunpack.c.h.bf16 %v3626_v48 }
 0x4cb   : > { %v3800_v58 = vpop.f32.mrf.mxu0 }
 0x4cd   : > { %v5496_v44 = vpop.f32.mrf.mxu0 }
 0x4cf   : > { %v3801_v32 = vpop.f32.mrf.mxu0 }
 0x4d1   : > { %v5498_v34 = vpop.f32.mrf.mxu0 }
 0x4d3   : > { %v3804_v46 = vpop.f32.mrf.mxu0 }
 0x4d5   : > { %v5500_v10 = vpop.f32.mrf.mxu0 }
 0x4d7   : > { %v3805_v7 = vpop.f32.mrf.mxu0 }
 0x4d9   : > { %v5502_v11 = vpop.f32.mrf.mxu0 }
 0x4db   : > { %v3808_v55 = vpop.f32.mrf.mxu0 }
 0x4dd   : > { %v5504_v56 = vpop.f32.mrf.mxu0 }
 0x4df   : > { %v3809_v30 = vpop.f32.mrf.mxu0 }
 0x528   : > { %v2638_v51 = vpop.f32.mrf.mxu1 }
 0x529   : > { %v2639_v2 = vadd.f32 %v2638_v51, %v2517_v22 }
 0x52a   : > { %v3828_v39 = vpop.f32.mrf.mxu1 }
 0x52b   : > { %v2697_v23 = vadd.f32 %v3608_v37, %v2639_v2  ;;  %v3627_v2 = vld [vmem:[%s5510_s26 + $0x10] sm:$0xff]  }
 0x52c   : > { %v2641_v5 = vpop.f32.mrf.mxu1  ;;  %v3616_v39 = vunpack.c.l.bf16 %v3627_v2 }
 0x52d   : > { %v2717_v14 = vmul.f32 0.044715, %v2697_v23  ;;  %v2642_v29 = vadd.f32 %v2641_v5, %v2520_v21 }
 0x52e   : > { %v3829_v19 = vpop.f32.mrf.mxu1 }
 0x52f   : > { %v2727_v45 = vmul.f32 %v2717_v14, %v2697_v23  ;;  %v2698_v60 = vadd.f32 %v3609_v9, %v2642_v29  ;;  %v3617_v14 = vunpack.c.h.bf16 %v3627_v2  ;;  %v3628_v19 = vld [vmem:[%s5510_s26 + $0x18] sm:$0xff]  }
 0x530   : > { %v2646_v8 = vpop.f32.mrf.mxu1 }
 0x531   : > { %v2737_v0 = vmul.f32 %v2727_v45, %v2697_v23  ;;  %v2718_v25 = vmul.f32 0.044715, %v2698_v60  ;;  %v2647_v16 = vadd.f32 %v2646_v8, %v2525_v41  ;;  %v2708_v57 = vmul.f32 0.5, %v2698_v60 }
 0x532   : > { %v3832_v63 = vpop.f32.mrf.mxu1 }
 0x533   : > { %v2747_v54 = vadd.f32 %v2737_v0, %v2697_v23  ;;  %v2728_v38 = vmul.f32 %v2718_v25, %v2698_v60  ;;  %v2699_v12 = vadd.f32 %v3612_v50, %v2647_v16  ;;  %v3620_v25 = vunpack.c.l.bf16 %v3628_v19 }
 0x534   : > { %v2649_v18 = vpop.f32.mrf.mxu1 }
 0x535   : > { %v2757_v43 = vmul.f32 0.7978846, %v2747_v54  ;;  %v2738_v59 = vmul.f32 %v2728_v38, %v2698_v60  ;;  %v2719_v35 = vmul.f32 0.044715, %v2699_v12  ;;  %v2650_v4 = vadd.f32 %v2649_v18, %v2528_v20 }
 0x536   : > { %v3833_v47 = vpop.f32.mrf.mxu1  ;;  %v2707_v20 = vmul.f32 0.5, %v2697_v23  ;;  %v2709_v7 = vmul.f32 0.5, %v2699_v12  ;;  %v3621_v18 = vunpack.c.h.bf16 %v3628_v19 }
 0x537   : > { %4163 = vtanh.f32 %v2757_v43  ;;  %v2748_v49 = vadd.f32 %v2738_v59, %v2698_v60  ;;  %v2729_v13 = vmul.f32 %v2719_v35, %v2699_v12  ;;  %v2700_v24 = vadd.f32 %v3613_v17, %v2650_v4  ;;  %v3629_v43 = vld [vmem:[%s5510_s26 + $0x20] sm:$0xff]  }
 0x539   : > { %v2758_v22 = vmul.f32 0.7978846, %v2748_v49  ;;  %v2720_v40 = vmul.f32 0.044715, %v2700_v24  ;;  %v2739_v1 = vmul.f32 %v2729_v13, %v2699_v12  ;;  %v2710_v55 = vmul.f32 0.5, %v2700_v24 }
 0x53b   : > { %4165 = vtanh.f32 %v2758_v22  ;;  %v2730_v3 = vmul.f32 %v2720_v40, %v2700_v24  ;;  %v2749_v31 = vadd.f32 %v2739_v1, %v2699_v12 }
 0x53d   : > { %v2740_v15 = vmul.f32 %v2730_v3, %v2700_v24  ;;  %v2759_v21 = vmul.f32 0.7978846, %v2749_v31 }
 0x53f   : > { %v2750_v61 = vadd.f32 %v2740_v15, %v2700_v24  ;;  %4167 = vtanh.f32 %v2759_v21  ;;  %v3624_v24 = vunpack.c.l.bf16 %v3629_v43 }
 0x541   : > { %v2760_v62 = vmul.f32 0.7978846, %v2750_v61 }
 0x543   : > { %4169 = vtanh.f32 %v2760_v62 }
 0x544   : > { %v4164_v41 = vpop.eup %4163 }
 0x545   : > { %v2777_v52 = vadd.f32 1.0, %v4164_v41 }
 0x547   : > { %v2787_v53 = vmul.f32 %v2777_v52, %v2707_v20  ;;  %v3625_v52 = vunpack.c.h.bf16 %v3629_v43 }
 0x548   : > { %v4166_v42 = vpop.eup %4165 }
 0x549   : > { %v2778_v28 = vadd.f32 1.0, %v4166_v42 }
 0x54b   : > { %v2788_v33 = vmul.f32 %v2778_v28, %v2708_v57 }
 0x54c   : > { %v4168_v27 = vpop.eup %4167 }
 0x54d   : > { %v2797_v58 = vpack.c.bf16 %v2788_v33, %v2787_v53  ;;  %v2779_v32 = vadd.f32 1.0, %v4168_v27 }
 0x54f   : > { %3863 = vmatmul.mubr.bf16.vlgmr.msra.gmra.mxu0 %v2797_v58  ;;  %v2789_v36 = vmul.f32 %v2779_v32, %v2709_v7 }
 0x550   : > { %v4170_v46 = vpop.eup %4169  ;;  %3866 = vmatprep.mubr.msk.bf16.mxu0 %vm4243_vm0, %v4242_v26 }
 0x551   : > { %v2780_v30 = vadd.f32 1.0, %v4170_v46 }
 0x553   : > { %v2790_v37 = vmul.f32 %v2780_v30, %v2710_v55 }
 0x555   : > { %v2798_v51 = vpack.c.bf16 %v2790_v37, %v2789_v36 }
 0x557   : > { %3867 = vmatmul.mubr.bf16.gmra.mxu0 %v2798_v51 }
 0x558   : > { %3870 = vmatprep.mubr.msk.bf16.mxu0 %vm4243_vm0, %v4242_v26 }
 0x573   : > { %v2654_v23 = vpop.f32.mrf.mxu1 }
 0x574   : > { %v2655_v9 = vadd.f32 %v2654_v23, %v5494_v6 }
 0x575   : > { %v3836_v5 = vpop.f32.mrf.mxu1 }
 0x576   : > { %v5520_v48 = vadd.f32 %v3616_v39, %v2655_v9 }
 0x577   : > { %v2657_v29 = vpop.f32.mrf.mxu1 }
 0x578   : > { %v2721_v45 = vmul.f32 0.044715, %v5520_v48  ;;  %v2658_v60 = vadd.f32 %v2657_v29, %v5496_v44  ;;  %v2711_v23 = vmul.f32 0.5, %v5520_v48 }
 0x579   : > { %v3837_v50 = vpop.f32.mrf.mxu1 }
 0x57a   : > { %v2731_v8 = vmul.f32 %v2721_v45, %v5520_v48  ;;  %v2702_v0 = vadd.f32 %v3617_v14, %v2658_v60 }
 0x57b   : > { %v2662_v16 = vpop.f32.mrf.mxu1 }
 0x57c   : > { %v2722_v63 = vmul.f32 0.044715, %v2702_v0  ;;  %v2663_v6 = vadd.f32 %v2662_v16, %v5498_v34  ;;  %v2741_v54 = vmul.f32 %v2731_v8, %v5520_v48  ;;  %v2712_v9 = vmul.f32 0.5, %v2702_v0 }
 0x57d   : > { %v3840_v38 = vpop.f32.mrf.mxu1 }
 0x57e   : > { %v2732_v12 = vmul.f32 %v2722_v63, %v2702_v0  ;;  %v2703_v17 = vadd.f32 %v3620_v25, %v2663_v6  ;;  %v2751_v59 = vadd.f32 %v2741_v54, %v5520_v48  ;;  %v4035_v38 = vld [vmem:[%s5717_s13 + $0x38] sm:$0xff]  }
 0x57f   : > { %v2665_v35 = vpop.f32.mrf.mxu1  ;;  %3883 = vmatpush3.bf16.msra.mxu1 %v4035_v38 }
 0x580   : > { %v2723_v44 = vmul.f32 0.044715, %v2703_v17  ;;  %v2666_v4 = vadd.f32 %v2665_v35, %v5500_v10  ;;  %v2742_v47 = vmul.f32 %v2732_v12, %v2702_v0  ;;  %v2761_v49 = vmul.f32 0.7978846, %v2751_v59  ;;  %3884 = vmatprep.subr.bf16.mxu1 %v4242_v26 }
 0x581   : > { %v3841_v13 = vpop.f32.mrf.mxu1  ;;  %v2713_v25 = vmul.f32 0.5, %v2703_v17 }
 0x582   : > { %v2733_v22 = vmul.f32 %v2723_v44, %v2703_v17  ;;  %v2704_v40 = vadd.f32 %v3621_v18, %v2666_v4  ;;  %v2752_v34 = vadd.f32 %v2742_v47, %v2702_v0  ;;  %4171 = vtanh.f32 %v2761_v49  ;;  %v4036_v18 = vld [vmem:[%s5717_s13 + $0x30] sm:$0xff]   ;;  %v4037_v47 = vld [vmem:[%s5717_s13 + $0x28] sm:$0xff]   ;;  %v4038_v13 = vld [vmem:[%s5717_s13 + $0x20] sm:$0xff]  }
 0x583   : > { %v2670_v1 = vpop.f32.mrf.mxu1  ;;  %3885 = vmatpush3.bf16.msra.mxu1 %v4036_v18 }
 0x584   : > { %v2724_v3 = vmul.f32 0.044715, %v2704_v40  ;;  %v2671_v31 = vadd.f32 %v2670_v1, %v5502_v11  ;;  %v2762_v15 = vmul.f32 0.7978846, %v2752_v34  ;;  %v2743_v61 = vmul.f32 %v2733_v22, %v2703_v17  ;;  %3886 = vmatprep.subr.bf16.mxu1 %v4242_v26  ;;  %v4040_v22 = vld [vmem:[%s5717_s13 + $0x10] sm:$0xff]   ;;  %v4042_v34 = vld [vmem:[%s5717_s13] sm:$0xff]  }
 0x585   : > { %v3844_v21 = vpop.f32.mrf.mxu1  ;;  %v2714_v16 = vmul.f32 0.5, %v2704_v40  ;;  %v5572_v1 = vld [vmem:[%s5716_s12] ss:$0 sm:$0xff] }
 0x586   : > { %v2734_v62 = vmul.f32 %v2724_v3, %v2704_v40  ;;  %v2705_v41 = vadd.f32 %v3624_v24, %v2671_v31  ;;  %4173 = vtanh.f32 %v2762_v15  ;;  %v2753_v42 = vadd.f32 %v2743_v61, %v2703_v17  ;;  %v4039_v24 = vld [vmem:[%s5717_s13 + $0x18] sm:$0xff]  }
 0x587   : > { %v2673_v10 = vpop.f32.mrf.mxu1  ;;  %3887 = vmatpush3.bf16.msra.mxu1 %v4037_v47 }
 0x588   : > { %v2725_v20 = vmul.f32 0.044715, %v2705_v41  ;;  %v2674_v57 = vadd.f32 %v2673_v10, %v5504_v56  ;;  %v2744_v28 = vmul.f32 %v2734_v62, %v2704_v40  ;;  %v2763_v33 = vmul.f32 0.7978846, %v2753_v42  ;;  %3888 = vmatprep.subr.bf16.mxu1 %v4242_v26 }
 0x589   : > { %v3845_v53 = vpop.f32.mrf.mxu1  ;;  %v2715_v17 = vmul.f32 0.5, %v2705_v41 }
 0x58a   : > { %v2735_v27 = vmul.f32 %v2725_v20, %v2705_v41  ;;  %v2706_v58 = vadd.f32 %v3625_v52, %v2674_v57  ;;  %v2754_v32 = vadd.f32 %v2744_v28, %v2704_v40  ;;  %4175 = vtanh.f32 %v2763_v33  ;;  %v4041_v40 = vld [vmem:[%s5717_s13 + $0x8] sm:$0xff]  }
 0x58b   : > { %3889 = vmatpush3.bf16.msra.mxu1 %v4038_v13 }
 0x58c   : > { %v2726_v11 = vmul.f32 0.044715, %v2706_v58  ;;  %v2764_v46 = vmul.f32 0.7978846, %v2754_v32  ;;  %v2745_v7 = vmul.f32 %v2735_v27, %v2705_v41  ;;  %v2716_v59 = vmul.f32 0.5, %v2706_v58  ;;  %3890 = vmatprep.subr.bf16.mxu1 %v4242_v26 }
 0x58e   : > { %v2736_v55 = vmul.f32 %v2726_v11, %v2706_v58  ;;  %4177 = vtanh.f32 %v2764_v46  ;;  %v2755_v30 = vadd.f32 %v2745_v7, %v2705_v41 }
 0x58f   : > { %v4172_v36 = vpop.eup %4171  ;;  %3891 = vmatpush3.bf16.msra.mxu1 %v4039_v24 }
 0x590   : > { %v2746_v37 = vmul.f32 %v2736_v55, %v2706_v58  ;;  %v2765_v51 = vmul.f32 0.7978846, %v2755_v30  ;;  %v2781_v2 = vadd.f32 1.0, %v4172_v36  ;;  %3892 = vmatprep.subr.bf16.mxu1 %v4242_v26 }
 0x592   : > { %v2756_v39 = vadd.f32 %v2746_v37, %v2706_v58  ;;  %4179 = vtanh.f32 %v2765_v51  ;;  %v2791_v29 = vmul.f32 %v2781_v2, %v2711_v23 }
 0x593   : > { %v4174_v56 = vpop.eup %4173  ;;  %3893 = vmatpush3.bf16.msra.mxu1 %v4040_v22 }
 0x594   : > { %v2782_v5 = vadd.f32 1.0, %v4174_v56  ;;  %v2766_v14 = vmul.f32 0.7978846, %v2756_v39  ;;  %3894 = vmatprep.subr.bf16.mxu1 %v4242_v26 }
 0x596   : > { %v2792_v19 = vmul.f32 %v2782_v5, %v2712_v9  ;;  %4181 = vtanh.f32 %v2766_v14 }
 0x597   : > { %v4176_v45 = vpop.eup %4175  ;;  %3895 = vmatpush3.bf16.msra.mxu1 %v4041_v40 }
 0x598   : > { %v2799_v60 = vpack.c.bf16 %v2792_v19, %v2791_v29  ;;  %v2783_v50 = vadd.f32 1.0, %v4176_v45  ;;  %3896 = vmatprep.subr.bf16.mxu1 %v4242_v26 }
 0x59a   : > { %3871 = vmatmul.mubr.bf16.gmra.mxu0 %v2799_v60  ;;  %v2793_v6 = vmul.f32 %v2783_v50, %v2713_v25 }
 0x59b   : > { %v4178_v8 = vpop.eup %4177  ;;  %3874 = vmatprep.mubr.msk.bf16.mxu0 %vm4243_vm0, %v4242_v26  ;;  %3897 = vmatpush3.bf16.msra.mxu1 %v4042_v34 }
 0x59c   : > { %v2784_v63 = vadd.f32 1.0, %v4178_v8 }
 0x59e   : > { %v2794_v54 = vmul.f32 %v2784_v63, %v2714_v16 }
 0x59f   : > { %v4180_v48 = vpop.eup %4179 }
 0x5a0   : > { %v2800_v0 = vpack.c.bf16 %v2794_v54, %v2793_v6  ;;  %v2785_v12 = vadd.f32 1.0, %v4180_v48 }
 0x5a2   : > { %3875 = vmatmul.mubr.bf16.gmra.mxu0 %v2800_v0  ;;  %v2795_v44 = vmul.f32 %v2785_v12, %v2715_v17 }
 0x5a3   : > { %v4182_v43 = vpop.eup %4181  ;;  %3878 = vmatprep.mubr.msk.bf16.mxu0 %vm4243_vm0, %v4242_v26 }
 0x5a4   : > { %v2786_v35 = vadd.f32 1.0, %v4182_v43 }
 0x5a6   : > { %v2796_v4 = vmul.f32 %v2786_v35, %v2716_v59 }
 0x5a8   : > { %v2801_v49 = vpack.c.bf16 %v2796_v4, %v2795_v44 }
 0x5aa   : > { %3879 = vmatmul.mubr.bf16.gmra.mxu0 %v2801_v49 }
 0x60f   : > { %v2907_v3 = vpop.f32.mrf.mxu0 }
 0x610   : > { %v2908_v31 = vadd.f32 %v5572_v1, %v2907_v3 }
 0x611   : > { %v3864_v15 = vpop.f32.mrf.mxu0 }
 0x612   : > { %v2956_v21 = vmul.f32 0.044715, %v2908_v31  ;;  %v2946_v45 = vmul.f32 0.5, %v2908_v31 }
 0x613   : > { %v2910_v61 = vpop.f32.mrf.mxu0 }
 0x614   : > { %v2966_v62 = vmul.f32 %v2956_v21, %v2908_v31  ;;  %v2911_v41 = vadd.f32 %v5572_v1, %v2910_v61 }
 0x615   : > { %v3865_v52 = vpop.f32.mrf.mxu0 }
 0x616   : > { %v2976_v10 = vmul.f32 %v2966_v62, %v2908_v31  ;;  %v2957_v42 = vmul.f32 0.044715, %v2911_v41  ;;  %v2947_v60 = vmul.f32 0.5, %v2911_v41 }
 0x617   : > { %v2915_v20 = vpop.f32.mrf.mxu0 }
 0x618   : > { %v2986_v57 = vadd.f32 %v2976_v10, %v2908_v31  ;;  %v2967_v28 = vmul.f32 %v2957_v42, %v2911_v41  ;;  %v2916_v53 = vadd.f32 %v5572_v1, %v2915_v20 }
 0x619   : > { %v3868_v33 = vpop.f32.mrf.mxu0 }
 0x61a   : > { %v2996_v27 = vmul.f32 0.7978846, %v2986_v57  ;;  %v2977_v58 = vmul.f32 %v2967_v28, %v2911_v41  ;;  %v2958_v32 = vmul.f32 0.044715, %v2916_v53  ;;  %v2948_v48 = vmul.f32 0.5, %v2916_v53 }
 0x61b   : > { %v2918_v11 = vpop.f32.mrf.mxu0 }
 0x61c   : > { %4183 = vtanh.f32 %v2996_v27  ;;  %v2987_v46 = vadd.f32 %v2977_v58, %v2911_v41  ;;  %v2968_v7 = vmul.f32 %v2958_v32, %v2916_v53  ;;  %v2919_v55 = vadd.f32 %v5572_v1, %v2918_v11 }
 0x61d   : > { %v3869_v30 = vpop.f32.mrf.mxu0 }
 0x61e   : > { %v2997_v36 = vmul.f32 0.7978846, %v2987_v46  ;;  %v2978_v37 = vmul.f32 %v2968_v7, %v2916_v53  ;;  %v2959_v51 = vmul.f32 0.044715, %v2919_v55  ;;  %v2949_v0 = vmul.f32 0.5, %v2919_v55 }
 0x620   : > { %4185 = vtanh.f32 %v2997_v36  ;;  %v2969_v2 = vmul.f32 %v2959_v51, %v2919_v55  ;;  %v2988_v39 = vadd.f32 %v2978_v37, %v2916_v53 }
 0x622   : > { %v2979_v56 = vmul.f32 %v2969_v2, %v2919_v55  ;;  %v2998_v23 = vmul.f32 0.7978846, %v2988_v39 }
 0x624   : > { %v2989_v9 = vadd.f32 %v2979_v56, %v2919_v55  ;;  %4187 = vtanh.f32 %v2998_v23 }
 0x626   : > { %v2999_v5 = vmul.f32 0.7978846, %v2989_v9 }
 0x628   : > { %4189 = vtanh.f32 %v2999_v5 }
 0x629   : > { %v4184_v14 = vpop.eup %4183 }
 0x62a   : > { %v3016_v29 = vadd.f32 1.0, %v4184_v14 }
 0x62c   : > { %v3026_v8 = vmul.f32 %v3016_v29, %v2946_v45 }
 0x62d   : > { %v4186_v19 = vpop.eup %4185 }
 0x62e   : > { %v3017_v50 = vadd.f32 1.0, %v4186_v19 }
 0x630   : > { %v3027_v25 = vmul.f32 %v3017_v50, %v2947_v60 }
 0x631   : > { %v4188_v16 = vpop.eup %4187 }
 0x632   : > { %v3036_v63 = vpack.c.bf16 %v3027_v25, %v3026_v8  ;;  %v3018_v6 = vadd.f32 1.0, %v4188_v16 }
 0x634   : > { %3899 = vmatmul.mubr.bf16.vlgmr.msra.gmra.mxu1 %v3036_v63  ;;  %v3028_v12 = vmul.f32 %v3018_v6, %v2948_v48 }
 0x635   : > { %v4190_v54 = vpop.eup %4189  ;;  %3902 = vmatprep.mubr.msk.bf16.mxu1 %vm4243_vm0, %v4242_v26 }
 0x636   : > { %v3019_v38 = vadd.f32 1.0, %v4190_v54 }
 0x638   : > { %v3029_v18 = vmul.f32 %v3019_v38, %v2949_v0 }
 0x63a   : > { %v3037_v43 = vpack.c.bf16 %v3029_v18, %v3028_v12 }
 0x63c   : > { %3903 = vmatmul.mubr.bf16.gmra.mxu1 %v3037_v43 }
 0x63d   : > { %3906 = vmatprep.mubr.msk.bf16.mxu1 %vm4243_vm0, %v4242_v26 }
 0x65a   : > { %v2923_v17 = vpop.f32.mrf.mxu0 }
 0x65b   : > { %v2924_v59 = vadd.f32 %v5572_v1, %v2923_v17 }
 0x65c   : > { %v3872_v35 = vpop.f32.mrf.mxu0 }
 0x65d   : > { %v2960_v44 = vmul.f32 0.044715, %v2924_v59  ;;  %v2950_v8 = vmul.f32 0.5, %v2924_v59 }
 0x65e   : > { %v2926_v4 = vpop.f32.mrf.mxu0 }
 0x65f   : > { %v2970_v47 = vmul.f32 %v2960_v44, %v2924_v59  ;;  %v2927_v49 = vadd.f32 %v5572_v1, %v2926_v4 }
 0x660   : > { %v3873_v13 = vpop.f32.mrf.mxu0 }
 0x661   : > { %v2980_v24 = vmul.f32 %v2970_v47, %v2924_v59  ;;  %v2961_v22 = vmul.f32 0.044715, %v2927_v49  ;;  %v2951_v25 = vmul.f32 0.5, %v2927_v49 }
 0x662   : > { %v2931_v40 = vpop.f32.mrf.mxu0 }
 0x663   : > { %v2971_v34 = vmul.f32 %v2961_v22, %v2927_v49  ;;  %v2932_v3 = vadd.f32 %v5572_v1, %v2931_v40  ;;  %v2990_v31 = vadd.f32 %v2980_v24, %v2924_v59 }
 0x664   : > { %v3876_v15 = vpop.f32.mrf.mxu0 }
 0x665   : > { %v2981_v21 = vmul.f32 %v2971_v34, %v2927_v49  ;;  %v2962_v61 = vmul.f32 0.044715, %v2932_v3  ;;  %v3000_v62 = vmul.f32 0.7978846, %v2990_v31  ;;  %v2952_v12 = vmul.f32 0.5, %v2932_v3 }
 0x666   : > { %v2934_v41 = vpop.f32.mrf.mxu0 }
 0x667   : > { %v2972_v52 = vmul.f32 %v2962_v61, %v2932_v3  ;;  %v2935_v10 = vadd.f32 %v5572_v1, %v2934_v41  ;;  %v2991_v42 = vadd.f32 %v2981_v21, %v2927_v49  ;;  %4191 = vtanh.f32 %v3000_v62  ;;  %v4223_v61 = vld [vmem:[%s5355_s4] sm:$0xff] }
 0x668   : > { %v3877_v20 = vpop.f32.mrf.mxu0 }
 0x669   : > { %v2982_v57 = vmul.f32 %v2972_v52, %v2932_v3  ;;  %v2963_v28 = vmul.f32 0.044715, %v2935_v10  ;;  %v3001_v53 = vmul.f32 0.7978846, %v2991_v42  ;;  %v2953_v18 = vmul.f32 0.5, %v2935_v10 }
 0x66a   : > { %v2939_v33 = vpop.f32.mrf.mxu0 }
 0x66b   : > { %v2973_v27 = vmul.f32 %v2963_v28, %v2935_v10  ;;  %v2940_v58 = vadd.f32 %v5572_v1, %v2939_v33  ;;  %4193 = vtanh.f32 %v3001_v53  ;;  %v2992_v32 = vadd.f32 %v2982_v57, %v2932_v3  ;;  %v3593_v3 = vld [vmem:[%s5718_s14] ss:$0 sm:$0xff]  ;;  %v4225_v53 = vld [vmem:[%s5355_s4 + $0x10] sm:$0xff] }
 0x66c   : > { %v3880_v11 = vpop.f32.mrf.mxu0 }
 0x66d   : > { %v2983_v46 = vmul.f32 %v2973_v27, %v2935_v10  ;;  %v2964_v7 = vmul.f32 0.044715, %v2940_v58  ;;  %v3002_v55 = vmul.f32 0.7978846, %v2992_v32  ;;  %v2954_v49 = vmul.f32 0.5, %v2940_v58  ;;  %v4226_v11 = vld [vmem:[%s5355_s4 + $0x18] sm:$0xff] }
 0x66e   : > { %v2942_v30 = vpop.f32.mrf.mxu0 }
 0x66f   : > { %v2974_v36 = vmul.f32 %v2964_v7, %v2940_v58  ;;  %v2943_v37 = vadd.f32 %v5572_v1, %v2942_v30  ;;  %v2993_v51 = vadd.f32 %v2983_v46, %v2935_v10  ;;  %4195 = vtanh.f32 %v3002_v55  ;;  %v4224_v10 = vld [vmem:[%s5355_s4 + $0x8] sm:$0xff] }
 0x670   : > { %v3881_v2 = vpop.f32.mrf.mxu0 }
 0x671   : > { %v2984_v39 = vmul.f32 %v2974_v36, %v2940_v58  ;;  %v2965_v56 = vmul.f32 0.044715, %v2943_v37  ;;  %v3003_v23 = vmul.f32 0.7978846, %v2993_v51  ;;  %v2955_v13 = vmul.f32 0.5, %v2943_v37  ;;  %v4227_v36 = vld [vmem:[%s5355_s4 + $0x20] sm:$0xff] }
 0x673   : > { %v2975_v9 = vmul.f32 %v2965_v56, %v2943_v37  ;;  %4197 = vtanh.f32 %v3003_v23  ;;  %v2994_v5 = vadd.f32 %v2984_v39, %v2940_v58  ;;  %v4228_v56 = vld [vmem:[%s5355_s4 + $0x28] sm:$0xff] }
 0x674   : > { %v4192_v14 = vpop.eup %4191 }
 0x675   : > { %v2985_v29 = vmul.f32 %v2975_v9, %v2943_v37  ;;  %v3004_v19 = vmul.f32 0.7978846, %v2994_v5  ;;  %v3020_v45 = vadd.f32 1.0, %v4192_v14 }
 0x677   : > { %v2995_v60 = vadd.f32 %v2985_v29, %v2943_v37  ;;  %4199 = vtanh.f32 %v3004_v19  ;;  %v3030_v63 = vmul.f32 %v3020_v45, %v2950_v8  ;;  %v4229_v29 = vld [vmem:[%s5355_s4 + $0x30] sm:$0xff]  ;;  %v4230_v8 = vld [vmem:[%s5355_s4 + $0x38] sm:$0xff] }
 0x678   : > { %v4194_v50 = vpop.eup %4193 }
 0x679   : > { %v3021_v16 = vadd.f32 1.0, %v4194_v50  ;;  %v3005_v1 = vmul.f32 0.7978846, %v2995_v60 }
 0x67b   : > { %v3031_v6 = vmul.f32 %v3021_v16, %v2951_v25  ;;  %4201 = vtanh.f32 %v3005_v1 }
 0x67c   : > { %v4196_v54 = vpop.eup %4195 }
 0x67d   : > { %v3038_v48 = vpack.c.bf16 %v3031_v6, %v3030_v63  ;;  %v3022_v0 = vadd.f32 1.0, %v4196_v54  ;;  %v4231_v6 = vld [vmem:[%s5355_s4 + $0x40] sm:$0xff] }
 0x67f   : > { %3907 = vmatmul.mubr.bf16.gmra.mxu1 %v3038_v48  ;;  %v3032_v17 = vmul.f32 %v3022_v0, %v2952_v12  ;;  %v4232_v12 = vld [vmem:[%s5355_s4 + $0x48] sm:$0xff] }
 0x680   : > { %v4198_v38 = vpop.eup %4197  ;;  %3910 = vmatprep.mubr.msk.bf16.mxu1 %vm4243_vm0, %v4242_v26 }
 0x681   : > { %v3023_v43 = vadd.f32 1.0, %v4198_v38 }
 0x683   : > { %v3033_v35 = vmul.f32 %v3023_v43, %v2953_v18 }
 0x684   : > { %v4200_v59 = vpop.eup %4199 }
 0x685   : > { %v3039_v44 = vpack.c.bf16 %v3033_v35, %v3032_v17  ;;  %v3024_v4 = vadd.f32 1.0, %v4200_v59 }
 0x687   : > { %3911 = vmatmul.mubr.bf16.gmra.mxu1 %v3039_v44  ;;  %v3034_v22 = vmul.f32 %v3024_v4, %v2954_v49 }
 0x688   : > { %v4202_v47 = vpop.eup %4201  ;;  %3914 = vmatprep.mubr.msk.bf16.mxu1 %vm4243_vm0, %v4242_v26 }
 0x689   : > { %v3025_v24 = vadd.f32 1.0, %v4202_v47 }
 0x68b   : > { %v3035_v40 = vmul.f32 %v3025_v24, %v2955_v13 }
 0x68d   : > { %v3040_v34 = vpack.c.bf16 %v3035_v40, %v3034_v22 }
 0x68f   : > { %3915 = vmatmul.mubr.bf16.gmra.mxu1 %v3040_v34 }
 0x6f4   : > { %v3146_v31 = vpop.f32.mrf.mxu1 }
 0x6f5   : > { %v3147_v15 = vadd.f32 %v3593_v3, %v3146_v31 }
 0x6f6   : > { %v3900_v21 = vpop.f32.mrf.mxu1 }
 0x6f7   : > { %v3185_v62 = vadd.f32 %v4223_v61, %v3147_v15 }
 0x6f8   : > { %v3149_v41 = vpop.f32.mrf.mxu1 }
 0x6f9   : > { %v3150_v26 = vadd.f32 %v3593_v3, %v3149_v41  ;;  %3197 = vadd.xlane.f32.xlu1 %v3185_v62 }
 0x6fa   : > { %v3901_v52 = vpop.f32.mrf.mxu1 }
 0x6fb   : > { %v3186_v42 = vadd.f32 %v4224_v10, %v3150_v26 }
 0x6fc   : > { %v3154_v20 = vpop.f32.mrf.mxu1 }
 0x6fd   : > { %v3155_v57 = vadd.f32 %v3593_v3, %v3154_v20  ;;  %3199 = vadd.xlane.f32.xlu0 %v3186_v42 }
 0x6fe   : > { %v3904_v28 = vpop.f32.mrf.mxu1 }
 0x6ff   : > { %v3187_v33 = vadd.f32 %v4225_v53, %v3155_v57 }
 0x700   : > { %v3157_v27 = vpop.f32.mrf.mxu1 }
 0x701   : > { %v3158_v58 = vadd.f32 %v3593_v3, %v3157_v27  ;;  %3201 = vadd.xlane.f32.xlu0 %v3187_v33 }
 0x702   : > { %v3905_v32 = vpop.f32.mrf.mxu1 }
 0x703   : > { %v3188_v46 = vadd.f32 %v4226_v11, %v3158_v58 }
 0x705   : > { %3203 = vadd.xlane.f32.xlu1 %v3188_v46 }
 0x73f   : > { %v3162_v7 = vpop.f32.mrf.mxu1 }
 0x740   : > { %v3163_v55 = vadd.f32 %v3593_v3, %v3162_v7 }
 0x741   : > { %v3908_v30 = vpop.f32.mrf.mxu1 }
 0x742   : > { %v3189_v37 = vadd.f32 %v4227_v36, %v3163_v55 }
 0x743   : > { %v3165_v51 = vpop.f32.mrf.mxu1 }
 0x744   : > { %v3166_v2 = vadd.f32 %v3593_v3, %v3165_v51  ;;  %3205 = vadd.xlane.f32.xlu0 %v3189_v37 }
 0x745   : > { %v3909_v39 = vpop.f32.mrf.mxu1 }
 0x746   : > { %v3190_v23 = vadd.f32 %v4228_v56, %v3166_v2 }
 0x747   : > { %v3170_v9 = vpop.f32.mrf.mxu1 }
 0x748   : > { %v3171_v5 = vadd.f32 %v3593_v3, %v3170_v9  ;;  %3207 = vadd.xlane.f32.xlu1 %v3190_v23 }
 0x749   : > { %v3912_v14 = vpop.f32.mrf.mxu1 }
 0x74a   : > { %v3191_v19 = vadd.f32 %v4229_v29, %v3171_v5 }
 0x74b   : > { %v3173_v45 = vpop.f32.mrf.mxu1 }
 0x74c   : > { %v3174_v60 = vadd.f32 %v3593_v3, %v3173_v45  ;;  %3209 = vadd.xlane.f32.xlu0 %v3191_v19 }
 0x74d   : > { %v3913_v50 = vpop.f32.mrf.mxu1 }
 0x74e   : > { %v3192_v25 = vadd.f32 %v4230_v8, %v3174_v60 }
 0x74f   : > { %v3178_v16 = vpop.f32.mrf.mxu1 }
 0x750   : > { %v3179_v1 = vadd.f32 %v3593_v3, %v3178_v16  ;;  %3211 = vadd.xlane.f32.xlu1 %v3192_v25 }
 0x751   : > { %v3916_v63 = vpop.f32.mrf.mxu1 }
 0x752   : > { %v3193_v54 = vadd.f32 %v4231_v6, %v3179_v1  ;;  %v5654_v1 = vld [vmem:[%s5724_s20] ss:$0 sm:$0xff] }
 0x753   : > { %v3181_v48 = vpop.f32.mrf.mxu1 }
 0x754   : > { %v3182_v0 = vadd.f32 %v3593_v3, %v3181_v48  ;;  %3213 = vadd.xlane.f32.xlu0 %v3193_v54 }
 0x755   : > { %v3917_v38 = vpop.f32.mrf.mxu1 }
 0x756   : > { %v3194_v18 = vadd.f32 %v4232_v12, %v3182_v0 }
 0x758   : > { %3215 = vadd.xlane.f32.xlu1 %v3194_v18 }
 0x782   : > { %v3198_v43 = vpop.xlane.xlu1 %3197 }
 0x783   : > { %v3217_v17 = vmul.f32 0.0078125, %v3198_v43 }
 0x785   : > { %v5605_v35 = vsub.f32 %v3185_v62, %v3217_v17 }
 0x786   : > { %v3200_v59 = vpop.xlane.xlu0 %3199 }
 0x787   : > { %v3218_v44 = vmul.f32 0.0078125, %v3200_v59  ;;  %v3237_v4 = vmul.f32 %v5605_v35, %v5605_v35 }
 0x789   : > { %v5609_v47 = vsub.f32 %v3186_v42, %v3218_v44  ;;  %3247 = vadd.xlane.f32.xlu0 %v3237_v4 }
 0x78a   : > { %v3202_v49 = vpop.xlane.xlu0 %3201 }
 0x78b   : > { %v3219_v13 = vmul.f32 0.0078125, %v3202_v49  ;;  %v3238_v24 = vmul.f32 %v5609_v47, %v5609_v47 }
 0x78d   : > { %v5613_v22 = vsub.f32 %v3187_v33, %v3219_v13  ;;  %3249 = vadd.xlane.f32.xlu1 %v3238_v24 }
 0x78e   : > { %v3204_v40 = vpop.xlane.xlu1 %3203 }
 0x78f   : > { %v3220_v34 = vmul.f32 0.0078125, %v3204_v40  ;;  %v3239_v3 = vmul.f32 %v5613_v22, %v5613_v22 }
 0x791   : > { %v5617_v31 = vsub.f32 %v3188_v46, %v3220_v34  ;;  %3251 = vadd.xlane.f32.xlu0 %v3239_v3 }
 0x793   : > { %v3240_v15 = vmul.f32 %v5617_v31, %v5617_v31 }
 0x795   : > { %3253 = vadd.xlane.f32.xlu1 %v3240_v15 }
 0x7cd   : > { %v3206_v21 = vpop.xlane.xlu0 %3205 }
 0x7ce   : > { %v3221_v61 = vmul.f32 0.0078125, %v3206_v21 }
 0x7d0   : > { %v5621_v62 = vsub.f32 %v3189_v37, %v3221_v61 }
 0x7d1   : > { %v3208_v41 = vpop.xlane.xlu1 %3207 }
 0x7d2   : > { %v3222_v26 = vmul.f32 0.0078125, %v3208_v41  ;;  %v3241_v52 = vmul.f32 %v5621_v62, %v5621_v62 }
 0x7d4   : > { %v5625_v10 = vsub.f32 %v3190_v23, %v3222_v26  ;;  %3255 = vadd.xlane.f32.xlu0 %v3241_v52 }
 0x7d5   : > { %v3210_v42 = vpop.xlane.xlu0 %3209 }
 0x7d6   : > { %v3223_v20 = vmul.f32 0.0078125, %v3210_v42  ;;  %v3242_v57 = vmul.f32 %v5625_v10, %v5625_v10 }
 0x7d8   : > { %v5629_v28 = vsub.f32 %v3191_v19, %v3223_v20  ;;  %3257 = vadd.xlane.f32.xlu1 %v3242_v57 }
 0x7d9   : > { %v3212_v53 = vpop.xlane.xlu1 %3211 }
 0x7da   : > { %v3224_v33 = vmul.f32 0.0078125, %v3212_v53  ;;  %v3243_v27 = vmul.f32 %v5629_v28, %v5629_v28 }
 0x7dc   : > { %v5633_v58 = vsub.f32 %v3192_v25, %v3224_v33  ;;  %3259 = vadd.xlane.f32.xlu0 %v3243_v27  ;;  %v5648_v25 = vld [vmem:[%s5723_s19] ss:$0 sm:$0xff] }
 0x7dd   : > { %v3214_v32 = vpop.xlane.xlu0 %3213 }
 0x7de   : > { %v3225_v11 = vmul.f32 0.0078125, %v3214_v32  ;;  %v3244_v46 = vmul.f32 %v5633_v58, %v5633_v58 }
 0x7e0   : > { %v5637_v7 = vsub.f32 %v3193_v54, %v3225_v11  ;;  %3261 = vadd.xlane.f32.xlu1 %v3244_v46 }
 0x7e1   : > { %v3216_v55 = vpop.xlane.xlu1 %3215 }
 0x7e2   : > { %v3226_v30 = vmul.f32 0.0078125, %v3216_v55  ;;  %v3245_v36 = vmul.f32 %v5637_v7, %v5637_v7 }
 0x7e4   : > { %v5641_v37 = vsub.f32 %v3194_v18, %v3226_v30  ;;  %3263 = vadd.xlane.f32.xlu0 %v3245_v36 }
 0x7e6   : > { %v3246_v51 = vmul.f32 %v5641_v37, %v5641_v37 }
 0x7e8   : > { %3265 = vadd.xlane.f32.xlu1 %v3246_v51 }
 0x812   : > { %v3248_v2 = vpop.xlane.xlu0 %3247 }
 0x813   : > { %v3267_v39 = vmul.f32 0.0078125, %v3248_v2 }
 0x815   : > { %v3277_v56 = vadd.f32 1e-05, %v3267_v39 }
 0x816   : > { %v3250_v23 = vpop.xlane.xlu1 %3249 }
 0x817   : > { %4203 = vrsqrt.f32 %v3277_v56  ;;  %v3268_v9 = vmul.f32 0.0078125, %v3250_v23 }
 0x819   : > { %v3278_v5 = vadd.f32 1e-05, %v3268_v9 }
 0x81a   : > { %v3252_v14 = vpop.xlane.xlu0 %3251 }
 0x81b   : > { %4205 = vrsqrt.f32 %v3278_v5  ;;  %v3269_v29 = vmul.f32 0.0078125, %v3252_v14 }
 0x81d   : > { %v3279_v19 = vadd.f32 1e-05, %v3269_v29 }
 0x81e   : > { %v3254_v45 = vpop.xlane.xlu1 %3253 }
 0x81f   : > { %4207 = vrsqrt.f32 %v3279_v19  ;;  %v3270_v60 = vmul.f32 0.0078125, %v3254_v45 }
 0x821   : > { %v3280_v50 = vadd.f32 1e-05, %v3270_v60 }
 0x823   : > { %4209 = vrsqrt.f32 %v3280_v50 }
 0x824   : > { %v4204_v8 = vpop.eup %4203 }
 0x825   : > { %v3297_v16 = vmul.f32 %v4204_v8, %v5605_v35 }
 0x827   : > { %v3313_v63 = vmul.f32 %v5648_v25, %v3297_v16 }
 0x828   : > { %v4206_v6 = vpop.eup %4205 }
 0x829   : > { %v3329_v54 = vadd.f32 %v5654_v1, %v3313_v63  ;;  %v3298_v48 = vmul.f32 %v4206_v6, %v5609_v47 }
 0x82b   : > { %3339 = vst [vmem:[%s5661_s24] sm:$0xff] %v3329_v54  ;;  %v3314_v0 = vmul.f32 %v5648_v25, %v3298_v48 }
 0x82c   : > { %v4208_v38 = vpop.eup %4207 }
 0x82d   : > { %v3330_v12 = vadd.f32 %v5654_v1, %v3314_v0  ;;  %v3299_v18 = vmul.f32 %v4208_v38, %v5613_v22 }
 0x82f   : > { %3340 = vst [vmem:[%s5661_s24 + $0x8] sm:$0xff] %v3330_v12  ;;  %v3315_v43 = vmul.f32 %v5648_v25, %v3299_v18 }
 0x830   : > { %v4210_v17 = vpop.eup %4209 }
 0x831   : > { %v3331_v35 = vadd.f32 %v5654_v1, %v3315_v43  ;;  %v3300_v59 = vmul.f32 %v4210_v17, %v5617_v31 }
 0x833   : > { %3341 = vst [vmem:[%s5661_s24 + $0x10] sm:$0xff] %v3331_v35  ;;  %v3316_v44 = vmul.f32 %v5648_v25, %v3300_v59 }
 0x835   : > { %v3332_v4 = vadd.f32 %v5654_v1, %v3316_v44 }
 0x837   : > { %3342 = vst [vmem:[%s5661_s24 + $0x18] sm:$0xff] %v3332_v4 }
 0x85d   : > { %v3256_v47 = vpop.xlane.xlu0 %3255 }
 0x85e   : > { %v3271_v49 = vmul.f32 0.0078125, %v3256_v47 }
 0x860   : > { %v3281_v13 = vadd.f32 1e-05, %v3271_v49 }
 0x861   : > { %v3258_v24 = vpop.xlane.xlu1 %3257 }
 0x862   : > { %4211 = vrsqrt.f32 %v3281_v13  ;;  %v3272_v22 = vmul.f32 0.0078125, %v3258_v24 }
 0x864   : > { %v3282_v40 = vadd.f32 1e-05, %v3272_v22 }
 0x865   : > { %v3260_v34 = vpop.xlane.xlu0 %3259 }
 0x866   : > { %4213 = vrsqrt.f32 %v3282_v40  ;;  %v3273_v3 = vmul.f32 0.0078125, %v3260_v34 }
 0x868   : > { %v3283_v15 = vadd.f32 1e-05, %v3273_v3 }
 0x869   : > { %v3262_v21 = vpop.xlane.xlu1 %3261 }
 0x86a   : > { %4215 = vrsqrt.f32 %v3283_v15  ;;  %v3274_v31 = vmul.f32 0.0078125, %v3262_v21 }
 0x86c   : > { %v3284_v61 = vadd.f32 1e-05, %v3274_v31 }
 0x86d   : > { %v3264_v41 = vpop.xlane.xlu0 %3263 }
 0x86e   : > { %4217 = vrsqrt.f32 %v3284_v61  ;;  %v3275_v26 = vmul.f32 0.0078125, %v3264_v41 }
 0x86f   : > { %v4212_v52 = vpop.eup %4211 }
 0x870   : > { %v3301_v42 = vmul.f32 %v4212_v52, %v5621_v62  ;;  %v3285_v20 = vadd.f32 1e-05, %v3275_v26 }
 0x871   : > { %v3266_v57 = vpop.xlane.xlu1 %3265 }
 0x872   : > { %v3317_v53 = vmul.f32 %v5648_v25, %v3301_v42  ;;  %4219 = vrsqrt.f32 %v3285_v20  ;;  %v3276_v33 = vmul.f32 0.0078125, %v3266_v57 }
 0x873   : > { %v4214_v27 = vpop.eup %4213 }
 0x874   : > { %v3333_v32 = vadd.f32 %v5654_v1, %v3317_v53  ;;  %v3302_v11 = vmul.f32 %v4214_v27, %v5625_v10  ;;  %v3286_v46 = vadd.f32 1e-05, %v3276_v33 }
 0x876   : > { %3343 = vst [vmem:[%s5661_s24 + $0x20] sm:$0xff] %v3333_v32  ;;  %v3318_v55 = vmul.f32 %v5648_v25, %v3302_v11  ;;  %4221 = vrsqrt.f32 %v3286_v46 }
 0x877   : > { %v4216_v62 = vpop.eup %4215 }
 0x878   : > { %v3334_v30 = vadd.f32 %v5654_v1, %v3318_v55  ;;  %v3303_v36 = vmul.f32 %v4216_v62, %v5629_v28 }
 0x87a   : > { %3344 = vst [vmem:[%s5661_s24 + $0x28] sm:$0xff] %v3334_v30  ;;  %v3319_v51 = vmul.f32 %v5648_v25, %v3303_v36 }
 0x87b   : > { %v4218_v2 = vpop.eup %4217 }
 0x87c   : > { %v3335_v39 = vadd.f32 %v5654_v1, %v3319_v51  ;;  %v3304_v10 = vmul.f32 %v4218_v2, %v5633_v58 }
 0x87e   : > { %3345 = vst [vmem:[%s5661_s24 + $0x30] sm:$0xff] %v3335_v39  ;;  %v3320_v56 = vmul.f32 %v5648_v25, %v3304_v10 }
 0x87f   : > { %v4220_v23 = vpop.eup %4219 }
 0x880   : > { %v3336_v9 = vadd.f32 %v5654_v1, %v3320_v56  ;;  %v3305_v5 = vmul.f32 %v4220_v23, %v5637_v7 }
 0x882   : > { %3346 = vst [vmem:[%s5661_s24 + $0x38] sm:$0xff] %v3336_v9  ;;  %v3321_v28 = vmul.f32 %v5648_v25, %v3305_v5 }
 0x883   : > { %v4222_v14 = vpop.eup %4221 }
 0x884   : > { %v3337_v29 = vadd.f32 %v5654_v1, %v3321_v28  ;;  %v3306_v19 = vmul.f32 %v4222_v14, %v5641_v37 }
 0x886   : > { %3347 = vst [vmem:[%s5661_s24 + $0x40] sm:$0xff] %v3337_v29  ;;  %v3322_v45 = vmul.f32 %v5648_v25, %v3306_v19 }
 0x888   : > { %v3338_v58 = vadd.f32 %v5654_v1, %v3322_v45 }
 0x88a   : > { %3348 = vst [vmem:[%s5661_s24 + $0x48] sm:$0xff] %v3338_v58 }
 0x88b PF: > { %s33_s3 = sadd.s32 1, %s4239_s3  }
 0x88c   : > { %p30_p4 = scmp.ge.s32.totalorder %s33_s3, 4  }
 0x88e   :  { %32 = sbr.rel (!%p30_p4) target bundleno = 8 (0x8), region = 158 }

</bundles_post_ra>
